<compile_context>
chip_gen: v7x
topology: tpu7x:2x2x1
jax: 0.10.0
libtpu: 0.0.40
codegen_flags: <defaults>
</compile_context>

<pallas_src>
import functools
import math

import jax
import jax.numpy as jnp
from jax import lax
from jax.experimental import pallas as pl
from jax.experimental.pallas import tpu as pltpu

LEAKY = 0.1          # LEAKY_RATE
BN_EPS = 1e-5
BIG = 1e30
WN2_CH = 64          # IntraPatchCost out_channel (hard-coded in the reference module)
PEC_HIDDEN = 8       # PositionalEncodingFourier hidden_dim
PEC_TEMP = 10000.0


def _leaky(x):
    return jnp.where(x >= 0, x, LEAKY * x)


def _relu(x):
    return jnp.maximum(x, 0.0)


def _softmax(x, axis):
    m = jnp.max(x, axis=axis, keepdims=True)
    e = jnp.exp(x - m)
    return e / jnp.sum(e, axis=axis, keepdims=True)


def _pick_tile(n, cap=256):
    """Largest tile <= cap that divides n (multiple of 8 when possible)."""
    for t in range(min(cap, n), 0, -1):
        if n % t == 0 and (t % 8 == 0 or t == n):
            return t
    return n


def _const_spec(a):
    zeros = (0,) * a.ndim
    return pl.BlockSpec(a.shape, lambda b, i, _z=zeros: _z)


# --------------------------------------------------------------------------------------
# Kernel 1: KNN (ascending squared distance, ties -> smallest index).
# --------------------------------------------------------------------------------------
def _knn_kernel(q_ref, s_ref, idx_ref, *, nsample):
    q = q_ref[0]                                                    # (TM, 3)
    s = s_ref[0]                                                    # (Ns, 3)
    ns = s.shape[0]
    ones = jnp.ones((q.shape[0], 1), jnp.float32)
    ssq = jnp.sum(s * s, axis=1, keepdims=True)                     # (Ns, 1)
    # biased sq. distance: d[i,j] = |s_j|^2 - 2 q_i.s_j  (per-row |q_i|^2 dropped:
    # ordering over j is unchanged); single fused matmul, no transposes.
    d = lax.dot_general(jnp.concatenate([q, ones], axis=1),
                        jnp.concatenate([-2.0 * s, ssq], axis=1),
                        (((1,), (1,)), ((), ())),
                        preferred_element_type=jnp.float32)         # (TM, Ns)
    iota = lax.broadcasted_iota(jnp.int32, d.shape, 1)
    cols = []
    for _ in range(nsample):                                        # ascending selection
        minval = jnp.min(d, axis=1, keepdims=True)
        sel = jnp.min(jnp.where(d <= minval, iota, ns), axis=1, keepdims=True)
        cols.append(sel)
        d = jnp.where(iota == sel, BIG, d)
    idx_ref[0] = jnp.concatenate(cols, axis=1)                      # one (TM, K) store


def knn(query, support, nsample):
    """query (B, Nq, 3), support (B, Ns, 3) -> int32 (B, Nq, nsample)."""
    B, nq, _ = query.shape
    ns = support.shape[1]
    tm = _pick_tile(nq)
    return pl.pallas_call(
        functools.partial(_knn_kernel, nsample=nsample),
        out_shape=jax.ShapeDtypeStruct((B, nq, nsample), jnp.int32),
        grid=(B, nq // tm),
        in_specs=[pl.BlockSpec((1, tm, 3), lambda b, i: (b, i, 0)),
                  pl.BlockSpec((1, ns, 3), lambda b, i: (b, 0, 0))],
        out_specs=pl.BlockSpec((1, tm, nsample), lambda b, i: (b, i, 0)),
        compiler_params=pltpu.CompilerParams(
            dimension_semantics=("parallel", "parallel")),
    )(query, support)


# --------------------------------------------------------------------------------------
# Kernel 2: fused mlp_convs / mlp_convs2 / mlp_convs3 + KxK attention + point-to-patch.
# --------------------------------------------------------------------------------------
def _cost_kernel(p1_ref, g2_ref, g2w_ref, dxyz_ref, dxyzw_ref, *rest,
                 nlayers, nsample, attn_temp):
    nw = 2 * nlayers
    w1 = rest[0:nw]            # mlp_convs   (W, b) pairs
    w2 = rest[nw:2 * nw]       # mlp_convs2
    w3 = rest[2 * nw:3 * nw]   # mlp_convs3  (shared between both cost branches)
    out_ref = rest[3 * nw]

    k = nsample
    p1 = p1_ref[0]                                                  # (TM, D)
    tm, din = p1.shape
    g2 = g2_ref[0]                                                  # (TM*K, D)
    g2w = g2w_ref[0]
    dxyz = dxyz_ref[0]                                              # (TM*K, 3)
    dxyzw = dxyzw_ref[0]

    def mlp_tail(x, ws):
        for i in range(2, len(ws), 2):
            x = _leaky(jnp.dot(x, ws[i][...], preferred_element_type=jnp.float32)
                       + ws[i + 1][...])
        return x

    def branch12(grouped, ws):
        # layer 0 of cat([points1 (broadcast over K), grouped_points2]) via split weight:
        # the points1 part is computed on TM rows only and broadcast over K.
        w0, b0 = ws[0][...], ws[1][...]
        h_p = jnp.dot(p1, w0[:din], preferred_element_type=jnp.float32) + b0   # (TM, C0)
        h_g = jnp.dot(grouped, w0[din:], preferred_element_type=jnp.float32)   # (TM*K,C0)
        c0 = h_p.shape[-1]
        h = _leaky(h_g.reshape(tm, k, c0) + h_p[:, None, :]).reshape(tm * k, c0)
        return mlp_tail(h, ws)

    def branch3(feat, dxy, ws):
        # layer 0 of cat([features, direction_xyz]) via split weight (no concat needed).
        w0, b0 = ws[0][...], ws[1][...]
        cf = feat.shape[-1]
        h = _leaky(jnp.dot(feat, w0[:cf], preferred_element_type=jnp.float32)
                   + jnp.dot(dxy, w0[cf:], preferred_element_type=jnp.float32) + b0)
        return mlp_tail(h, ws)

    np_ = branch12(g2, w1)                                          # "new_points"
    npw = branch12(g2w, w2)                                         # "new_pointsw"
    npc = branch3(np_, dxyz, w3)                                    # "new_points_cost"
    npwc = branch3(npw, dxyzw, w3)                                  # "new_pointsw_cost"

    c = np_.shape[-1]
    np3 = np_.reshape(tm, k, c)
    npw3 = npw.reshape(tm, k, c)
    # weight_qk[n,k,l] = <new_points[n,k,:], new_pointsw[n,l,:]> / attn_temp
    wqk = jnp.sum(np3[:, :, None, :] * npw3[:, None, :, :], axis=-1) / attn_temp  # (TM,K,K)
    w = _softmax(wqk, axis=1) * _softmax(wqk, axis=2)
    wsum_l = jnp.sum(w, axis=2)                                     # (TM, K): sum over l
    wsum_k = jnp.sum(w, axis=1)                                     # (TM, K): sum over k

    npc3 = npc.reshape(tm, k, c)
    npwc3 = npwc.reshape(tm, k, c)
    # point_to_patch_cost  = sum_{k,l} npc[n,k,c]  * wqk[n,k,l]
    # point_to_patch_costw = sum_{k,l} npwc[n,l,c] * wqk[n,k,l]
    ptp = jnp.sum(npc3 * wsum_l[:, :, None], axis=1)                # (TM, C)
    ptpw = jnp.sum(npwc3 * wsum_k[:, :, None], axis=1)              # (TM, C)
    out_ref[0] = jnp.concatenate([ptp, ptpw], axis=-1)              # lane-dense (TM, 2C)


def cost_volume(p1, g2, g2w, dxyz, dxyzw, params):
    B, n1, din = p1.shape
    k = params["nsample"]
    convs1, convs2, convs3 = params["convs1"], params["convs2"], params["convs3"]
    c = convs1[-1][0].shape[-1]
    tm = _pick_tile(n1)
    wargs = []
    for stack in (convs1, convs2, convs3):
        for (w, b) in stack:
            wargs += [w, b]
    g2f = g2.reshape(B, n1 * k, din)
    g2wf = g2w.reshape(B, n1 * k, din)
    dxf = dxyz.reshape(B, n1 * k, 3)
    dxwf = dxyzw.reshape(B, n1 * k, 3)
    kern = functools.partial(_cost_kernel, nlayers=len(convs1), nsample=k,
                             attn_temp=float(params["attn_temp"]))
    in_specs = ([pl.BlockSpec((1, tm, din), lambda b, i: (b, i, 0)),
                 pl.BlockSpec((1, tm * k, din), lambda b, i: (b, i, 0)),
                 pl.BlockSpec((1, tm * k, din), lambda b, i: (b, i, 0)),
                 pl.BlockSpec((1, tm * k, 3), lambda b, i: (b, i, 0)),
                 pl.BlockSpec((1, tm * k, 3), lambda b, i: (b, i, 0))]
                + [_const_spec(a) for a in wargs])
    return pl.pallas_call(
        kern,
        out_shape=jax.ShapeDtypeStruct((B, n1, 2 * c), jnp.float32),
        grid=(B, n1 // tm),
        in_specs=in_specs,
        out_specs=pl.BlockSpec((1, tm, 2 * c), lambda b, i: (b, i, 0)),
        compiler_params=pltpu.CompilerParams(
            dimension_semantics=("parallel", "parallel")),
    )(p1, g2f, g2wf, dxf, dxwf, *wargs)


# --------------------------------------------------------------------------------------
# Kernel 3: weightnet2 (IntraPatchCost, BN folded) + mlp_convs4 + weighted neighbor sum.
# --------------------------------------------------------------------------------------
def _final_kernel(sdir_ref, gc_ref, e1w, e1b, e2w, e2b, fmat, pjw, pjb,
                  m1w, m1b, m2w, m2b, m3w, m3b, m4w, m4b, *rest,
                  nlayers, nsample, voxel_size):
    c4 = rest[:2 * nlayers]
    out_ref = rest[2 * nlayers]

    k = nsample
    pd = sdir_ref[0]                                                # (TM*K, 3)
    gc = gc_ref[0]                                                  # (TM*K, 2C)
    tmk = pd.shape[0]
    tm = tmk // k

    # ---- weightnet2 (eval-mode BatchNorm folded into the preceding linears) ----
    r = voxel_size
    dis_voxel = jnp.round(pd / r)
    pe_raw = (pd - dis_voxel * r) / r                               # (TM*K, 3)
    # (valid_scatter is computed but never used in the reference forward -> omitted)

    h = _relu(jnp.dot(pd, e1w[...], preferred_element_type=jnp.float32) + e1b[...])
    inp = jnp.dot(h, e2w[...], preferred_element_type=jnp.float32) + e2b[...]    # (TM*K,64)

    # Fourier PE: 24 phases via one small matmul; sin on even lanes, cos on odd lanes.
    phase = jnp.dot(pe_raw, fmat[...], preferred_element_type=jnp.float32)       # (TM*K,24)
    parity = lax.broadcasted_iota(jnp.int32, phase.shape, 1) & 1
    enc = jnp.where(parity == 0, jnp.sin(phase), jnp.cos(phase))
    pec = jnp.dot(enc, pjw[...], preferred_element_type=jnp.float32) + pjb[...]  # (TM*K,64)

    x = inp + pec
    x = _relu(jnp.dot(x, m1w[...], preferred_element_type=jnp.float32) + m1b[...])
    x = _relu(jnp.dot(x, m2w[...], preferred_element_type=jnp.float32) + m2b[...])
    x = jnp.dot(x, m3w[...], preferred_element_type=jnp.float32) + m3b[...]      # (TM*K,32)
    score = jnp.dot(x, m4w[...], preferred_element_type=jnp.float32) + m4b[...]  # (TM*K,1)
    attn = _softmax(score.reshape(tm, k, 1), axis=1)                # softmax over K

    # ---- mlp_convs4 on cat([grouped cost, grouped costw]) ----
    y = gc
    for i in range(0, 2 * nlayers, 2):
        y = _leaky(jnp.dot(y, c4[i][...], preferred_element_type=jnp.float32)
                   + c4[i + 1][...])
    cc = y.shape[-1]
    out_ref[0] = jnp.sum(attn * y.reshape(tm, k, cc), axis=1)       # (TM, Cout)


def patch_aggregate(sdir, gcost, params):
    B, n1, k, c2 = gcost.shape
    tm = _pick_tile(n1)
    convs4 = params["convs4"]
    cout = convs4[-1][0].shape[-1]
    wn = params["wn2"]
    wn_args = [wn["emb1_w"], wn["emb1_b"], wn["emb2_w"], wn["emb2_b"], wn["fmat"],
               wn["proj_w"], wn["proj_b"], wn["pm1_w"], wn["pm1_b"],
               wn["pm2_w"], wn["pm2_b"], wn["pm3_w"], wn["pm3_b"],
               wn["pm4_w"], wn["pm4_b"]]
    c4_args = []
    for (w, b) in convs4:
        c4_args += [w, b]
    sd = sdir.reshape(B, n1 * k, 3)
    gc = gcost.reshape(B, n1 * k, c2)
    kern = functools.partial(_final_kernel, nlayers=len(convs4), nsample=k,
                             voxel_size=float(params["voxel_size"]))
    in_specs = ([pl.BlockSpec((1, tm * k, 3), lambda b, i: (b, i, 0)),
                 pl.BlockSpec((1, tm * k, c2), lambda b, i: (b, i, 0))]
                + [_const_spec(a) for a in wn_args]
                + [_const_spec(a) for a in c4_args])
    return pl.pallas_call(
        kern,
        out_shape=jax.ShapeDtypeStruct((B, n1, cout), jnp.float32),
        grid=(B, n1 // tm),
        in_specs=in_specs,
        out_specs=pl.BlockSpec((1, tm, cout), lambda b, i: (b, i, 0)),
        compiler_params=pltpu.CompilerParams(
            dimension_semantics=("parallel", "parallel")),
    )(sd, gc, *wn_args, *c4_args)


# --------------------------------------------------------------------------------------
# Glue: gathers between kernel stages + top-level forward (PyTorch layouts in/out).
# --------------------------------------------------------------------------------------
def _gather_rows(x, idx):
    """x (B, N, C), idx (B, M, K) int32 -> (B, M, K, C)."""
    return jax.vmap(lambda xb, ib: xb[ib])(x, idx)


def pointconv_trans_flow_v3_forward(params, xyz1, xyz2, xyz2w, points1, points2, sf=None):
    """xyz* (B,3,N), points* (B,D,N), sf (B,3,N1) or None -> (B, mlp[-1], N1)."""
    x1 = jnp.transpose(xyz1, (0, 2, 1)).astype(jnp.float32)
    x2 = jnp.transpose(xyz2, (0, 2, 1)).astype(jnp.float32)
    x2w = x2 if xyz2w is None else jnp.transpose(xyz2w, (0, 2, 1)).astype(jnp.float32)
    p1 = jnp.transpose(points1, (0, 2, 1)).astype(jnp.float32)
    p2 = jnp.transpose(points2, (0, 2, 1)).astype(jnp.float32)
    k = params["nsample"]

    if sf is not None and params["use_flow"]:
        q1 = x1 + jnp.transpose(sf, (0, 2, 1)).astype(jnp.float32)
    else:
        q1 = x1
    idx1 = knn(q1, x2, k)                                           # neighbors in xyz2
    idxw = knn(x1, x2w, k)                                          # neighbors in xyz2w
    idxs = knn(x1, x1, k)                                           # self neighbors

    g2 = _gather_rows(p2, idx1)                                     # (B,N1,K,D)
    g2w = _gather_rows(p2, idxw)
    dxyz = _gather_rows(x2, idx1) - x1[:, :, None, :]               # direction_xyz
    dxyzw = _gather_rows(x2, idxw) - x1[:, :, None, :]              # (ref gathers xyz2)

    ptp = cost_volume(p1, g2, g2w, dxyz, dxyzw, params)             # (B, N1, 2C)

    gcost = _gather_rows(ptp, idxs)                                 # (B, N1, K, 2C)
    sdir = _gather_rows(x1, idxs) - x1[:, :, None, :]               # (B, N1, K, 3)

    out = patch_aggregate(sdir, gcost, params)                      # (B, N1, Cout)
    return jnp.transpose(out, (0, 2, 1))                            # (B, Cout, N1)


# --------------------------------------------------------------------------------------
# Deterministic synthetic parameters (BatchNorms inside IntraPatchCost folded, eval mode).
# --------------------------------------------------------------------------------------
def init_params(key, nsample, in_channel, mlp, voxel_size=0.25, resolution=6,
                attn_temp=1.0, use_flow=True):
    del resolution  # only used for the unused valid_scatter mask in the reference
    keys = iter(jax.random.split(key, 256))

    def lin(cin, cout, fold_bn=False, scale=0.1):
        w = scale * jax.random.normal(next(keys), (cin, cout), jnp.float32)
        b = scale * jax.random.normal(next(keys), (1, cout), jnp.float32)
        if fold_bn:  # eval-mode BatchNorm folded: y = (xW+b)*s + t
            gamma = 1.0 + 0.1 * jax.random.normal(next(keys), (cout,), jnp.float32)
            beta = 0.1 * jax.random.normal(next(keys), (cout,), jnp.float32)
            rmean = 0.1 * jax.random.normal(next(keys), (cout,), jnp.float32)
            rvar = 1.0 + 0.1 * jnp.abs(jax.random.normal(next(keys), (cout,), jnp.float32))
            s = gamma / jnp.sqrt(rvar + BN_EPS)
            t = beta - rmean * s
            w = w * s[None, :]
            b = b * s[None, :] + t[None, :]
        return w, b

    def conv_stack(cin, outs):
        layers, last = [], cin
        for c in outs:
            layers.append(lin(last, c))
            last = c
        return layers

    p = {"nsample": int(nsample), "attn_temp": float(attn_temp),
         "voxel_size": float(voxel_size), "use_flow": bool(use_flow), "mlp": list(mlp)}
    p["convs1"] = conv_stack(2 * in_channel, mlp)        # mlp_convs
    p["convs2"] = conv_stack(2 * in_channel, mlp)        # mlp_convs2
    p["convs3"] = conv_stack(mlp[-1] + 3, mlp)           # mlp_convs3 (shared)
    p["convs4"] = conv_stack(2 * mlp[-1], mlp)           # mlp_convs4

    ch, hidden = WN2_CH, PEC_HIDDEN
    e1 = lin(3, ch, fold_bn=True)
    e2 = lin(ch, ch)
    proj = lin(3 * hidden, ch)
    pm1 = lin(ch, ch, fold_bn=True)
    pm2 = lin(ch, ch, fold_bn=True)
    pm3 = lin(ch, ch // 2, fold_bn=True)
    pm4 = lin(ch // 2, 1, fold_bn=True)
    j = jnp.arange(hidden, dtype=jnp.float32)
    dim_t = jnp.power(PEC_TEMP, 2.0 * jnp.floor(j / 2.0) / hidden)
    row = (2.0 * math.pi / (1.0 + 1e-6)) / dim_t                    # scale folded in
    fmat = jnp.zeros((3, 3 * hidden), jnp.float32)
    for c in range(3):
        fmat = fmat.at[c, c * hidden:(c + 1) * hidden].set(row)
    p["wn2"] = {"emb1_w": e1[0], "emb1_b": e1[1], "emb2_w": e2[0], "emb2_b": e2[1],
                "fmat": fmat, "proj_w": proj[0], "proj_b": proj[1],
                "pm1_w": pm1[0], "pm1_b": pm1[1], "pm2_w": pm2[0], "pm2_b": pm2[1],
                "pm3_w": pm3[0], "pm3_b": pm3[1], "pm4_w": pm4[0], "pm4_b": pm4[1]}
    return p


# --------------------------------------------------------------------------------------
if __name__ == "__main__":
    B, N1, N2 = 2, 128, 128
    in_channel, nsample = 16, 8
    mlp = [32, 32]

    key = jax.random.PRNGKey(0)
    ks = jax.random.split(key, 7)
    xyz1 = jax.random.normal(ks[0], (B, 3, N1), jnp.float32)
    xyz2 = jax.random.normal(ks[1], (B, 3, N2), jnp.float32)
    xyz2w = xyz2 + 0.05 * jax.random.normal(ks[2], (B, 3, N2), jnp.float32)
    points1 = jax.random.normal(ks[3], (B, in_channel, N1), jnp.float32)
    points2 = jax.random.normal(ks[4], (B, in_channel, N2), jnp.float32)
    sf = 0.1 * jax.random.normal(ks[5], (B, 3, N1), jnp.float32)

    params = init_params(ks[6], nsample, in_channel, mlp)

    out = pointconv_trans_flow_v3_forward(params, xyz1, xyz2, xyz2w, points1, points2, sf)
    jax.block_until_ready(out)
    assert out.shape == (B, mlp[-1], N1)
    assert bool(jnp.all(jnp.isfinite(out)))
    print("KERNEL_OK")
</pallas_src>

<mosaic_0001>
module attributes {stable_mosaic.version = 11 : i64} {
  func.func @_knn_kernel(%arg0: i32, %arg1: i32, %arg2: memref<1x128x3xf32, #tpu.memory_space<vmem>>, %arg3: memref<1x128x3xf32, #tpu.memory_space<vmem>>, %arg4: memref<1x128x8xi32, #tpu.memory_space<vmem>>) attributes {dimension_semantics = [#tpu.dimension_semantics<parallel>, #tpu.dimension_semantics<parallel>], iteration_bounds = array<i64: 2, 1>, scalar_prefetch = 0 : i64, scratch_operands = 0 : i64, tpu.core_type = #tpu.core_type<tc>, window_params = [{transform_indices = @transform_0, window_bounds = array<i64: 1, 128, 3>}, {transform_indices = @transform_1, window_bounds = array<i64: 1, 128, 3>}, {transform_indices = @transform_2, window_bounds = array<i64: 1, 128, 8>}]} {
    %c0 = arith.constant 0 : index
    %c0_0 = arith.constant 0 : index
    %c0_1 = arith.constant 0 : index
    %0 = vector.load %arg2[%c0, %c0_0, %c0_1] : memref<1x128x3xf32, #tpu.memory_space<vmem>>, vector<1x128x3xf32>
    %1 = vector.shape_cast %0 : vector<1x128x3xf32> to vector<128x3xf32>
    %c0_2 = arith.constant 0 : index
    %c0_3 = arith.constant 0 : index
    %c0_4 = arith.constant 0 : index
    %2 = vector.load %arg3[%c0_2, %c0_3, %c0_4] : memref<1x128x3xf32, #tpu.memory_space<vmem>>, vector<1x128x3xf32>
    %3 = vector.shape_cast %2 : vector<1x128x3xf32> to vector<128x3xf32>
    %cst = arith.constant 1.000000e+00 : f32
    %4 = vector.broadcast %cst : f32 to vector<128x1xf32>
    %5 = arith.mulf %3, %3 : vector<128x3xf32>
    %cst_5 = arith.constant dense<0.000000e+00> : vector<128xf32>
    %6 = vector.multi_reduction <add>, %5, %cst_5 [1] : vector<128x3xf32> to vector<128xf32>
    %7 = vector.shape_cast %6 : vector<128xf32> to vector<128x1xf32>
    %8 = tpu.concatenate %1, %4 in 1 : vector<128x3xf32>, vector<128x1xf32> -> vector<128x4xf32>
    %cst_6 = arith.constant -2.000000e+00 : f32
    %9 = vector.broadcast %cst_6 : f32 to vector<128x3xf32>
    %10 = arith.mulf %9, %3 : vector<128x3xf32>
    %11 = tpu.concatenate %10, %7 in 1 : vector<128x3xf32>, vector<128x1xf32> -> vector<128x4xf32>
    %cst_7 = arith.constant dense<0.000000e+00> : vector<128x128xf32>
    %12 = tpu.matmul %8, %11, %cst_7 {dimension_numbers = #tpu.dot_dimension_numbers<[1], [1], [0], [0], [0, 0, 1, 0], [], []>} : vector<128x4xf32>, vector<128x4xf32>, vector<128x128xf32> -> vector<128x128xf32>
    %13 = tpu.iota {dimensions = array<i32: 1>} : vector<128x128xi32>
    %cst_8 = arith.constant dense<0x7F800000> : vector<128xf32>
    %14 = vector.multi_reduction <minimumf>, %12, %cst_8 [1] : vector<128x128xf32> to vector<128xf32>
    %15 = vector.shape_cast %14 : vector<128xf32> to vector<128x1xf32>
    %16 = vector.broadcast %15 : vector<128x1xf32> to vector<128x128xf32>
    %17 = arith.cmpf ole, %12, %16 : vector<128x128xf32>
    %c128_i32 = arith.constant 128 : i32
    %18 = vector.broadcast %c128_i32 : i32 to vector<128x128xi32>
    %19 = arith.select %17, %13, %18 : vector<128x128xi1>, vector<128x128xi32>
    %cst_9 = arith.constant dense<2147483647> : vector<128xi32>
    %20 = vector.multi_reduction <minsi>, %19, %cst_9 [1] : vector<128x128xi32> to vector<128xi32>
    %21 = vector.shape_cast %20 : vector<128xi32> to vector<128x1xi32>
    %22 = vector.broadcast %21 : vector<128x1xi32> to vector<128x128xi32>
    %23 = arith.cmpi eq, %13, %22 : vector<128x128xi32>
    %cst_10 = arith.constant 1.000000e+30 : f32
    %24 = vector.broadcast %cst_10 : f32 to vector<128x128xf32>
    %25 = arith.select %23, %24, %12 : vector<128x128xi1>, vector<128x128xf32>
    %cst_11 = arith.constant dense<0x7F800000> : vector<128xf32>
    %26 = vector.multi_reduction <minimumf>, %25, %cst_11 [1] : vector<128x128xf32> to vector<128xf32>
    %27 = vector.shape_cast %26 : vector<128xf32> to vector<128x1xf32>
    %28 = vector.broadcast %27 : vector<128x1xf32> to vector<128x128xf32>
    %29 = arith.cmpf ole, %25, %28 : vector<128x128xf32>
    %c128_i32_12 = arith.constant 128 : i32
    %30 = vector.broadcast %c128_i32_12 : i32 to vector<128x128xi32>
    %31 = arith.select %29, %13, %30 : vector<128x128xi1>, vector<128x128xi32>
    %cst_13 = arith.constant dense<2147483647> : vector<128xi32>
    %32 = vector.multi_reduction <minsi>, %31, %cst_13 [1] : vector<128x128xi32> to vector<128xi32>
    %33 = vector.shape_cast %32 : vector<128xi32> to vector<128x1xi32>
    %34 = vector.broadcast %33 : vector<128x1xi32> to vector<128x128xi32>
    %35 = arith.cmpi eq, %13, %34 : vector<128x128xi32>
    %cst_14 = arith.constant 1.000000e+30 : f32
    %36 = vector.broadcast %cst_14 : f32 to vector<128x128xf32>
    %37 = arith.select %35, %36, %25 : vector<128x128xi1>, vector<128x128xf32>
    %cst_15 = arith.constant dense<0x7F800000> : vector<128xf32>
    %38 = vector.multi_reduction <minimumf>, %37, %cst_15 [1] : vector<128x128xf32> to vector<128xf32>
    %39 = vector.shape_cast %38 : vector<128xf32> to vector<128x1xf32>
    %40 = vector.broadcast %39 : vector<128x1xf32> to vector<128x128xf32>
    %41 = arith.cmpf ole, %37, %40 : vector<128x128xf32>
    %c128_i32_16 = arith.constant 128 : i32
    %42 = vector.broadcast %c128_i32_16 : i32 to vector<128x128xi32>
    %43 = arith.select %41, %13, %42 : vector<128x128xi1>, vector<128x128xi32>
    %cst_17 = arith.constant dense<2147483647> : vector<128xi32>
    %44 = vector.multi_reduction <minsi>, %43, %cst_17 [1] : vector<128x128xi32> to vector<128xi32>
    %45 = vector.shape_cast %44 : vector<128xi32> to vector<128x1xi32>
    %46 = vector.broadcast %45 : vector<128x1xi32> to vector<128x128xi32>
    %47 = arith.cmpi eq, %13, %46 : vector<128x128xi32>
    %cst_18 = arith.constant 1.000000e+30 : f32
    %48 = vector.broadcast %cst_18 : f32 to vector<128x128xf32>
    %49 = arith.select %47, %48, %37 : vector<128x128xi1>, vector<128x128xf32>
    %cst_19 = arith.constant dense<0x7F800000> : vector<128xf32>
    %50 = vector.multi_reduction <minimumf>, %49, %cst_19 [1] : vector<128x128xf32> to vector<128xf32>
    %51 = vector.shape_cast %50 : vector<128xf32> to vector<128x1xf32>
    %52 = vector.broadcast %51 : vector<128x1xf32> to vector<128x128xf32>
    %53 = arith.cmpf ole, %49, %52 : vector<128x128xf32>
    %c128_i32_20 = arith.constant 128 : i32
    %54 = vector.broadcast %c128_i32_20 : i32 to vector<128x128xi32>
    %55 = arith.select %53, %13, %54 : vector<128x128xi1>, vector<128x128xi32>
    %cst_21 = arith.constant dense<2147483647> : vector<128xi32>
    %56 = vector.multi_reduction <minsi>, %55, %cst_21 [1] : vector<128x128xi32> to vector<128xi32>
    %57 = vector.shape_cast %56 : vector<128xi32> to vector<128x1xi32>
    %58 = vector.broadcast %57 : vector<128x1xi32> to vector<128x128xi32>
    %59 = arith.cmpi eq, %13, %58 : vector<128x128xi32>
    %cst_22 = arith.constant 1.000000e+30 : f32
    %60 = vector.broadcast %cst_22 : f32 to vector<128x128xf32>
    %61 = arith.select %59, %60, %49 : vector<128x128xi1>, vector<128x128xf32>
    %cst_23 = arith.constant dense<0x7F800000> : vector<128xf32>
    %62 = vector.multi_reduction <minimumf>, %61, %cst_23 [1] : vector<128x128xf32> to vector<128xf32>
    %63 = vector.shape_cast %62 : vector<128xf32> to vector<128x1xf32>
    %64 = vector.broadcast %63 : vector<128x1xf32> to vector<128x128xf32>
    %65 = arith.cmpf ole, %61, %64 : vector<128x128xf32>
    %c128_i32_24 = arith.constant 128 : i32
    %66 = vector.broadcast %c128_i32_24 : i32 to vector<128x128xi32>
    %67 = arith.select %65, %13, %66 : vector<128x128xi1>, vector<128x128xi32>
    %cst_25 = arith.constant dense<2147483647> : vector<128xi32>
    %68 = vector.multi_reduction <minsi>, %67, %cst_25 [1] : vector<128x128xi32> to vector<128xi32>
    %69 = vector.shape_cast %68 : vector<128xi32> to vector<128x1xi32>
    %70 = vector.broadcast %69 : vector<128x1xi32> to vector<128x128xi32>
    %71 = arith.cmpi eq, %13, %70 : vector<128x128xi32>
    %cst_26 = arith.constant 1.000000e+30 : f32
    %72 = vector.broadcast %cst_26 : f32 to vector<128x128xf32>
    %73 = arith.select %71, %72, %61 : vector<128x128xi1>, vector<128x128xf32>
    %cst_27 = arith.constant dense<0x7F800000> : vector<128xf32>
    %74 = vector.multi_reduction <minimumf>, %73, %cst_27 [1] : vector<128x128xf32> to vector<128xf32>
    %75 = vector.shape_cast %74 : vector<128xf32> to vector<128x1xf32>
    %76 = vector.broadcast %75 : vector<128x1xf32> to vector<128x128xf32>
    %77 = arith.cmpf ole, %73, %76 : vector<128x128xf32>
    %c128_i32_28 = arith.constant 128 : i32
    %78 = vector.broadcast %c128_i32_28 : i32 to vector<128x128xi32>
    %79 = arith.select %77, %13, %78 : vector<128x128xi1>, vector<128x128xi32>
    %cst_29 = arith.constant dense<2147483647> : vector<128xi32>
    %80 = vector.multi_reduction <minsi>, %79, %cst_29 [1] : vector<128x128xi32> to vector<128xi32>
    %81 = vector.shape_cast %80 : vector<128xi32> to vector<128x1xi32>
    %82 = vector.broadcast %81 : vector<128x1xi32> to vector<128x128xi32>
    %83 = arith.cmpi eq, %13, %82 : vector<128x128xi32>
    %cst_30 = arith.constant 1.000000e+30 : f32
    %84 = vector.broadcast %cst_30 : f32 to vector<128x128xf32>
    %85 = arith.select %83, %84, %73 : vector<128x128xi1>, vector<128x128xf32>
    %cst_31 = arith.constant dense<0x7F800000> : vector<128xf32>
    %86 = vector.multi_reduction <minimumf>, %85, %cst_31 [1] : vector<128x128xf32> to vector<128xf32>
    %87 = vector.shape_cast %86 : vector<128xf32> to vector<128x1xf32>
    %88 = vector.broadcast %87 : vector<128x1xf32> to vector<128x128xf32>
    %89 = arith.cmpf ole, %85, %88 : vector<128x128xf32>
    %c128_i32_32 = arith.constant 128 : i32
    %90 = vector.broadcast %c128_i32_32 : i32 to vector<128x128xi32>
    %91 = arith.select %89, %13, %90 : vector<128x128xi1>, vector<128x128xi32>
    %cst_33 = arith.constant dense<2147483647> : vector<128xi32>
    %92 = vector.multi_reduction <minsi>, %91, %cst_33 [1] : vector<128x128xi32> to vector<128xi32>
    %93 = vector.shape_cast %92 : vector<128xi32> to vector<128x1xi32>
    %94 = vector.broadcast %93 : vector<128x1xi32> to vector<128x128xi32>
    %95 = arith.cmpi eq, %13, %94 : vector<128x128xi32>
    %cst_34 = arith.constant 1.000000e+30 : f32
    %96 = vector.broadcast %cst_34 : f32 to vector<128x128xf32>
    %97 = arith.select %95, %96, %85 : vector<128x128xi1>, vector<128x128xf32>
    %cst_35 = arith.constant dense<0x7F800000> : vector<128xf32>
    %98 = vector.multi_reduction <minimumf>, %97, %cst_35 [1] : vector<128x128xf32> to vector<128xf32>
    %99 = vector.shape_cast %98 : vector<128xf32> to vector<128x1xf32>
    %100 = vector.broadcast %99 : vector<128x1xf32> to vector<128x128xf32>
    %101 = arith.cmpf ole, %97, %100 : vector<128x128xf32>
    %c128_i32_36 = arith.constant 128 : i32
    %102 = vector.broadcast %c128_i32_36 : i32 to vector<128x128xi32>
    %103 = arith.select %101, %13, %102 : vector<128x128xi1>, vector<128x128xi32>
    %cst_37 = arith.constant dense<2147483647> : vector<128xi32>
    %104 = vector.multi_reduction <minsi>, %103, %cst_37 [1] : vector<128x128xi32> to vector<128xi32>
    %105 = vector.shape_cast %104 : vector<128xi32> to vector<128x1xi32>
    %106 = tpu.concatenate %21, %33, %45, %57, %69, %81, %93, %105 in 1 : vector<128x1xi32>, vector<128x1xi32>, vector<128x1xi32>, vector<128x1xi32>, vector<128x1xi32>, vector<128x1xi32>, vector<128x1xi32>, vector<128x1xi32> -> vector<128x8xi32>
    %c0_38 = arith.constant 0 : index
    %c0_39 = arith.constant 0 : index
    %c0_40 = arith.constant 0 : index
    %107 = vector.load %arg4[%c0_38, %c0_39, %c0_40] : memref<1x128x8xi32, #tpu.memory_space<vmem>>, vector<1x128x8xi32>
    %108 = vector.shape_cast %107 : vector<1x128x8xi32> to vector<128x8xi32>
    %109 = vector.shape_cast %106 : vector<128x8xi32> to vector<1x128x8xi32>
    tpu.vector_store %arg4[%c0_38, %c0_39, %c0_40], %109 {strides = array<i32>} : memref<1x128x8xi32, #tpu.memory_space<vmem>>, vector<1x128x8xi32>,
    return
  }
  func.func @transform_0(%arg0: i32, %arg1: i32) -> (i32, i32, i32) {
    %c0_i32 = arith.constant 0 : i32
    %c0_i32_0 = arith.constant 0 : i32
    return %arg0, %arg1, %c0_i32 : i32, i32, i32
  }
  func.func @transform_1(%arg0: i32, %arg1: i32) -> (i32, i32, i32) {
    %c0_i32 = arith.constant 0 : i32
    %c0_i32_0 = arith.constant 0 : i32
    %c0_i32_1 = arith.constant 0 : i32
    return %arg0, %c0_i32, %c0_i32_0 : i32, i32, i32
  }
  func.func @transform_2(%arg0: i32, %arg1: i32) -> (i32, i32, i32) {
    %c0_i32 = arith.constant 0 : i32
    %c0_i32_0 = arith.constant 0 : i32
    return %arg0, %arg1, %c0_i32 : i32, i32, i32
  }
}

</mosaic_0001>

<bundles_post_ra>
// kernel: tpu_custom_call.1
= control target key start
LH: loop header
LB: loop body
LE: loop exit
PB: predicated region body
PF: predicated region fallthrough
CT: control target
= control target key end

     0   :  { %s3616_s9 = smov 0   ;;  %s3618_s10 = smov 0   ;;  %s6823_s0 = inlined_call_operand.vmem [shape: f32[2,128,3], index: 0, kind: input, shape index: {}]   ;;  %s6824_s1 = inlined_call_operand.vmem [shape: f32[2,128,3], index: 1, kind: input, shape index: {}]   ;;  %s6825_s2 = inlined_call_operand.vmem [shape: s32[2,128,8], index: 2, kind: output, shape index: {}]  }
   0x1   :  { %s3620_s11 = smov 0  }
   0x2 LB: > { %s24_s12 = sadd.s32 1, %s3595_s10  ;;  %p3357_p0 = scmp.ge.s32.totalorder %s3599_s11, 1  ;;  %s3599_s11 = sphi %s3620_s11, %s12_s11   ;;  %s3595_s10 = sphi %s3618_s10, %s7020_s10   ;;  %s3591_s9 = sphi %s3616_s9, %s7019_s9  }
   0x3   : > { %p26_p1 = scmp.ge.s32.totalorder %s24_s12, 2  ;;  %p143_p2 = scmp.lt.s32.totalorder %s3599_s11, 3 }
   0x5   : > { %s7022_s12 = smov (%p26_p1, %s24_s12), 0  ;;  %p144_p3 = pnand %p3357_p0, %p143_p2 }
   0x7   : > { %147 = sbr.rel (%p144_p3) target bundleno = 3997 (0xf9d), region = 28 }
   0xe   : > { %p179_p4 = scmp.lt.s32.totalorder %s3591_s9, 1  ;;  %vm251_vm0 = vcmask 23552   ;;  %vm348_vm1 = vcmask 31744  }
   0xf   : > { %vm3762_vm2 = vmpackc.low %vm348_vm1, %vm348_vm1 }
  0x10   : > { %s7024_s9 = smov (!%p179_p4, %s3591_s9), 1 }
  0x11   : > { %s3634_s13 = sshll.u32 %s7024_s9, 7 }
  0x12   : > { %s3640_s16 = scalar_lea.vmem %s6824_s1, %s3634_s13  ;;  %s3742_s19 = scalar_lea.vmem %s6823_s0, %s3634_s13 }
  0x13   : > { %v3643_v0 = vld [vmem:[%s3640_s16] sm:$0xff]  ;;  %v3646_v1 = vld [vmem:[%s3640_s16 + $0x10] sm:$0xff]  ;;  %v3649_v2 = vld [vmem:[%s3640_s16 + $0x8] sm:$0xff]  ;;  %s6736_s22 = scalar_lea.vmem %s6825_s2, %s3634_s13 }
  0x14   : > { %v235_v3 = vmul.f32 %v3643_v0, %v3643_v0  ;;  %v237_v4 = vmul.f32 %v3646_v1, %v3646_v1  ;;  %v3656_v5 = vld [vmem:[%s3640_s16 + $0x18] sm:$0xff]  ;;  %v236_v6 = vmul.f32 %v3649_v2, %v3649_v2  ;;  %v3663_v8 = vld [vmem:[%s3640_s16 + $0x28] sm:$0xff]  ;;  %v3666_v9 = vld [vmem:[%s3640_s16 + $0x20] sm:$0xff]  ;;  %v318_v52 = vmul.f32 -2.0, %v3646_v1 }
  0x15   : > { %v238_v7 = vmul.f32 %v3656_v5, %v3656_v5  ;;  %v240_v14 = vmul.f32 %v3663_v8, %v3663_v8  ;;  %v239_v15 = vmul.f32 %v3666_v9, %v3666_v9  ;;  %v3677_v16 = vld [vmem:[%s3640_s16 + $0x38] sm:$0xff]  ;;  %v3680_v17 = vld [vmem:[%s3640_s16 + $0x30] sm:$0xff]  ;;  %v3689_v22 = vld [vmem:[%s3640_s16 + $0x48] sm:$0xff]  ;;  %v316_v55 = vmul.f32 -2.0, %v3643_v0 }
  0x16   : > { %v252_v10 = vsel %vm251_vm0, %v235_v3, 0.0  ;;  %v258_v11 = vsel %vm251_vm0, %v237_v4, 0.0  ;;  %v255_v12 = vsel %vm251_vm0, %v236_v6, 0.0  ;;  %v242_v20 = vmul.f32 %v3677_v16, %v3677_v16  ;;  %v3692_v23 = vld [vmem:[%s3640_s16 + $0x40] sm:$0xff]  ;;  %v3701_v28 = vld [vmem:[%s3640_s16 + $0x58] sm:$0xff]  ;;  %v3704_v29 = vld [vmem:[%s3640_s16 + $0x50] sm:$0xff] }
  0x17   : > { %253 = vadd.xlane.f32.xlu0 %v252_v10  ;;  %259 = vadd.xlane.f32.xlu1 %v258_v11  ;;  %v261_v13 = vsel %vm251_vm0, %v238_v7, 0.0  ;;  %v267_v18 = vsel %vm251_vm0, %v240_v14, 0.0  ;;  %v264_v19 = vsel %vm251_vm0, %v239_v15, 0.0  ;;  %v241_v21 = vmul.f32 %v3680_v17, %v3680_v17  ;;  %v3713_v34 = vld [vmem:[%s3640_s16 + $0x68] sm:$0xff]  ;;  %v3716_v35 = vld [vmem:[%s3640_s16 + $0x60] sm:$0xff]  ;;  %v3725_v40 = vld [vmem:[%s3640_s16 + $0x78] sm:$0xff] }
  0x18   : > { %v273_v24 = vsel %vm251_vm0, %v242_v20, 0.0  ;;  %v244_v26 = vmul.f32 %v3689_v22, %v3689_v22  ;;  %v243_v27 = vmul.f32 %v3692_v23, %v3692_v23  ;;  %v246_v32 = vmul.f32 %v3701_v28, %v3701_v28  ;;  %v3728_v41 = vld [vmem:[%s3640_s16 + $0x70] sm:$0xff]  ;;  %v203_v48 = vld [vmem:[%s3742_s19] sm:$0xff] }
  0x19   : > { %v270_v25 = vsel %vm251_vm0, %v241_v21, 0.0  ;;  %v245_v33 = vmul.f32 %v3704_v29, %v3704_v29  ;;  %v248_v38 = vmul.f32 %v3713_v34, %v3713_v34  ;;  %v247_v39 = vmul.f32 %v3716_v35, %v3716_v35  ;;  %v211_v50 = vld [vmem:[%s3742_s19 + $0x40] sm:$0xff] }
  0x1a   : > { %v279_v30 = vsel %vm251_vm0, %v244_v26, 0.0  ;;  %v276_v31 = vsel %vm251_vm0, %v243_v27, 0.0  ;;  %v285_v36 = vsel %vm251_vm0, %v246_v32, 0.0  ;;  %v250_v44 = vmul.f32 %v3725_v40, %v3725_v40 }
  0x1b   : > { %256 = vadd.xlane.f32.xlu0 %v255_v12  ;;  %262 = vadd.xlane.f32.xlu1 %v261_v13  ;;  %v282_v37 = vsel %vm251_vm0, %v245_v33, 0.0  ;;  %v291_v42 = vsel %vm251_vm0, %v248_v38, 0.0  ;;  %v288_v43 = vsel %vm251_vm0, %v247_v39, 0.0  ;;  %v249_v45 = vmul.f32 %v3728_v41, %v3728_v41 }
  0x1c   : > { %v297_v46 = vsel %vm251_vm0, %v250_v44, 0.0  ;;  %v300_v49 = vsel %vm251_vm0, %v203_v48, 1.0  ;;  %v308_v51 = vsel %vm251_vm0, %v211_v50, 1.0  ;;  %v317_v56 = vmul.f32 -2.0, %v3649_v2  ;;  %v213_v48 = vld [vmem:[%s3742_s19 + $0x50] sm:$0xff] }
  0x1d   : > { %v294_v47 = vsel %vm251_vm0, %v249_v45, 0.0  ;;  %3465 = vmatprep.mubr.msk.f32.mxu0 %vm348_vm1, %v300_v49  ;;  %3477 = vmatprep.mubr.msk.f32.mxu1 %vm348_vm1, %v308_v51  ;;  %v319_v57 = vmul.f32 -2.0, %v3656_v5  ;;  %v321_v59 = vmul.f32 -2.0, %v3663_v8  ;;  %v320_v62 = vmul.f32 -2.0, %v3666_v9  ;;  %v204_v45 = vld [vmem:[%s3742_s19 + $0x8] sm:$0xff] }
  0x1e   : > { %v323_v7 = vmul.f32 -2.0, %v3677_v16  ;;  %v322_v8 = vmul.f32 -2.0, %v3680_v17  ;;  %v325_v14 = vmul.f32 -2.0, %v3689_v22  ;;  %v324_v15 = vmul.f32 -2.0, %v3692_v23 }
  0x1f   : > { %268 = vadd.xlane.f32.xlu1 %v267_v18  ;;  %265 = vadd.xlane.f32.xlu0 %v264_v19  ;;  %v327_v21 = vmul.f32 -2.0, %v3701_v28  ;;  %v329_v28 = vmul.f32 -2.0, %v3713_v34  ;;  %v330_v38 = vmul.f32 -2.0, %v3728_v41  ;;  %v301_v49 = vsel %vm251_vm0, %v204_v45, 1.0 }
  0x23   : > { %274 = vadd.xlane.f32.xlu1 %v273_v24  ;;  %271 = vadd.xlane.f32.xlu0 %v270_v25  ;;  %v326_v24 = vmul.f32 -2.0, %v3704_v29  ;;  %v328_v29 = vmul.f32 -2.0, %v3716_v35 }
  0x27   : > { %280 = vadd.xlane.f32.xlu1 %v279_v30  ;;  %277 = vadd.xlane.f32.xlu0 %v276_v31 }
  0x2b   : > { %286 = vadd.xlane.f32.xlu1 %v285_v36  ;;  %283 = vadd.xlane.f32.xlu0 %v282_v37  ;;  %v331_v37 = vmul.f32 -2.0, %v3725_v40 }
  0x2f   : > { %292 = vadd.xlane.f32.xlu1 %v291_v42  ;;  %289 = vadd.xlane.f32.xlu0 %v288_v43 }
  0x33   : > { %298 = vadd.xlane.f32.xlu1 %v297_v46  ;;  %295 = vadd.xlane.f32.xlu0 %v294_v47  ;;  %v212_v46 = vld [vmem:[%s3742_s19 + $0x48] sm:$0xff]  ;;  %v205_v47 = vld [vmem:[%s3742_s19 + $0x10] sm:$0xff] }
  0x34   : > { %v309_v50 = vsel %vm251_vm0, %v212_v46, 1.0  ;;  %v302_v51 = vsel %vm251_vm0, %v205_v47, 1.0 }
  0xa4   : > { %v254_v53 = vpop.xlane.xlu0 %253  ;;  %v260_v54 = vpop.xlane.xlu1 %259 }
  0xa5   : > { %v334_v58 = vsel %vm251_vm0, %v318_v52, %v260_v54  ;;  %v332_v63 = vsel %vm251_vm0, %v316_v55, %v254_v53  ;;  %v206_v52 = vld [vmem:[%s3742_s19 + $0x18] sm:$0xff]  ;;  %v310_v53 = vsel %vm251_vm0, %v213_v48, 1.0  ;;  %v207_v55 = vld [vmem:[%s3742_s19 + $0x20] sm:$0xff] }
  0xa6   : > { %v214_v54 = vld [vmem:[%s3742_s19 + $0x58] sm:$0xff] }
  0xa8   : > { %v257_v60 = vpop.xlane.xlu0 %256  ;;  %v263_v61 = vpop.xlane.xlu1 %262 }
  0xa9   : > { %v333_v1 = vsel %vm251_vm0, %v317_v56, %v257_v60  ;;  %v335_v3 = vsel %vm251_vm0, %v319_v57, %v263_v61  ;;  %v215_v56 = vld [vmem:[%s3742_s19 + $0x60] sm:$0xff]  ;;  %v303_v57 = vsel %vm251_vm0, %v206_v52, 1.0  ;;  %v208_v60 = vld [vmem:[%s3742_s19 + $0x28] sm:$0xff] }
  0xaa   : > { %v3489_v2 = vpack.c.bf16 %v333_v1, %v332_v63  ;;  %v3495_v4 = vpack.c.bf16 %v335_v3, %v334_v58  ;;  %v311_v58 = vsel %vm251_vm0, %v214_v54, 1.0  ;;  %v312_v61 = vsel %vm251_vm0, %v215_v56, 1.0  ;;  %v209_v63 = vld [vmem:[%s3742_s19 + $0x30] sm:$0xff] }
  0xab   : > { %v217_v1 = vld [vmem:[%s3742_s19 + $0x70] sm:$0xff]  ;;  %v305_v3 = vsel %vm251_vm0, %v208_v60, 1.0 }
  0xac   : > { %3491 = vmatprep.subr.msk.bf16.mxu0 %vm3762_vm2, %v3489_v2  ;;  %3537 = vmatprep.subr.msk.bf16.mxu1 %vm3762_vm2, %v3489_v2  ;;  %v269_v5 = vpop.xlane.xlu1 %268  ;;  %v266_v6 = vpop.xlane.xlu0 %265 }
  0xad   : > { %3494 = vmatpush3.bf16.xpose.msk.msra.mxu0 %vm3762_vm2, %v3489_v2  ;;  %3545 = vmatpush3.bf16.xpose.msk.msra.mxu1 %vm3762_vm2, %v3489_v2  ;;  %v337_v9 = vsel %vm251_vm0, %v321_v59, %v269_v5  ;;  %v336_v10 = vsel %vm251_vm0, %v320_v62, %v266_v6  ;;  %v304_v59 = vsel %vm251_vm0, %v207_v55, 1.0  ;;  %v216_v62 = vld [vmem:[%s3742_s19 + $0x68] sm:$0xff]  ;;  %v306_v2 = vsel %vm251_vm0, %v209_v63, 1.0  ;;  %v218_v6 = vld [vmem:[%s3742_s19 + $0x78] sm:$0xff] }
  0xae   : > { %3497 = vmatprep.subr.msk.bf16.mxu0 %vm3762_vm2, %v3495_v4  ;;  %3538 = vmatprep.subr.msk.bf16.mxu1 %vm3762_vm2, %v3495_v4  ;;  %v3501_v11 = vpack.c.bf16 %v337_v9, %v336_v10  ;;  %v313_v0 = vsel %vm251_vm0, %v216_v62, 1.0  ;;  %v314_v5 = vsel %vm251_vm0, %v217_v1, 1.0 }
  0xb0   : > { %v275_v12 = vpop.xlane.xlu1 %274  ;;  %v272_v13 = vpop.xlane.xlu0 %271 }
  0xb1   : > { %v339_v16 = vsel %vm251_vm0, %v323_v7, %v275_v12  ;;  %v338_v17 = vsel %vm251_vm0, %v322_v8, %v272_v13  ;;  %v315_v8 = vsel %vm251_vm0, %v218_v6, 1.0 }
  0xb2   : > { %v3507_v18 = vpack.c.bf16 %v339_v16, %v338_v17 }
  0xb4   : > { %v281_v19 = vpop.xlane.xlu1 %280  ;;  %v278_v20 = vpop.xlane.xlu0 %277 }
  0xb5   : > { %3500 = vmatpush3.bf16.xpose.msk.msra.mxu0 %vm3762_vm2, %v3495_v4  ;;  %3546 = vmatpush3.bf16.xpose.msk.msra.mxu1 %vm3762_vm2, %v3495_v4  ;;  %v341_v22 = vsel %vm251_vm0, %v325_v14, %v281_v19  ;;  %v340_v23 = vsel %vm251_vm0, %v324_v15, %v278_v20  ;;  %v210_v4 = vld [vmem:[%s3742_s19 + $0x38] sm:$0xff] }
  0xb6   : > { %3503 = vmatprep.subr.msk.bf16.mxu0 %vm3762_vm2, %v3501_v11  ;;  %3539 = vmatprep.subr.msk.bf16.mxu1 %vm3762_vm2, %v3501_v11  ;;  %v3513_v25 = vpack.c.bf16 %v341_v22, %v340_v23  ;;  %v307_v7 = vsel %vm251_vm0, %v210_v4, 1.0 }
  0xb8   : > { %v287_v26 = vpop.xlane.xlu1 %286  ;;  %v284_v27 = vpop.xlane.xlu0 %283 }
  0xb9   : > { %v343_v30 = vsel %vm251_vm0, %v327_v21, %v287_v26  ;;  %v342_v31 = vsel %vm251_vm0, %v326_v24, %v284_v27 }
  0xba   : > { %v3519_v32 = vpack.c.bf16 %v343_v30, %v342_v31 }
  0xbc   : > { %v293_v33 = vpop.xlane.xlu1 %292  ;;  %v290_v36 = vpop.xlane.xlu0 %289 }
  0xbd   : > { %3506 = vmatpush3.bf16.xpose.msk.msra.mxu0 %vm3762_vm2, %v3501_v11  ;;  %3547 = vmatpush3.bf16.xpose.msk.msra.mxu1 %vm3762_vm2, %v3501_v11  ;;  %v345_v34 = vsel %vm251_vm0, %v329_v28, %v293_v33  ;;  %v344_v35 = vsel %vm251_vm0, %v328_v29, %v290_v36 }
  0xbe   : > { %3509 = vmatprep.subr.msk.bf16.mxu0 %vm3762_vm2, %v3507_v18  ;;  %3540 = vmatprep.subr.msk.bf16.mxu1 %vm3762_vm2, %v3507_v18  ;;  %v3525_v39 = vpack.c.bf16 %v345_v34, %v344_v35 }
  0xc0   : > { %v299_v40 = vpop.xlane.xlu1 %298  ;;  %v296_v42 = vpop.xlane.xlu0 %295 }
  0xc1   : > { %v347_v41 = vsel %vm251_vm0, %v331_v37, %v299_v40  ;;  %v346_v43 = vsel %vm251_vm0, %v330_v38, %v296_v42 }
  0xc2   : > { %v3531_v44 = vpack.c.bf16 %v347_v41, %v346_v43 }
  0xc5   : > { %3512 = vmatpush3.bf16.xpose.msk.msra.mxu0 %vm3762_vm2, %v3507_v18  ;;  %3548 = vmatpush3.bf16.xpose.msk.msra.mxu1 %vm3762_vm2, %v3507_v18 }
  0xc6   : > { %3515 = vmatprep.subr.msk.bf16.mxu0 %vm3762_vm2, %v3513_v25  ;;  %3541 = vmatprep.subr.msk.bf16.mxu1 %vm3762_vm2, %v3513_v25 }
  0xcd   : > { %3518 = vmatpush3.bf16.xpose.msk.msra.mxu0 %vm3762_vm2, %v3513_v25  ;;  %3549 = vmatpush3.bf16.xpose.msk.msra.mxu1 %vm3762_vm2, %v3513_v25  ;;  %v590_v25 = vlaneseq }
  0xce   : > { %3521 = vmatprep.subr.msk.bf16.mxu0 %vm3762_vm2, %v3519_v32  ;;  %3542 = vmatprep.subr.msk.bf16.mxu1 %vm3762_vm2, %v3519_v32 }
  0xcf   : > { %v3942_v26 = vand.u32 127, %v590_v25 }
  0xd5   : > { %3524 = vmatpush3.bf16.xpose.msk.msra.mxu0 %vm3762_vm2, %v3519_v32  ;;  %3550 = vmatpush3.bf16.xpose.msk.msra.mxu1 %vm3762_vm2, %v3519_v32 }
  0xd6   : > { %3527 = vmatprep.subr.msk.bf16.mxu0 %vm3762_vm2, %v3525_v39  ;;  %3543 = vmatprep.subr.msk.bf16.mxu1 %vm3762_vm2, %v3525_v39 }
  0xdd   : > { %3530 = vmatpush3.bf16.xpose.msk.msra.mxu0 %vm3762_vm2, %v3525_v39  ;;  %3551 = vmatpush3.bf16.xpose.msk.msra.mxu1 %vm3762_vm2, %v3525_v39 }
  0xde   : > { %3533 = vmatprep.subr.msk.bf16.mxu0 %vm3762_vm2, %v3531_v44  ;;  %3544 = vmatprep.subr.msk.bf16.mxu1 %vm3762_vm2, %v3531_v44 }
  0xe5   : > { %3536 = vmatpush3.bf16.xpose.msk.msra.mxu0 %vm3762_vm2, %v3531_v44  ;;  %3552 = vmatpush3.bf16.xpose.msk.msra.mxu1 %vm3762_vm2, %v3531_v44 }
  0xec   : > { %3466 = vmatmul.mubr.msk.f32.vlgmr.msra.gmra.mrb[0].mxu0 %vm348_vm1, %v301_v49  ;;  %3478 = vmatmul.mubr.msk.f32.vlgmr.msra.gmra.mrb[0].mxu1 %vm348_vm1, %v309_v50 }
  0xed   : > { %3468 = vmatprep.mubr.msk.f32.mxu0 %vm348_vm1, %v302_v51  ;;  %3480 = vmatprep.mubr.msk.f32.mxu1 %vm348_vm1, %v310_v53 }
  0xf0   : > { %3469 = vmatmul.mubr.msk.f32.gmra.mrb[2].mxu0 %vm348_vm1, %v303_v57  ;;  %3481 = vmatmul.mubr.msk.f32.gmra.mrb[2].mxu1 %vm348_vm1, %v311_v58 }
  0xf1   : > { %3471 = vmatprep.mubr.msk.f32.mxu0 %vm348_vm1, %v304_v59  ;;  %3483 = vmatprep.mubr.msk.f32.mxu1 %vm348_vm1, %v312_v61 }
  0xf4   : > { %3472 = vmatmul.mubr.msk.f32.gmra.mrb[4].mxu0 %vm348_vm1, %v305_v3  ;;  %3484 = vmatmul.mubr.msk.f32.gmra.mrb[4].mxu1 %vm348_vm1, %v313_v0 }
  0xf5   : > { %3474 = vmatprep.mubr.msk.f32.mxu0 %vm348_vm1, %v306_v2  ;;  %3486 = vmatprep.mubr.msk.f32.mxu1 %vm348_vm1, %v314_v5 }
  0xf8   : > { %3475 = vmatmul.mubr.msk.f32.gmra.mrb[6].mxu0 %vm348_vm1, %v307_v7  ;;  %3487 = vmatmul.mubr.msk.f32.gmra.mrb[6].mxu1 %vm348_vm1, %v315_v8 }
 0x1bf   : > { %v3894_v9 = vpop.f32.mrb[0].mxu0  ;;  %v3896_v10 = vpop.f32.mrb[0].mxu1 }
 0x1c0   : > { %594 = vmin.xlane.f32.xlu1 %v3894_v9  ;;  %v3899_v11 = vpop.f32.mrb[1].mxu0  ;;  %v3901_v12 = vpop.f32.mrb[1].mxu1 }
 0x1c1   : > { %592 = vmin.xlane.f32.xlu0 %v3899_v11 }
 0x1c3   : > { %v3904_v13 = vpop.f32.mrb[2].mxu0  ;;  %v3906_v14 = vpop.f32.mrb[2].mxu1 }
 0x1c4   : > { %610 = vmin.xlane.f32.xlu1 %v3896_v10  ;;  %v3909_v15 = vpop.f32.mrb[3].mxu0  ;;  %v3911_v16 = vpop.f32.mrb[3].mxu1 }
 0x1c5   : > { %608 = vmin.xlane.f32.xlu0 %v3901_v12 }
 0x1c7   : > { %v3914_v17 = vpop.f32.mrb[4].mxu0  ;;  %v3916_v18 = vpop.f32.mrb[4].mxu1 }
 0x1c8   : > { %598 = vmin.xlane.f32.xlu1 %v3904_v13  ;;  %v3919_v19 = vpop.f32.mrb[5].mxu0  ;;  %v3921_v20 = vpop.f32.mrb[5].mxu1 }
 0x1c9   : > { %596 = vmin.xlane.f32.xlu0 %v3909_v15 }
 0x1cb   : > { %v3924_v21 = vpop.f32.mrb[6].mxu0  ;;  %v3926_v24 = vpop.f32.mrb[6].mxu1 }
 0x1cc   : > { %614 = vmin.xlane.f32.xlu1 %v3906_v14  ;;  %v3929_v22 = vpop.f32.mrb[7].mxu0  ;;  %v3931_v23 = vpop.f32.mrb[7].mxu1 }
 0x1cd   : > { %612 = vmin.xlane.f32.xlu0 %v3911_v16 }
 0x1d0   : > { %602 = vmin.xlane.f32.xlu1 %v3914_v17 }
 0x1d1   : > { %600 = vmin.xlane.f32.xlu0 %v3919_v19 }
 0x1d4   : > { %618 = vmin.xlane.f32.xlu1 %v3916_v18 }
 0x1d5   : > { %616 = vmin.xlane.f32.xlu0 %v3921_v20 }
 0x1d8   : > { %606 = vmin.xlane.f32.xlu1 %v3924_v21 }
 0x1d9   : > { %604 = vmin.xlane.f32.xlu0 %v3929_v22 }
 0x1dc   : > { %622 = vmin.xlane.f32.xlu1 %v3926_v24 }
 0x1dd   : > { %620 = vmin.xlane.f32.xlu0 %v3931_v23 }
 0x24d   : > { %v595_v27 = vpop.xlane.xlu1 %594 }
 0x24e   : > { %vm625_vm3 = vcmp.le.f32.partialorder %v3894_v9, %v595_v27  ;;  %v593_v28 = vpop.xlane.xlu0 %592 }
 0x24f   : > { %v3946_v29 = vsel %vm625_vm3, %v3942_v26, 128  ;;  %vm624_vm4 = vcmp.le.f32.partialorder %v3899_v11, %v593_v28 }
 0x250   : > { %v3950_v30 = vsel %vm624_vm4, %v3942_v26, 128  ;;  %v671_v31 = vshra.s32 %v3946_v29, 16 }
 0x251   : > { %v611_v32 = vpop.xlane.xlu1 %610  ;;  %v657_v33 = vshra.s32 %v3950_v30, 16 }
 0x252   : > { %vm633_vm5 = vcmp.le.f32.partialorder %v3896_v10, %v611_v32  ;;  %v609_v36 = vpop.xlane.xlu0 %608  ;;  %v3955_v37 = vcvt.s32.f32 %v671_v31 }
 0x253   : > { %v3958_v38 = vsel %vm633_vm5, %v3942_v26, 128  ;;  %vm632_vm6 = vcmp.le.f32.partialorder %v3901_v12, %v609_v36  ;;  %v3961_v34 = vcvt.s32.f32 %v657_v33 }
 0x254   : > { %v3964_v35 = vsel %vm632_vm6, %v3942_v26, 128  ;;  %674 = vmin.xlane.f32.xlu1 %v3955_v37  ;;  %v783_v39 = vshra.s32 %v3958_v38, 16 }
 0x255   : > { %v599_v40 = vpop.xlane.xlu1 %598  ;;  %660 = vmin.xlane.f32.xlu0 %v3961_v34  ;;  %v769_v42 = vshra.s32 %v3964_v35, 16 }
 0x256   : > { %vm627_vm7 = vcmp.le.f32.partialorder %v3904_v13, %v599_v40  ;;  %v597_v41 = vpop.xlane.xlu0 %596  ;;  %v3971_v43 = vcvt.s32.f32 %v783_v39 }
 0x257   : > { %v3974_v44 = vsel %vm627_vm7, %v3942_v26, 128  ;;  %vm626_vm8 = vcmp.le.f32.partialorder %v3909_v15, %v597_v41  ;;  %v3977_v45 = vcvt.s32.f32 %v769_v42 }
 0x258   : > { %v3980_v46 = vsel %vm626_vm8, %v3942_v26, 128  ;;  %786 = vmin.xlane.f32.xlu1 %v3971_v43  ;;  %v699_v47 = vshra.s32 %v3974_v44, 16 }
 0x259   : > { %v615_v48 = vpop.xlane.xlu1 %614  ;;  %772 = vmin.xlane.f32.xlu0 %v3977_v45  ;;  %v685_v49 = vshra.s32 %v3980_v46, 16 }
 0x25a   : > { %vm635_vm9 = vcmp.le.f32.partialorder %v3906_v14, %v615_v48  ;;  %v613_v50 = vpop.xlane.xlu0 %612  ;;  %v3987_v51 = vcvt.s32.f32 %v699_v47 }
 0x25b   : > { %v3990_v52 = vsel %vm635_vm9, %v3942_v26, 128  ;;  %vm634_vm10 = vcmp.le.f32.partialorder %v3911_v16, %v613_v50  ;;  %v3993_v53 = vcvt.s32.f32 %v685_v49 }
 0x25c   : > { %v3996_v54 = vsel %vm634_vm10, %v3942_v26, 128  ;;  %702 = vmin.xlane.f32.xlu1 %v3987_v51  ;;  %v811_v55 = vshra.s32 %v3990_v52, 16 }
 0x25d   : > { %v603_v56 = vpop.xlane.xlu1 %602  ;;  %688 = vmin.xlane.f32.xlu0 %v3993_v53  ;;  %v797_v57 = vshra.s32 %v3996_v54, 16 }
 0x25e   : > { %vm629_vm11 = vcmp.le.f32.partialorder %v3914_v17, %v603_v56  ;;  %v601_v58 = vpop.xlane.xlu0 %600  ;;  %v4003_v59 = vcvt.s32.f32 %v811_v55 }
 0x25f   : > { %v4006_v60 = vsel %vm629_vm11, %v3942_v26, 128  ;;  %vm628_vm12 = vcmp.le.f32.partialorder %v3919_v19, %v601_v58  ;;  %v4009_v61 = vcvt.s32.f32 %v797_v57  ;;  %v670_v58 = vand.u32 65535, %v3946_v29 }
 0x260   : > { %v4012_v62 = vsel %vm628_vm12, %v3942_v26, 128  ;;  %814 = vmin.xlane.f32.xlu1 %v4003_v59  ;;  %v727_v63 = vshra.s32 %v4006_v60, 16 }
 0x261   : > { %v619_v1 = vpop.xlane.xlu1 %618  ;;  %800 = vmin.xlane.f32.xlu0 %v4009_v61  ;;  %v713_v3 = vshra.s32 %v4012_v62, 16 }
 0x262   : > { %vm637_vm13 = vcmp.le.f32.partialorder %v3916_v18, %v619_v1  ;;  %v617_v0 = vpop.xlane.xlu0 %616  ;;  %v4019_v2 = vcvt.s32.f32 %v727_v63  ;;  %v656_v63 = vand.u32 65535, %v3950_v30 }
 0x263   : > { %v4022_v4 = vsel %vm637_vm13, %v3942_v26, 128  ;;  %vm636_vm14 = vcmp.le.f32.partialorder %v3921_v20, %v617_v0  ;;  %v4025_v5 = vcvt.s32.f32 %v713_v3  ;;  %v672_v3 = vcvt.s32.f32 %v670_v58 }
 0x264   : > { %v4028_v6 = vsel %vm636_vm14, %v3942_v26, 128  ;;  %730 = vmin.xlane.f32.xlu1 %v4019_v2  ;;  %v839_v7 = vshra.s32 %v4022_v4, 16  ;;  %v782_v0 = vand.u32 65535, %v3958_v38  ;;  %v698_v38 = vand.u32 65535, %v3974_v44 }
 0x265   : > { %v607_v8 = vpop.xlane.xlu1 %606  ;;  %716 = vmin.xlane.f32.xlu0 %v4025_v5  ;;  %v825_v25 = vshra.s32 %v4028_v6, 16  ;;  %v810_v44 = vand.u32 65535, %v3990_v52  ;;  %v726_v52 = vand.u32 65535, %v4006_v60  ;;  %v838_v60 = vand.u32 65535, %v4022_v4 }
 0x266   : > { %vm631_vm15 = vcmp.le.f32.partialorder %v3924_v21, %v607_v8  ;;  %v605_v27 = vpop.xlane.xlu0 %604  ;;  %v4035_v28 = vcvt.s32.f32 %v839_v7  ;;  %v658_v8 = vcvt.s32.f32 %v656_v63 }
 0x267   : > { %v4038_v31 = vsel %vm631_vm15, %v3942_v26, 128  ;;  %vm630_vm2 = vcmp.le.f32.partialorder %v3929_v22, %v605_v27  ;;  %v4041_v32 = vcvt.s32.f32 %v825_v25  ;;  %v768_v25 = vand.u32 65535, %v3964_v35 }
 0x268   : > { %v4044_v33 = vsel %vm630_vm2, %v3942_v26, 128  ;;  %842 = vmin.xlane.f32.xlu1 %v4035_v28  ;;  %v755_v36 = vshra.s32 %v4038_v31, 16  ;;  %v684_v35 = vand.u32 65535, %v3980_v46  ;;  %v796_v46 = vand.u32 65535, %v3996_v54 }
 0x269   : > { %v623_v39 = vpop.xlane.xlu1 %622  ;;  %828 = vmin.xlane.f32.xlu0 %v4041_v32  ;;  %v741_v40 = vshra.s32 %v4044_v33, 16  ;;  %v712_v54 = vand.u32 65535, %v4012_v62  ;;  %v824_v62 = vand.u32 65535, %v4028_v6  ;;  %v754_v4 = vand.u32 65535, %v4038_v31 }
 0x26a   : > { %vm639_vm3 = vcmp.le.f32.partialorder %v3926_v24, %v623_v39  ;;  %v621_v42 = vpop.xlane.xlu0 %620  ;;  %v4051_v41 = vcvt.s32.f32 %v755_v36  ;;  %v784_v36 = vcvt.s32.f32 %v782_v0  ;;  %v740_v6 = vand.u32 65535, %v4044_v33 }
 0x26b   : > { %v4054_v47 = vsel %vm639_vm3, %v3942_v26, 128  ;;  %vm638_vm4 = vcmp.le.f32.partialorder %v3931_v23, %v621_v42  ;;  %v4057_v48 = vcvt.s32.f32 %v741_v40 }
 0x26c   : > { %v4060_v49 = vsel %vm638_vm4, %v3942_v26, 128  ;;  %758 = vmin.xlane.f32.xlu1 %v4051_v41  ;;  %v867_v50 = vshra.s32 %v4054_v47, 16  ;;  %v866_v31 = vand.u32 65535, %v4054_v47 }
 0x26d   : > { %744 = vmin.xlane.f32.xlu0 %v4057_v48  ;;  %v853_v55 = vshra.s32 %v4060_v49, 16  ;;  %v852_v33 = vand.u32 65535, %v4060_v49 }
 0x26e   : > { %v4066_v56 = vcvt.s32.f32 %v867_v50  ;;  %v700_v50 = vcvt.s32.f32 %v698_v38 }
 0x26f   : > { %v4068_v57 = vcvt.s32.f32 %v853_v55  ;;  %v854_v47 = vcvt.s32.f32 %v852_v33 }
 0x270   : > { %870 = vmin.xlane.f32.xlu1 %v4066_v56 }
 0x271   : > { %856 = vmin.xlane.f32.xlu0 %v4068_v57 }
 0x2e1   : > { %v4074_v1 = vpop.xlane.xlu1 %674 }
 0x2e2   : > { %v4077_v7 = vpop.xlane.xlu0 %660  ;;  %vm676_vm5 = vcmp.eq.f32.partialorder %v3955_v37, %v4074_v1  ;;  %v770_v37 = vcvt.s32.f32 %v768_v25 }
 0x2e3   : > { %v677_v27 = vsel %vm676_vm5, %v672_v3, inf  ;;  %vm662_vm6 = vcmp.eq.f32.partialorder %v3961_v34, %v4077_v7  ;;  %v812_v3 = vcvt.s32.f32 %v810_v44 }
 0x2e4   : > { %678 = vmin.xlane.f32.xlu1 %v677_v27  ;;  %v663_v29 = vsel %vm662_vm6, %v658_v8, inf  ;;  %v728_v27 = vcvt.s32.f32 %v726_v52 }
 0x2e5   : > { %v4084_v30 = vpop.xlane.xlu1 %786  ;;  %664 = vmin.xlane.f32.xlu0 %v663_v29 }
 0x2e6   : > { %v4087_v39 = vpop.xlane.xlu0 %772  ;;  %vm788_vm7 = vcmp.eq.f32.partialorder %v3971_v43, %v4084_v30  ;;  %v686_v43 = vcvt.s32.f32 %v684_v35 }
 0x2e7   : > { %v789_v40 = vsel %vm788_vm7, %v784_v36, inf  ;;  %vm774_vm8 = vcmp.eq.f32.partialorder %v3977_v45, %v4087_v39 }
 0x2e8   : > { %790 = vmin.xlane.f32.xlu1 %v789_v40  ;;  %v775_v34 = vsel %vm774_vm8, %v770_v37, inf  ;;  %v840_v37 = vcvt.s32.f32 %v838_v60 }
 0x2e9   : > { %v4094_v42 = vpop.xlane.xlu1 %702  ;;  %776 = vmin.xlane.f32.xlu0 %v775_v34 }
 0x2ea   : > { %v4097_v55 = vpop.xlane.xlu0 %688  ;;  %vm704_vm9 = vcmp.eq.f32.partialorder %v3987_v51, %v4094_v42  ;;  %v798_v51 = vcvt.s32.f32 %v796_v46 }
 0x2eb   : > { %v705_v58 = vsel %vm704_vm9, %v700_v50, inf  ;;  %vm690_vm10 = vcmp.eq.f32.partialorder %v3993_v53, %v4097_v55  ;;  %v756_v50 = vcvt.s32.f32 %v754_v4 }
 0x2ec   : > { %706 = vmin.xlane.f32.xlu1 %v705_v58  ;;  %v691_v45 = vsel %vm690_vm10, %v686_v43, inf  ;;  %v868_v58 = vcvt.s32.f32 %v866_v31 }
 0x2ed   : > { %v4104_v63 = vpop.xlane.xlu1 %814  ;;  %692 = vmin.xlane.f32.xlu0 %v691_v45 }
 0x2ee   : > { %v4107_v0 = vpop.xlane.xlu0 %800  ;;  %vm816_vm11 = vcmp.eq.f32.partialorder %v4003_v59, %v4104_v63  ;;  %v714_v59 = vcvt.s32.f32 %v712_v54  ;;  %v793_v54 = vcvt.f32.s32 %v4084_v30 }
 0x2ef   : > { %v817_v8 = vsel %vm816_vm11, %v812_v3, inf  ;;  %vm802_vm12 = vcmp.eq.f32.partialorder %v4009_v61, %v4107_v0  ;;  %v667_v3 = vcvt.f32.s32 %v4077_v7  ;;  %v695_v7 = vcvt.f32.s32 %v4097_v55 }
 0x2f0   : > { %818 = vmin.xlane.f32.xlu1 %v817_v8  ;;  %v803_v53 = vsel %vm802_vm12, %v798_v51, inf }
 0x2f1   : > { %v4114_v25 = vpop.xlane.xlu1 %730  ;;  %804 = vmin.xlane.f32.xlu0 %v803_v53 }
 0x2f2   : > { %v4117_v29 = vpop.xlane.xlu0 %716  ;;  %vm732_vm13 = vcmp.eq.f32.partialorder %v4019_v2, %v4114_v25  ;;  %v826_v2 = vcvt.s32.f32 %v824_v62 }
 0x2f3   : > { %v733_v36 = vsel %vm732_vm13, %v728_v27, inf  ;;  %vm718_vm14 = vcmp.eq.f32.partialorder %v4025_v5, %v4117_v29  ;;  %v668_v27 = vshll.u32 %v667_v3, 16 }
 0x2f4   : > { %734 = vmin.xlane.f32.xlu1 %v733_v36  ;;  %v719_v61 = vsel %vm718_vm14, %v714_v59, inf }
 0x2f5   : > { %v4124_v38 = vpop.xlane.xlu1 %842  ;;  %720 = vmin.xlane.f32.xlu0 %v719_v61 }
 0x2f6   : > { %v4127_v35 = vpop.xlane.xlu0 %828  ;;  %vm844_vm15 = vcmp.eq.f32.partialorder %v4035_v28, %v4124_v38  ;;  %v742_v28 = vcvt.s32.f32 %v740_v6 }
 0x2f7   : > { %v845_v40 = vsel %vm844_vm15, %v840_v37, inf  ;;  %vm830_vm2 = vcmp.eq.f32.partialorder %v4041_v32, %v4127_v35 }
 0x2f8   : > { %846 = vmin.xlane.f32.xlu1 %v845_v40  ;;  %v831_v5 = vsel %vm830_vm2, %v826_v2, inf }
 0x2f9   : > { %v4134_v34 = vpop.xlane.xlu1 %758  ;;  %832 = vmin.xlane.f32.xlu0 %v831_v5  ;;  %v696_v5 = vshll.u32 %v695_v7, 16 }
 0x2fa   : > { %v4137_v44 = vpop.xlane.xlu0 %744  ;;  %vm760_vm3 = vcmp.eq.f32.partialorder %v4051_v41, %v4134_v34 }
 0x2fb   : > { %v761_v43 = vsel %vm760_vm3, %v756_v50, inf  ;;  %vm746_vm4 = vcmp.eq.f32.partialorder %v4057_v48, %v4137_v44  ;;  %v681_v48 = vcvt.f32.s32 %v4074_v1  ;;  %v794_v1 = vshll.u32 %v793_v54, 16 }
 0x2fc   : > { %762 = vmin.xlane.f32.xlu1 %v761_v43  ;;  %v747_v32 = vsel %vm746_vm4, %v742_v28, inf  ;;  %v807_v28 = vcvt.f32.s32 %v4107_v0 }
 0x2fd   : > { %v4144_v46 = vpop.xlane.xlu1 %870  ;;  %748 = vmin.xlane.f32.xlu0 %v747_v32  ;;  %v682_v51 = vshll.u32 %v681_v48, 16  ;;  %v737_v32 = vcvt.f32.s32 %v4114_v25 }
 0x2fe   : > { %v4146_v45 = vpop.xlane.xlu0 %856  ;;  %vm872_vm5 = vcmp.eq.f32.partialorder %v4066_v56, %v4144_v46  ;;  %v779_v56 = vcvt.f32.s32 %v4087_v39  ;;  %v808_v48 = vshll.u32 %v807_v28, 16 }
 0x2ff   : > { %v873_v41 = vsel %vm872_vm5, %v868_v58, inf  ;;  %vm858_vm6 = vcmp.eq.f32.partialorder %v4068_v57, %v4146_v45  ;;  %v709_v57 = vcvt.f32.s32 %v4094_v42  ;;  %v863_v28 = vcvt.f32.s32 %v4146_v45 }
 0x300   : > { %874 = vmin.xlane.f32.xlu1 %v873_v41  ;;  %v859_v49 = vsel %vm858_vm6, %v854_v47, inf  ;;  %v780_v30 = vshll.u32 %v779_v56, 16  ;;  %v835_v56 = vcvt.f32.s32 %v4127_v35 }
 0x301   : > { %860 = vmin.xlane.f32.xlu0 %v859_v49  ;;  %v710_v55 = vshll.u32 %v709_v57, 16 }
 0x371   : > { %v679_v52 = vpop.xlane.xlu1 %678 }
 0x372   : > { %v680_v8 = vcvt.f32.s32 %v679_v52  ;;  %v665_v53 = vpop.xlane.xlu0 %664 }
 0x373   : > { %v666_v60 = vcvt.f32.s32 %v665_v53 }
 0x374   : > { %v4156_v59 = vadd.s32 %v682_v51, %v680_v8 }
 0x375   : > { %v4159_v62 = vadd.s32 %v668_v27, %v666_v60  ;;  %v791_v36 = vpop.xlane.xlu1 %790 }
 0x376   : > { %v792_v61 = vcvt.f32.s32 %v791_v36  ;;  %v777_v37 = vpop.xlane.xlu0 %776  ;;  %vm881_vm7 = vcmp.eq.s32.totalorder %v3942_v26, %v4156_v59  ;;  %v765_v36 = vcvt.f32.s32 %v4134_v34 }
 0x377   : > { %v778_v4 = vcvt.f32.s32 %v777_v37  ;;  %v4165_v39 = vsel %vm881_vm7, 1e+30, %v3894_v9  ;;  %vm880_vm8 = vcmp.eq.s32.totalorder %v3942_v26, %v4159_v62  ;;  %v821_v9 = vcvt.f32.s32 %v4104_v63 }
 0x378   : > { %v4169_v42 = vadd.s32 %v794_v1, %v792_v61  ;;  %914 = vmin.xlane.f32.xlu1 %v4165_v39  ;;  %v4173_v2 = vsel %vm880_vm8, 1e+30, %v3899_v11 }
 0x379   : > { %v4175_v6 = vadd.s32 %v780_v30, %v778_v4  ;;  %v707_v40 = vpop.xlane.xlu1 %706  ;;  %912 = vmin.xlane.f32.xlu0 %v4173_v2  ;;  %v822_v0 = vshll.u32 %v821_v9, 16  ;;  %v836_v30 = vshll.u32 %v835_v56, 16 }
 0x37a   : > { %v708_v50 = vcvt.f32.s32 %v707_v40  ;;  %v693_v31 = vpop.xlane.xlu0 %692  ;;  %vm889_vm9 = vcmp.eq.s32.totalorder %v3942_v26, %v4169_v42 }
 0x37b   : > { %v694_v33 = vcvt.f32.s32 %v693_v31  ;;  %v4183_v11 = vsel %vm889_vm9, 1e+30, %v3896_v10  ;;  %vm888_vm10 = vcmp.eq.s32.totalorder %v3942_v26, %v4175_v6  ;;  %v723_v10 = vcvt.f32.s32 %v4117_v29 }
 0x37c   : > { %v4187_v43 = vadd.s32 %v710_v55, %v708_v50  ;;  %930 = vmin.xlane.f32.xlu1 %v4183_v11  ;;  %v4191_v63 = vsel %vm888_vm10, 1e+30, %v3901_v12  ;;  %v738_v29 = vshll.u32 %v737_v32, 16 }
 0x37d   : > { %v4194_v58 = vadd.s32 %v696_v5, %v694_v33  ;;  %v819_v47 = vpop.xlane.xlu1 %818  ;;  %928 = vmin.xlane.f32.xlu0 %v4191_v63  ;;  %v724_v8 = vshll.u32 %v723_v10, 16 }
 0x37e   : > { %v820_v41 = vcvt.f32.s32 %v819_v47  ;;  %v805_v49 = vpop.xlane.xlu0 %804  ;;  %vm883_vm11 = vcmp.eq.s32.totalorder %v3942_v26, %v4187_v43 }
 0x37f   : > { %6879 = vst [vmem:[#allocation2_spill] sm:$0xff] %v4194_v58  ;;  %v806_v3 = vcvt.f32.s32 %v805_v49  ;;  %v4201_v12 = vsel %vm883_vm11, 1e+30, %v3904_v13  ;;  %vm882_vm12 = vcmp.eq.s32.totalorder %v3942_v26, %v4194_v58  ;;  %v849_v13 = vcvt.f32.s32 %v4124_v38 }
 0x380   : > { %v4205_v25 = vadd.s32 %v822_v0, %v820_v41  ;;  %918 = vmin.xlane.f32.xlu1 %v4201_v12  ;;  %v4209_v52 = vsel %vm882_vm12, 1e+30, %v3909_v15 }
 0x381   : > { %v4211_v51 = vadd.s32 %v808_v48, %v806_v3  ;;  %v735_v54 = vpop.xlane.xlu1 %734  ;;  %916 = vmin.xlane.f32.xlu0 %v4209_v52  ;;  %v850_v35 = vshll.u32 %v849_v13, 16 }
 0x382   : > { %6880 = vst [vmem:[#allocation3_spill] sm:$0xff] %v4205_v25  ;;  %v736_v53 = vcvt.f32.s32 %v735_v54  ;;  %v721_v27 = vpop.xlane.xlu0 %720  ;;  %vm891_vm13 = vcmp.eq.s32.totalorder %v3942_v26, %v4205_v25 }
 0x383   : > { %6881 = vst [vmem:[#allocation4_spill] sm:$0xff] %v4211_v51  ;;  %v722_v60 = vcvt.f32.s32 %v721_v27  ;;  %v4219_v15 = vsel %vm891_vm13, 1e+30, %v3906_v14  ;;  %vm890_vm14 = vcmp.eq.s32.totalorder %v3942_v26, %v4211_v51  ;;  %v751_v14 = vcvt.f32.s32 %v4137_v44 }
 0x384   : > { %v4223_v57 = vadd.s32 %v738_v29, %v736_v53  ;;  %934 = vmin.xlane.f32.xlu1 %v4219_v15  ;;  %v4227_v38 = vsel %vm890_vm14, 1e+30, %v3911_v16  ;;  %v766_v44 = vshll.u32 %v765_v36, 16 }
 0x385   : > { %v4230_v1 = vadd.s32 %v724_v8, %v722_v60  ;;  %v847_v7 = vpop.xlane.xlu1 %846  ;;  %932 = vmin.xlane.f32.xlu0 %v4227_v38  ;;  %v752_v9 = vshll.u32 %v751_v14, 16 }
 0x386   : > { %6882 = vst [vmem:[#allocation5_spill] sm:$0xff] %v4223_v57  ;;  %v848_v61 = vcvt.f32.s32 %v847_v7  ;;  %v833_v37 = vpop.xlane.xlu0 %832  ;;  %vm885_vm15 = vcmp.eq.s32.totalorder %v3942_v26, %v4223_v57 }
 0x387   : > { %6883 = vst [vmem:[#allocation6_spill] sm:$0xff] %v4230_v1  ;;  %v834_v4 = vcvt.f32.s32 %v833_v37  ;;  %v4237_v16 = vsel %vm885_vm15, 1e+30, %v3914_v17  ;;  %vm884_vm2 = vcmp.eq.s32.totalorder %v3942_v26, %v4230_v1  ;;  %v877_v17 = vcvt.f32.s32 %v4144_v46 }
 0x388   : > { %v4241_v34 = vadd.s32 %v850_v35, %v848_v61  ;;  %922 = vmin.xlane.f32.xlu1 %v4237_v16  ;;  %v4245_v55 = vsel %vm884_vm2, 1e+30, %v3919_v19 }
 0x389   : > { %v4247_v40 = vadd.s32 %v836_v30, %v834_v4  ;;  %v763_v5 = vpop.xlane.xlu1 %762  ;;  %920 = vmin.xlane.f32.xlu0 %v4245_v55  ;;  %v878_v45 = vshll.u32 %v877_v17, 16 }
 0x38a   : > { %6884 = vst [vmem:[#allocation7_spill] sm:$0xff] %v4241_v34  ;;  %v764_v50 = vcvt.f32.s32 %v763_v5  ;;  %v749_v31 = vpop.xlane.xlu0 %748  ;;  %vm893_vm3 = vcmp.eq.s32.totalorder %v3942_v26, %v4241_v34 }
 0x38b   : > { %6885 = vst [vmem:[#allocation8_spill] sm:$0xff] %v4247_v40  ;;  %v750_v33 = vcvt.f32.s32 %v749_v31  ;;  %v4255_v19 = vsel %vm893_vm3, 1e+30, %v3916_v18  ;;  %vm892_vm4 = vcmp.eq.s32.totalorder %v3942_v26, %v4247_v40  ;;  %v864_v18 = vshll.u32 %v863_v28, 16 }
 0x38c   : > { %v4259_v32 = vadd.s32 %v766_v44, %v764_v50  ;;  %938 = vmin.xlane.f32.xlu1 %v4255_v19  ;;  %v4263_v46 = vsel %vm892_vm4, 1e+30, %v3921_v20 }
 0x38d   : > { %v4265_v47 = vadd.s32 %v752_v9, %v750_v33  ;;  %v875_v0 = vpop.xlane.xlu1 %874  ;;  %936 = vmin.xlane.f32.xlu0 %v4263_v46 }
 0x38e   : > { %6886 = vst [vmem:[#allocation9_spill] sm:$0xff] %v4259_v32  ;;  %v876_v10 = vcvt.f32.s32 %v875_v0  ;;  %v861_v41 = vpop.xlane.xlu0 %860  ;;  %vm887_vm5 = vcmp.eq.s32.totalorder %v3942_v26, %v4259_v32 }
 0x38f   : > { %6887 = vst [vmem:[#allocation10_spill] sm:$0xff] %v4265_v47  ;;  %v862_v49 = vcvt.f32.s32 %v861_v41  ;;  %v4271_v48 = vsel %vm887_vm5, 1e+30, %v3924_v21  ;;  %vm886_vm6 = vcmp.eq.s32.totalorder %v3942_v26, %v4265_v47 }
 0x390   : > { %v4275_v20 = vadd.s32 %v878_v45, %v876_v10  ;;  %926 = vmin.xlane.f32.xlu1 %v4271_v48  ;;  %v4279_v3 = vsel %vm886_vm6, 1e+30, %v3929_v22 }
 0x391   : > { %v4281_v29 = vadd.s32 %v864_v18, %v862_v49  ;;  %924 = vmin.xlane.f32.xlu0 %v4279_v3 }
 0x392   : > { %6888 = vst [vmem:[#allocation11_spill] sm:$0xff] %v4275_v20  ;;  %vm895_vm7 = vcmp.eq.s32.totalorder %v3942_v26, %v4275_v20 }
 0x393   : > { %6889 = vst [vmem:[#allocation12_spill] sm:$0xff] %v4281_v29  ;;  %v4287_v21 = vsel %vm895_vm7, 1e+30, %v3926_v24  ;;  %vm894_vm8 = vcmp.eq.s32.totalorder %v3942_v26, %v4281_v29 }
 0x394   : > { %942 = vmin.xlane.f32.xlu1 %v4287_v21  ;;  %v4293_v54 = vsel %vm894_vm8, 1e+30, %v3931_v23 }
 0x395   : > { %940 = vmin.xlane.f32.xlu0 %v4293_v54 }
 0x405   : > { %v915_v22 = vpop.xlane.xlu1 %914 }
 0x406   : > { %vm945_vm9 = vcmp.le.f32.partialorder %v4165_v39, %v915_v22  ;;  %v913_v8 = vpop.xlane.xlu0 %912 }
 0x407   : > { %v4298_v13 = vsel %vm945_vm9, %v3942_v26, 128  ;;  %vm944_vm10 = vcmp.le.f32.partialorder %v4173_v2, %v913_v8 }
 0x408   : > { %v4302_v24 = vsel %vm944_vm10, %v3942_v26, 128  ;;  %v991_v53 = vshra.s32 %v4298_v13, 16 }
 0x409   : > { %v931_v27 = vpop.xlane.xlu1 %930  ;;  %v977_v23 = vshra.s32 %v4302_v24, 16 }
 0x40a   : > { %vm953_vm11 = vcmp.le.f32.partialorder %v4183_v11, %v931_v27  ;;  %v929_v56 = vpop.xlane.xlu0 %928  ;;  %v4307_v60 = vcvt.s32.f32 %v991_v53 }
 0x40b   : > { %v4310_v36 = vsel %vm953_vm11, %v3942_v26, 128  ;;  %vm952_vm12 = vcmp.le.f32.partialorder %v4191_v63, %v929_v56  ;;  %v4313_v7 = vcvt.s32.f32 %v977_v23 }
 0x40c   : > { %v4316_v35 = vsel %vm952_vm12, %v3942_v26, 128  ;;  %994 = vmin.xlane.f32.xlu1 %v4307_v60  ;;  %v1103_v14 = vshra.s32 %v4310_v36, 16  ;;  %v1102_v34 = vand.u32 65535, %v4310_v36 }
 0x40d   : > { %v919_v61 = vpop.xlane.xlu1 %918  ;;  %980 = vmin.xlane.f32.xlu0 %v4313_v7  ;;  %v1089_v37 = vshra.s32 %v4316_v35, 16  ;;  %v1088_v51 = vand.u32 65535, %v4316_v35 }
 0x40e   : > { %vm947_vm13 = vcmp.le.f32.partialorder %v4201_v12, %v919_v61  ;;  %v917_v30 = vpop.xlane.xlu0 %916  ;;  %v4323_v4 = vcvt.s32.f32 %v1103_v14 }
 0x40f   : > { %v4326_v44 = vsel %vm947_vm13, %v3942_v26, 128  ;;  %vm946_vm14 = vcmp.le.f32.partialorder %v4209_v52, %v917_v30  ;;  %v4329_v5 = vcvt.s32.f32 %v1089_v37 }
 0x410   : > { %v4332_v9 = vsel %vm946_vm14, %v3942_v26, 128  ;;  %1106 = vmin.xlane.f32.xlu1 %v4323_v4  ;;  %v1019_v17 = vshra.s32 %v4326_v44, 16 }
 0x411   : > { %v935_v50 = vpop.xlane.xlu1 %934  ;;  %1092 = vmin.xlane.f32.xlu0 %v4329_v5  ;;  %v1005_v31 = vshra.s32 %v4332_v9, 16  ;;  %v1004_v35 = vand.u32 65535, %v4332_v9 }
 0x412   : > { %vm955_vm15 = vcmp.le.f32.partialorder %v4219_v15, %v935_v50  ;;  %v933_v28 = vpop.xlane.xlu0 %932  ;;  %v4339_v33 = vcvt.s32.f32 %v1019_v17 }
 0x413   : > { %v4342_v0 = vsel %vm955_vm15, %v3942_v26, 128  ;;  %vm954_vm2 = vcmp.le.f32.partialorder %v4227_v38, %v933_v28  ;;  %v4345_v45 = vcvt.s32.f32 %v1005_v31 }
 0x414   : > { %v4348_v10 = vsel %vm954_vm2, %v3942_v26, 128  ;;  %1022 = vmin.xlane.f32.xlu1 %v4339_v33  ;;  %v1131_v41 = vshra.s32 %v4342_v0, 16 }
 0x415   : > { %v923_v18 = vpop.xlane.xlu1 %922  ;;  %1008 = vmin.xlane.f32.xlu0 %v4345_v45  ;;  %v1117_v49 = vshra.s32 %v4348_v10, 16  ;;  %v1116_v9 = vand.u32 65535, %v4348_v10 }
 0x416   : > { %vm949_vm3 = vcmp.le.f32.partialorder %v4237_v16, %v923_v18  ;;  %v921_v22 = vpop.xlane.xlu0 %920  ;;  %v4355_v8 = vcvt.s32.f32 %v1131_v41 }
 0x417   : > { %v4358_v53 = vsel %vm949_vm3, %v3942_v26, 128  ;;  %vm948_vm4 = vcmp.le.f32.partialorder %v4245_v55, %v921_v22  ;;  %v4361_v27 = vcvt.s32.f32 %v1117_v49 }
 0x418   : > { %v4364_v23 = vsel %vm948_vm4, %v3942_v26, 128  ;;  %1134 = vmin.xlane.f32.xlu1 %v4355_v8  ;;  %v1047_v56 = vshra.s32 %v4358_v53, 16 }
 0x419   : > { %v939_v14 = vpop.xlane.xlu1 %938  ;;  %1120 = vmin.xlane.f32.xlu0 %v4361_v27  ;;  %v1033_v61 = vshra.s32 %v4364_v23, 16  ;;  %v1032_v10 = vand.u32 65535, %v4364_v23 }
 0x41a   : > { %vm957_vm5 = vcmp.le.f32.partialorder %v4255_v19, %v939_v14  ;;  %v937_v37 = vpop.xlane.xlu0 %936  ;;  %v4371_v30 = vcvt.s32.f32 %v1047_v56 }
 0x41b   : > { %v4374_v17 = vsel %vm957_vm5, %v3942_v26, 128  ;;  %vm956_vm6 = vcmp.le.f32.partialorder %v4263_v46, %v937_v37  ;;  %v4377_v50 = vcvt.s32.f32 %v1033_v61 }
 0x41c   : > { %v4380_v31 = vsel %vm956_vm6, %v3942_v26, 128  ;;  %1050 = vmin.xlane.f32.xlu1 %v4371_v30  ;;  %v1159_v28 = vshra.s32 %v4374_v17, 16 }
 0x41d   : > { %v927_v41 = vpop.xlane.xlu1 %926  ;;  %1036 = vmin.xlane.f32.xlu0 %v4377_v50  ;;  %v1145_v18 = vshra.s32 %v4380_v31, 16  ;;  %v1144_v23 = vand.u32 65535, %v4380_v31 }
 0x41e   : > { %vm951_vm7 = vcmp.le.f32.partialorder %v4271_v48, %v927_v41  ;;  %v925_v49 = vpop.xlane.xlu0 %924  ;;  %v4387_v22 = vcvt.s32.f32 %v1159_v28 }
 0x41f   : > { %v4390_v56 = vsel %vm951_vm7, %v3942_v26, 128  ;;  %vm950_vm8 = vcmp.le.f32.partialorder %v4279_v3, %v925_v49  ;;  %v4393_v14 = vcvt.s32.f32 %v1145_v18 }
 0x420   : > { %v4396_v61 = vsel %vm950_vm8, %v3942_v26, 128  ;;  %1162 = vmin.xlane.f32.xlu1 %v4387_v22  ;;  %v1075_v37 = vshra.s32 %v4390_v56, 16 }
 0x421   : > { %v943_v29 = vpop.xlane.xlu1 %942  ;;  %1148 = vmin.xlane.f32.xlu0 %v4393_v14  ;;  %v1061_v28 = vshra.s32 %v4396_v61, 16  ;;  %v1060_v31 = vand.u32 65535, %v4396_v61 }
 0x422   : > { %vm959_vm9 = vcmp.le.f32.partialorder %v4287_v21, %v943_v29  ;;  %v941_v41 = vpop.xlane.xlu0 %940  ;;  %v4403_v20 = vcvt.s32.f32 %v1075_v37 }
 0x423   : > { %v4406_v18 = vsel %vm959_vm9, %v3942_v26, 128  ;;  %vm958_vm10 = vcmp.le.f32.partialorder %v4293_v54, %v941_v41  ;;  %v4409_v49 = vcvt.s32.f32 %v1061_v28  ;;  %v990_v28 = vand.u32 65535, %v4298_v13 }
 0x424   : > { %v4412_v47 = vsel %vm958_vm10, %v3942_v26, 128  ;;  %1078 = vmin.xlane.f32.xlu1 %v4403_v20  ;;  %v1187_v32 = vshra.s32 %v4406_v18, 16  ;;  %v976_v41 = vand.u32 65535, %v4302_v24  ;;  %v1018_v24 = vand.u32 65535, %v4326_v44 }
 0x425   : > { %1064 = vmin.xlane.f32.xlu0 %v4409_v49  ;;  %v1173_v29 = vshra.s32 %v4412_v47, 16  ;;  %v992_v57 = vcvt.s32.f32 %v990_v28  ;;  %v1104_v28 = vcvt.s32.f32 %v1102_v34  ;;  %v1130_v44 = vand.u32 65535, %v4342_v0 }
 0x426   : > { %v4418_v37 = vcvt.s32.f32 %v1187_v32  ;;  %v978_v32 = vcvt.s32.f32 %v976_v41  ;;  %v1020_v34 = vcvt.s32.f32 %v1018_v24  ;;  %v1046_v0 = vand.u32 65535, %v4358_v53 }
 0x427   : > { %v4420_v40 = vcvt.s32.f32 %v1173_v29  ;;  %v1158_v53 = vand.u32 65535, %v4374_v17  ;;  %v1074_v17 = vand.u32 65535, %v4390_v56  ;;  %v1186_v56 = vand.u32 65535, %v4406_v18 }
 0x428   : > { %1190 = vmin.xlane.f32.xlu1 %v4418_v37  ;;  %v1172_v61 = vand.u32 65535, %v4412_v47 }
 0x429   : > { %1176 = vmin.xlane.f32.xlu0 %v4420_v40  ;;  %v1188_v18 = vcvt.s32.f32 %v1186_v56 }
 0x42a   : > { %v1174_v47 = vcvt.s32.f32 %v1172_v61 }
 0x499   : > { %v4427_v1 = vpop.xlane.xlu1 %994 }
 0x49a   : > { %v4430_v25 = vpop.xlane.xlu0 %980  ;;  %vm996_vm11 = vcmp.eq.f32.partialorder %v4307_v60, %v4427_v1  ;;  %v1090_v60 = vcvt.s32.f32 %v1088_v51  ;;  %v1006_v51 = vcvt.s32.f32 %v1004_v35 }
 0x49b   : > { %v997_v29 = vsel %vm996_vm11, %v992_v57, inf  ;;  %vm982_vm12 = vcmp.eq.f32.partialorder %v4313_v7, %v4430_v25 }
 0x49c   : > { %998 = vmin.xlane.f32.xlu1 %v997_v29  ;;  %v983_v13 = vsel %vm982_vm12, %v978_v32, inf }
 0x49d   : > { %v4437_v36 = vpop.xlane.xlu1 %1106  ;;  %984 = vmin.xlane.f32.xlu0 %v983_v13  ;;  %v1132_v13 = vcvt.s32.f32 %v1130_v44 }
 0x49e   : > { %v4440_v58 = vpop.xlane.xlu0 %1092  ;;  %vm1108_vm13 = vcmp.eq.f32.partialorder %v4323_v4, %v4437_v36 }
 0x49f   : > { %v1109_v57 = vsel %vm1108_vm13, %v1104_v28, inf  ;;  %vm1094_vm14 = vcmp.eq.f32.partialorder %v4329_v5, %v4440_v58 }
 0x4a0   : > { %1110 = vmin.xlane.f32.xlu1 %v1109_v57  ;;  %v1095_v7 = vsel %vm1094_vm14, %v1090_v60, inf  ;;  %v1048_v60 = vcvt.s32.f32 %v1046_v0 }
 0x4a1   : > { %v4447_v41 = vpop.xlane.xlu1 %1022  ;;  %1096 = vmin.xlane.f32.xlu0 %v1095_v7 }
 0x4a2   : > { %v4450_v32 = vpop.xlane.xlu0 %1008  ;;  %vm1024_vm15 = vcmp.eq.f32.partialorder %v4339_v33, %v4447_v41  ;;  %v1118_v33 = vcvt.s32.f32 %v1116_v9 }
 0x4a3   : > { %v1025_v4 = vsel %vm1024_vm15, %v1020_v34, inf  ;;  %vm1010_vm2 = vcmp.eq.f32.partialorder %v4345_v45, %v4450_v32  ;;  %v1160_v34 = vcvt.s32.f32 %v1158_v53 }
 0x4a4   : > { %1026 = vmin.xlane.f32.xlu1 %v1025_v4  ;;  %v1011_v5 = vsel %vm1010_vm2, %v1006_v51, inf }
 0x4a5   : > { %v4457_v29 = vpop.xlane.xlu1 %1134  ;;  %1012 = vmin.xlane.f32.xlu0 %v1011_v5  ;;  %v1076_v5 = vcvt.s32.f32 %v1074_v17 }
 0x4a6   : > { %v4460_v24 = vpop.xlane.xlu0 %1120  ;;  %vm1136_vm3 = vcmp.eq.f32.partialorder %v4355_v8, %v4457_v29  ;;  %v1034_v8 = vcvt.s32.f32 %v1032_v10 }
 0x4a7   : > { %v1137_v28 = vsel %vm1136_vm3, %v1132_v13, inf  ;;  %vm1122_vm4 = vcmp.eq.f32.partialorder %v4361_v27, %v4460_v24 }
 0x4a8   : > { %1138 = vmin.xlane.f32.xlu1 %v1137_v28  ;;  %v1123_v45 = vsel %vm1122_vm4, %v1118_v33, inf }
 0x4a9   : > { %v4467_v35 = vpop.xlane.xlu1 %1050  ;;  %1124 = vmin.xlane.f32.xlu0 %v1123_v45  ;;  %v987_v45 = vcvt.f32.s32 %v4430_v25  ;;  %v1015_v25 = vcvt.f32.s32 %v4450_v32 }
 0x4aa   : > { %v4470_v57 = vpop.xlane.xlu0 %1036  ;;  %vm1052_vm5 = vcmp.eq.f32.partialorder %v4371_v30, %v4467_v35  ;;  %v1146_v30 = vcvt.s32.f32 %v1144_v23  ;;  %v1113_v23 = vcvt.f32.s32 %v4437_v36 }
 0x4ab   : > { %v1053_v7 = vsel %vm1052_vm5, %v1048_v60, inf  ;;  %vm1038_vm6 = vcmp.eq.f32.partialorder %v4377_v50, %v4470_v57 }
 0x4ac   : > { %1054 = vmin.xlane.f32.xlu1 %v1053_v7  ;;  %v1039_v27 = vsel %vm1038_vm6, %v1034_v8, inf }
 0x4ad   : > { %v4477_v44 = vpop.xlane.xlu1 %1162  ;;  %1040 = vmin.xlane.f32.xlu0 %v1039_v27  ;;  %v988_v27 = vshll.u32 %v987_v45, 16 }
 0x4ae   : > { %v4480_v9 = vpop.xlane.xlu0 %1148  ;;  %vm1164_vm7 = vcmp.eq.f32.partialorder %v4387_v22, %v4477_v44  ;;  %v1062_v22 = vcvt.s32.f32 %v1060_v31 }
 0x4af   : > { %v1165_v51 = vsel %vm1164_vm7, %v1160_v34, inf  ;;  %vm1150_vm8 = vcmp.eq.f32.partialorder %v4393_v14, %v4480_v9 }
 0x4b0   : > { %1166 = vmin.xlane.f32.xlu1 %v1165_v51  ;;  %v1151_v50 = vsel %vm1150_vm8, %v1146_v30, inf }
 0x4b1   : > { %v4487_v4 = vpop.xlane.xlu1 %1078  ;;  %1152 = vmin.xlane.f32.xlu0 %v1151_v50 }
 0x4b2   : > { %v4490_v0 = vpop.xlane.xlu0 %1064  ;;  %vm1080_vm9 = vcmp.eq.f32.partialorder %v4403_v20, %v4487_v4 }
 0x4b3   : > { %v1081_v13 = vsel %vm1080_vm9, %v1076_v5, inf  ;;  %vm1066_vm10 = vcmp.eq.f32.partialorder %v4409_v49, %v4490_v0  ;;  %v1001_v49 = vcvt.f32.s32 %v4427_v1  ;;  %v1114_v1 = vshll.u32 %v1113_v23, 16 }
 0x4b4   : > { %1082 = vmin.xlane.f32.xlu1 %v1081_v13  ;;  %v1067_v14 = vsel %vm1066_vm10, %v1062_v22, inf  ;;  %v1016_v13 = vshll.u32 %v1015_v25, 16  ;;  %v1155_v25 = vcvt.f32.s32 %v4480_v9 }
 0x4b5   : > { %v4496_v10 = vpop.xlane.xlu1 %1190  ;;  %1068 = vmin.xlane.f32.xlu0 %v1067_v14  ;;  %v1002_v60 = vshll.u32 %v1001_v49, 16  ;;  %v1057_v49 = vcvt.f32.s32 %v4467_v35 }
 0x4b6   : > { %v4498_v33 = vpop.xlane.xlu0 %1176  ;;  %vm1192_vm11 = vcmp.eq.f32.partialorder %v4418_v37, %v4496_v10  ;;  %v1099_v37 = vcvt.f32.s32 %v4440_v58 }
 0x4b7   : > { %v1193_v28 = vsel %vm1192_vm11, %v1188_v18, inf  ;;  %vm1178_vm12 = vcmp.eq.f32.partialorder %v4420_v40, %v4498_v33  ;;  %v1029_v40 = vcvt.f32.s32 %v4447_v41 }
 0x4b8   : > { %1194 = vmin.xlane.f32.xlu1 %v1193_v28  ;;  %v1179_v20 = vsel %vm1178_vm12, %v1174_v47, inf  ;;  %v1100_v36 = vshll.u32 %v1099_v37, 16  ;;  %v1127_v47 = vcvt.f32.s32 %v4460_v24 }
 0x4b9   : > { %1180 = vmin.xlane.f32.xlu0 %v1179_v20  ;;  %v1030_v32 = vshll.u32 %v1029_v40, 16 }
 0x529   : > { %v999_v53 = vpop.xlane.xlu1 %998 }
 0x52a   : > { %v1000_v8 = vcvt.f32.s32 %v999_v53  ;;  %v985_v7 = vpop.xlane.xlu0 %984 }
 0x52b   : > { %v986_v17 = vcvt.f32.s32 %v985_v7 }
 0x52c   : > { %v4508_v34 = vadd.s32 %v1002_v60, %v1000_v8  ;;  %v1128_v8 = vshll.u32 %v1127_v47, 16 }
 0x52d   : > { %v4511_v31 = vadd.s32 %v988_v27, %v986_v17  ;;  %v1111_v30 = vpop.xlane.xlu1 %1110 }
 0x52e   : > { %v1112_v51 = vcvt.f32.s32 %v1111_v30  ;;  %v1097_v50 = vpop.xlane.xlu0 %1096  ;;  %vm1201_vm13 = vcmp.eq.s32.totalorder %v3942_v26, %v4508_v34 }
 0x52f   : > { %v1098_v56 = vcvt.f32.s32 %v1097_v50  ;;  %v4517_v58 = vsel %vm1201_vm13, 1e+30, %v4165_v39  ;;  %vm1200_vm14 = vcmp.eq.s32.totalorder %v3942_v26, %v4511_v31  ;;  %v1141_v39 = vcvt.f32.s32 %v4457_v29 }
 0x530   : > { %v4521_v41 = vadd.s32 %v1114_v1, %v1112_v51  ;;  %1234 = vmin.xlane.f32.xlu1 %v4517_v58  ;;  %v4525_v5 = vsel %vm1200_vm14, 1e+30, %v4173_v2 }
 0x531   : > { %v4527_v61 = vadd.s32 %v1100_v36, %v1098_v56  ;;  %v1027_v22 = vpop.xlane.xlu1 %1026  ;;  %1232 = vmin.xlane.f32.xlu0 %v4525_v5  ;;  %v1142_v24 = vshll.u32 %v1141_v39, 16  ;;  %v1085_v36 = vcvt.f32.s32 %v4487_v4  ;;  %v1156_v39 = vshll.u32 %v1155_v25, 16 }
 0x532   : > { %v1028_v14 = vcvt.f32.s32 %v1027_v22  ;;  %v1013_v18 = vpop.xlane.xlu0 %1012  ;;  %vm1209_vm15 = vcmp.eq.s32.totalorder %v3942_v26, %v4521_v41 }
 0x533   : > { %v1014_v28 = vcvt.f32.s32 %v1013_v18  ;;  %v4535_v2 = vsel %vm1209_vm15, 1e+30, %v4183_v11  ;;  %vm1208_vm2 = vcmp.eq.s32.totalorder %v3942_v26, %v4527_v61  ;;  %v1043_v11 = vcvt.f32.s32 %v4470_v57 }
 0x534   : > { %v4539_v20 = vadd.s32 %v1030_v32, %v1028_v14  ;;  %1250 = vmin.xlane.f32.xlu1 %v4535_v2  ;;  %v4543_v29 = vsel %vm1208_vm2, 1e+30, %v4191_v63  ;;  %v1058_v57 = vshll.u32 %v1057_v49, 16 }
 0x535   : > { %v4546_v45 = vadd.s32 %v1016_v13, %v1014_v28  ;;  %v1139_v53 = vpop.xlane.xlu1 %1138  ;;  %1248 = vmin.xlane.f32.xlu0 %v4543_v29  ;;  %v1044_v40 = vshll.u32 %v1043_v11, 16  ;;  %v1183_v11 = vcvt.f32.s32 %v4498_v33 }
 0x536   : > { %v1140_v60 = vcvt.f32.s32 %v1139_v53  ;;  %v1125_v23 = vpop.xlane.xlu0 %1124  ;;  %vm1203_vm3 = vcmp.eq.s32.totalorder %v3942_v26, %v4539_v20 }
 0x537   : > { %v1126_v7 = vcvt.f32.s32 %v1125_v23  ;;  %v4553_v63 = vsel %vm1203_vm3, 1e+30, %v4201_v12  ;;  %vm1202_vm4 = vcmp.eq.s32.totalorder %v3942_v26, %v4546_v45  ;;  %v1169_v12 = vcvt.f32.s32 %v4477_v44 }
 0x538   : > { %v4557_v35 = vadd.s32 %v1142_v24, %v1140_v60  ;;  %1238 = vmin.xlane.f32.xlu1 %v4553_v63  ;;  %v4561_v27 = vsel %vm1202_vm4, 1e+30, %v4209_v52 }
 0x539   : > { %v4563_v37 = vadd.s32 %v1128_v8, %v1126_v7  ;;  %v1055_v17 = vpop.xlane.xlu1 %1054  ;;  %1236 = vmin.xlane.f32.xlu0 %v4561_v27  ;;  %v1170_v9 = vshll.u32 %v1169_v12, 16 }
 0x53a   : > { %v1056_v30 = vcvt.f32.s32 %v1055_v17  ;;  %v1041_v1 = vpop.xlane.xlu0 %1040  ;;  %vm1211_vm5 = vcmp.eq.s32.totalorder %v3942_v26, %v4557_v35 }
 0x53b   : > { %v1042_v51 = vcvt.f32.s32 %v1041_v1  ;;  %v4571_v52 = vsel %vm1211_vm5, 1e+30, %v4219_v15  ;;  %vm1210_vm6 = vcmp.eq.s32.totalorder %v3942_v26, %v4563_v37  ;;  %v1071_v15 = vcvt.f32.s32 %v4490_v0 }
 0x53c   : > { %v4575_v50 = vadd.s32 %v1058_v57, %v1056_v30  ;;  %1254 = vmin.xlane.f32.xlu1 %v4571_v52  ;;  %v4579_v44 = vsel %vm1210_vm6, 1e+30, %v4227_v38  ;;  %v1086_v0 = vshll.u32 %v1085_v36, 16 }
 0x53d   : > { %6890 = vst [vmem:[#allocation13_spill] sm:$0xff] %v4579_v44  ;;  %v4582_v56 = vadd.s32 %v1044_v40, %v1042_v51  ;;  %v1167_v32 = vpop.xlane.xlu1 %1166  ;;  %1252 = vmin.xlane.f32.xlu0 %v4579_v44  ;;  %v1072_v49 = vshll.u32 %v1071_v15, 16 }
 0x53e   : > { %v1168_v22 = vcvt.f32.s32 %v1167_v32  ;;  %v1153_v13 = vpop.xlane.xlu0 %1152  ;;  %vm1205_vm7 = vcmp.eq.s32.totalorder %v3942_v26, %v4575_v50 }
 0x53f   : > { %6891 = vst [vmem:[#allocation14_spill] sm:$0xff] %v4582_v56  ;;  %v1154_v14 = vcvt.f32.s32 %v1153_v13  ;;  %v4589_v38 = vsel %vm1205_vm7, 1e+30, %v4237_v16  ;;  %vm1204_vm8 = vcmp.eq.s32.totalorder %v3942_v26, %v4582_v56  ;;  %v1197_v16 = vcvt.f32.s32 %v4496_v10 }
 0x540   : > { %6892 = vst [vmem:[#allocation15_spill] sm:$0xff] %v4589_v38  ;;  %v4593_v4 = vadd.s32 %v1170_v9, %v1168_v22  ;;  %1242 = vmin.xlane.f32.xlu1 %v4589_v38  ;;  %v4597_v18 = vsel %vm1204_vm8, 1e+30, %v4245_v55 }
 0x541   : > { %6894 = vst [vmem:[#allocation17_spill] sm:$0xff] %v4597_v18  ;;  %v4599_v47 = vadd.s32 %v1156_v39, %v1154_v14  ;;  %v1083_v28 = vpop.xlane.xlu1 %1082  ;;  %1240 = vmin.xlane.f32.xlu0 %v4597_v18  ;;  %v1198_v33 = vshll.u32 %v1197_v16, 16 }
 0x542   : > { %6893 = vst [vmem:[#allocation16_spill] sm:$0xff] %v4593_v4  ;;  %v1084_v53 = vcvt.f32.s32 %v1083_v28  ;;  %v1069_v24 = vpop.xlane.xlu0 %1068  ;;  %vm1213_vm9 = vcmp.eq.s32.totalorder %v3942_v26, %v4593_v4 }
 0x543   : > { %6895 = vst [vmem:[#allocation18_spill] sm:$0xff] %v4599_v47  ;;  %v1070_v60 = vcvt.f32.s32 %v1069_v24  ;;  %v4607_v55 = vsel %vm1213_vm9, 1e+30, %v4255_v19  ;;  %vm1212_vm10 = vcmp.eq.s32.totalorder %v3942_v26, %v4599_v47  ;;  %v1184_v19 = vshll.u32 %v1183_v11, 16 }
 0x544   : > { %6896 = vst [vmem:[#allocation19_spill] sm:$0xff] %v4607_v55  ;;  %v4611_v23 = vadd.s32 %v1086_v0, %v1084_v53  ;;  %1258 = vmin.xlane.f32.xlu1 %v4607_v55  ;;  %v4615_v10 = vsel %vm1212_vm10, 1e+30, %v4263_v46 }
 0x545   : > { %6898 = vst [vmem:[#allocation21_spill] sm:$0xff] %v4615_v10  ;;  %v4617_v8 = vadd.s32 %v1072_v49, %v1070_v60  ;;  %v1195_v7 = vpop.xlane.xlu1 %1194  ;;  %1256 = vmin.xlane.f32.xlu0 %v4615_v10 }
 0x546   : > { %6897 = vst [vmem:[#allocation20_spill] sm:$0xff] %v4611_v23  ;;  %v1196_v57 = vcvt.f32.s32 %v1195_v7  ;;  %v1181_v17 = vpop.xlane.xlu0 %1180  ;;  %vm1207_vm11 = vcmp.eq.s32.totalorder %v3942_v26, %v4611_v23 }
 0x547   : > { %6899 = vst [vmem:[#allocation22_spill] sm:$0xff] %v4617_v8  ;;  %v1182_v40 = vcvt.f32.s32 %v1181_v17  ;;  %v4623_v12 = vsel %vm1207_vm11, 1e+30, %v4271_v48  ;;  %vm1206_vm12 = vcmp.eq.s32.totalorder %v3942_v26, %v4617_v8 }
 0x548   : > { %6900 = vst [vmem:[#allocation23_spill] sm:$0xff] %v4623_v12  ;;  %v4627_v46 = vadd.s32 %v1198_v33, %v1196_v57  ;;  %1246 = vmin.xlane.f32.xlu1 %v4623_v12  ;;  %v4631_v30 = vsel %vm1206_vm12, 1e+30, %v4279_v3 }
 0x549   : > { %6902 = vst [vmem:[#allocation25_spill] sm:$0xff] %v4631_v30  ;;  %v4633_v1 = vadd.s32 %v1184_v19, %v1182_v40  ;;  %1244 = vmin.xlane.f32.xlu0 %v4631_v30 }
 0x54a   : > { %6901 = vst [vmem:[#allocation24_spill] sm:$0xff] %v4627_v46  ;;  %vm1215_vm13 = vcmp.eq.s32.totalorder %v3942_v26, %v4627_v46 }
 0x54b   : > { %6903 = vst [vmem:[#allocation26_spill] sm:$0xff] %v4633_v1  ;;  %v4639_v48 = vsel %vm1215_vm13, 1e+30, %v4287_v21  ;;  %vm1214_vm14 = vcmp.eq.s32.totalorder %v3942_v26, %v4633_v1 }
 0x54c   : > { %6904 = vst [vmem:[#allocation27_spill] sm:$0xff] %v4639_v48  ;;  %1262 = vmin.xlane.f32.xlu1 %v4639_v48  ;;  %v4645_v25 = vsel %vm1214_vm14, 1e+30, %v4293_v54 }
 0x54d   : > { %6905 = vst [vmem:[#allocation28_spill] sm:$0xff] %v4645_v25  ;;  %1260 = vmin.xlane.f32.xlu0 %v4645_v25 }
 0x5bd   : > { %v1235_v3 = vpop.xlane.xlu1 %1234 }
 0x5be   : > { %vm1265_vm15 = vcmp.le.f32.partialorder %v4517_v58, %v1235_v3  ;;  %v1233_v51 = vpop.xlane.xlu0 %1232 }
 0x5bf   : > { %v4650_v36 = vsel %vm1265_vm15, %v3942_v26, 128  ;;  %vm1264_vm2 = vcmp.le.f32.partialorder %v4525_v5, %v1233_v51 }
 0x5c0   : > { %v1311_v21 = vshra.s32 %v4650_v36, 16  ;;  %v4655_v32 = vsel %vm1264_vm2, %v3942_v26, 128 }
 0x5c1   : > { %v1297_v9 = vshra.s32 %v4655_v32, 16  ;;  %v1251_v54 = vpop.xlane.xlu1 %1250 }
 0x5c2   : > { %vm1273_vm3 = vcmp.le.f32.partialorder %v4535_v2, %v1251_v54  ;;  %v1249_v15 = vpop.xlane.xlu0 %1248  ;;  %v4659_v22 = vcvt.s32.f32 %v1311_v21 }
 0x5c3   : > { %v4662_v13 = vsel %vm1273_vm3, %v3942_v26, 128  ;;  %vm1272_vm4 = vcmp.le.f32.partialorder %v4543_v29, %v1249_v15  ;;  %v4665_v39 = vcvt.s32.f32 %v1297_v9 }
 0x5c4   : > { %v1423_v14 = vshra.s32 %v4662_v13, 16  ;;  %v4669_v0 = vsel %vm1272_vm4, %v3942_v26, 128  ;;  %1314 = vmin.xlane.f32.xlu1 %v4659_v22 }
 0x5c5   : > { %v1409_v28 = vshra.s32 %v4669_v0, 16  ;;  %v1239_v49 = vpop.xlane.xlu1 %1238  ;;  %1300 = vmin.xlane.f32.xlu0 %v4665_v39 }
 0x5c6   : > { %vm1267_vm5 = vcmp.le.f32.partialorder %v4553_v63, %v1239_v49  ;;  %v1237_v16 = vpop.xlane.xlu0 %1236  ;;  %v4675_v53 = vcvt.s32.f32 %v1423_v14 }
 0x5c7   : > { %v4678_v24 = vsel %vm1267_vm5, %v3942_v26, 128  ;;  %vm1266_vm6 = vcmp.le.f32.partialorder %v4561_v27, %v1237_v16  ;;  %v4681_v11 = vcvt.s32.f32 %v1409_v28 }
 0x5c8   : > { %v1339_v60 = vshra.s32 %v4678_v24, 16  ;;  %v4685_v7 = vsel %vm1266_vm6, %v3942_v26, 128  ;;  %1426 = vmin.xlane.f32.xlu1 %v4675_v53 }
 0x5c9   : > { %v1325_v33 = vshra.s32 %v4685_v7, 16  ;;  %v1255_v57 = vpop.xlane.xlu1 %1254  ;;  %1412 = vmin.xlane.f32.xlu0 %v4681_v11 }
 0x5ca   : > { %vm1275_vm7 = vcmp.le.f32.partialorder %v4571_v52, %v1255_v57  ;;  %v1253_v17 = vpop.xlane.xlu0 %1252  ;;  %v4691_v19 = vcvt.s32.f32 %v1339_v60 }
 0x5cb   : > { %v4694_v40 = vsel %vm1275_vm7, %v3942_v26, 128  ;;  %vm1274_vm8 = vcmp.le.f32.partialorder %v4579_v44, %v1253_v17  ;;  %v4697_v3 = vcvt.s32.f32 %v1325_v33 }
 0x5cc   : > { %v1451_v51 = vshra.s32 %v4694_v40, 16  ;;  %v4701_v21 = vsel %vm1274_vm8, %v3942_v26, 128  ;;  %1342 = vmin.xlane.f32.xlu1 %v4691_v19 }
 0x5cd   : > { %v1437_v9 = vshra.s32 %v4701_v21, 16  ;;  %v1243_v54 = vpop.xlane.xlu1 %1242  ;;  %1328 = vmin.xlane.f32.xlu0 %v4697_v3 }
 0x5ce   : > { %vm1269_vm9 = vcmp.le.f32.partialorder %v4589_v38, %v1243_v54  ;;  %v1241_v15 = vpop.xlane.xlu0 %1240  ;;  %v4707_v14 = vcvt.s32.f32 %v1451_v51  ;;  %v1408_v38 = vand.u32 65535, %v4669_v0  ;;  %v1324_v0 = vand.u32 65535, %v4685_v7 }
 0x5cf   : > { %v4710_v28 = vsel %vm1269_vm9, %v3942_v26, 128  ;;  %vm1268_vm10 = vcmp.le.f32.partialorder %v4597_v18, %v1241_v15  ;;  %v4713_v49 = vcvt.s32.f32 %v1437_v9  ;;  %v1436_v7 = vand.u32 65535, %v4701_v21 }
 0x5d0   : > { %v1367_v16 = vshra.s32 %v4710_v28, 16  ;;  %v4717_v60 = vsel %vm1268_vm10, %v3942_v26, 128  ;;  %1454 = vmin.xlane.f32.xlu1 %v4707_v14 }
 0x5d1   : > { %v1353_v33 = vshra.s32 %v4717_v60, 16  ;;  %v1259_v57 = vpop.xlane.xlu1 %1258  ;;  %1440 = vmin.xlane.f32.xlu0 %v4713_v49  ;;  %v1352_v21 = vand.u32 65535, %v4717_v60 }
 0x5d2   : > { %vm1277_vm11 = vcmp.le.f32.partialorder %v4607_v55, %v1259_v57  ;;  %v1257_v17 = vpop.xlane.xlu0 %1256  ;;  %v4723_v51 = vcvt.s32.f32 %v1367_v16 }
 0x5d3   : > { %v4726_v9 = vsel %vm1277_vm11, %v3942_v26, 128  ;;  %vm1276_vm12 = vcmp.le.f32.partialorder %v4615_v10, %v1257_v17  ;;  %v4729_v54 = vcvt.s32.f32 %v1353_v33 }
 0x5d4   : > { %v1479_v15 = vshra.s32 %v4726_v9, 16  ;;  %v4733_v1 = vsel %vm1276_vm12, %v3942_v26, 128  ;;  %1370 = vmin.xlane.f32.xlu1 %v4723_v51 }
 0x5d5   : > { %v1465_v46 = vshra.s32 %v4733_v1, 16  ;;  %v1247_v57 = vpop.xlane.xlu1 %1246  ;;  %1356 = vmin.xlane.f32.xlu0 %v4729_v54  ;;  %v1464_v60 = vand.u32 65535, %v4733_v1 }
 0x5d6   : > { %vm1271_vm13 = vcmp.le.f32.partialorder %v4623_v12, %v1247_v57  ;;  %v1245_v16 = vpop.xlane.xlu0 %1244  ;;  %v4739_v8 = vcvt.s32.f32 %v1479_v15 }
 0x5d7   : > { %v4742_v33 = vsel %vm1271_vm13, %v3942_v26, 128  ;;  %vm1270_vm14 = vcmp.le.f32.partialorder %v4631_v30, %v1245_v16  ;;  %v4745_v17 = vcvt.s32.f32 %v1465_v46 }
 0x5d8   : > { %v1395_v23 = vshra.s32 %v4742_v33, 16  ;;  %v4749_v10 = vsel %vm1270_vm14, %v3942_v26, 128  ;;  %1482 = vmin.xlane.f32.xlu1 %v4739_v8 }
 0x5d9   : > { %v1381_v55 = vshra.s32 %v4749_v10, 16  ;;  %v1263_v57 = vpop.xlane.xlu1 %1262  ;;  %1468 = vmin.xlane.f32.xlu0 %v4745_v17  ;;  %v1380_v1 = vand.u32 65535, %v4749_v10 }
 0x5da   : > { %vm1279_vm15 = vcmp.le.f32.partialorder %v4639_v48, %v1263_v57  ;;  %v1261_v15 = vpop.xlane.xlu0 %1260  ;;  %v4755_v12 = vcvt.s32.f32 %v1395_v23 }
 0x5db   : > { %v4758_v46 = vsel %vm1279_vm15, %v3942_v26, 128  ;;  %vm1278_vm2 = vcmp.le.f32.partialorder %v4645_v25, %v1261_v15  ;;  %v4761_v16 = vcvt.s32.f32 %v1381_v55  ;;  %v1310_v55 = vand.u32 65535, %v4650_v36 }
 0x5dc   : > { %v1507_v30 = vshra.s32 %v4758_v46, 16  ;;  %v4765_v18 = vsel %vm1278_vm2, %v3942_v26, 128  ;;  %1398 = vmin.xlane.f32.xlu1 %v4755_v12  ;;  %v1296_v15 = vand.u32 65535, %v4655_v32  ;;  %v1422_v25 = vand.u32 65535, %v4662_v13 }
 0x5dd   : > { %v1493_v47 = vshra.s32 %v4765_v18, 16  ;;  %1384 = vmin.xlane.f32.xlu0 %v4761_v16  ;;  %v1312_v4 = vcvt.s32.f32 %v1310_v55  ;;  %v1338_v32 = vand.u32 65535, %v4678_v24  ;;  %v1450_v24 = vand.u32 65535, %v4694_v40 }
 0x5de   : > { %v4770_v23 = vcvt.s32.f32 %v1507_v30  ;;  %v1424_v55 = vcvt.s32.f32 %v1422_v25  ;;  %v1366_v40 = vand.u32 65535, %v4710_v28  ;;  %v1478_v28 = vand.u32 65535, %v4726_v9 }
 0x5df   : > { %v4772_v57 = vcvt.s32.f32 %v1493_v47  ;;  %v1298_v47 = vcvt.s32.f32 %v1296_v15  ;;  %v1340_v25 = vcvt.s32.f32 %v1338_v32  ;;  %v1394_v9 = vand.u32 65535, %v4742_v33 }
 0x5e0   : > { %1510 = vmin.xlane.f32.xlu1 %v4770_v23  ;;  %v1506_v33 = vand.u32 65535, %v4758_v46  ;;  %v1492_v10 = vand.u32 65535, %v4765_v18 }
 0x5e1   : > { %1496 = vmin.xlane.f32.xlu0 %v4772_v57 }
 0x5e2   : > { %v1508_v46 = vcvt.s32.f32 %v1506_v33  ;;  %v1494_v18 = vcvt.s32.f32 %v1492_v10 }
 0x651   : > { %v4779_v48 = vpop.xlane.xlu1 %1314 }
 0x652   : > { %v4782_v44 = vpop.xlane.xlu0 %1300  ;;  %vm1316_vm3 = vcmp.eq.f32.partialorder %v4659_v22, %v4779_v48  ;;  %v1410_v22 = vcvt.s32.f32 %v1408_v38  ;;  %v1326_v38 = vcvt.s32.f32 %v1324_v0 }
 0x653   : > { %v1317_v30 = vsel %vm1316_vm3, %v1312_v4, inf  ;;  %vm1302_vm4 = vcmp.eq.f32.partialorder %v4665_v39, %v4782_v44 }
 0x654   : > { %1318 = vmin.xlane.f32.xlu1 %v1317_v30  ;;  %v1303_v36 = vsel %vm1302_vm4, %v1298_v47, inf }
 0x655   : > { %v4789_v13 = vpop.xlane.xlu1 %1426  ;;  %1304 = vmin.xlane.f32.xlu0 %v1303_v36  ;;  %v1452_v36 = vcvt.s32.f32 %v1450_v24 }
 0x656   : > { %v4792_v56 = vpop.xlane.xlu0 %1412  ;;  %vm1428_vm5 = vcmp.eq.f32.partialorder %v4675_v53, %v4789_v13 }
 0x657   : > { %v1429_v4 = vsel %vm1428_vm5, %v1424_v55, inf  ;;  %vm1414_vm6 = vcmp.eq.f32.partialorder %v4681_v11, %v4792_v56  ;;  %vm3120_vm5 = vcmask 7168  }
 0x658   : > { %1430 = vmin.xlane.f32.xlu1 %v1429_v4  ;;  %v1415_v39 = vsel %vm1414_vm6, %v1410_v22, inf  ;;  %v1368_v22 = vcvt.s32.f32 %v1366_v40  ;;  %vm3137_vm6 = vcmask 15360  }
 0x659   : > { %v4799_v15 = vpop.xlane.xlu1 %1342  ;;  %1416 = vmin.xlane.f32.xlu0 %v1415_v39 }
 0x65a   : > { %v4802_v47 = vpop.xlane.xlu0 %1328  ;;  %vm1344_vm7 = vcmp.eq.f32.partialorder %v4691_v19, %v4799_v15  ;;  %v1438_v19 = vcvt.s32.f32 %v1436_v7 }
 0x65b   : > { %v1345_v53 = vsel %vm1344_vm7, %v1340_v25, inf  ;;  %vm1330_vm8 = vcmp.eq.f32.partialorder %v4697_v3, %v4802_v47  ;;  %v1480_v25 = vcvt.s32.f32 %v1478_v28  ;;  %v1433_v28 = vcvt.f32.s32 %v4789_v13 }
 0x65c   : > { %1346 = vmin.xlane.f32.xlu1 %v1345_v53  ;;  %v1331_v11 = vsel %vm1330_vm8, %v1326_v38, inf  ;;  %v1349_v13 = vcvt.f32.s32 %v4799_v15  ;;  %v3129_v15 = vsel %vm3120_vm5, %v4175_v6, %v4527_v61 }
 0x65d   : > { %v4809_v30 = vpop.xlane.xlu1 %1454  ;;  %1332 = vmin.xlane.f32.xlu0 %v1331_v11  ;;  %v1396_v11 = vcvt.s32.f32 %v1394_v9 }
 0x65e   : > { %v4812_v32 = vpop.xlane.xlu0 %1440  ;;  %vm1456_vm9 = vcmp.eq.f32.partialorder %v4707_v14, %v4809_v30  ;;  %v1354_v14 = vcvt.s32.f32 %v1352_v21 }
 0x65f   : > { %v1457_v55 = vsel %vm1456_vm9, %v1452_v36, inf  ;;  %vm1442_vm10 = vcmp.eq.f32.partialorder %v4713_v49, %v4812_v32 }
 0x660   : > { %1458 = vmin.xlane.f32.xlu1 %v1457_v55  ;;  %v1443_v3 = vsel %vm1442_vm10, %v1438_v19, inf }
 0x661   : > { %v4819_v0 = vpop.xlane.xlu1 %1370  ;;  %1444 = vmin.xlane.f32.xlu0 %v1443_v3  ;;  %v1307_v3 = vcvt.f32.s32 %v4782_v44  ;;  %v3121_v44 = vsel %vm3120_vm5, %v4159_v62, %v4511_v31  ;;  %v3130_v31 = vsel %vm3120_vm5, %v4169_v42, %v4521_v41  ;;  %v1447_v42 = vcvt.f32.s32 %v4812_v32  ;;  %v6906_v32 = vld [vmem:[#allocation2_spill] sm:$0xff] }
 0x662   : > { %v4822_v4 = vpop.xlane.xlu0 %1356  ;;  %vm1372_vm11 = vcmp.eq.f32.partialorder %v4723_v51, %v4819_v0  ;;  %v1466_v51 = vcvt.s32.f32 %v1464_v60 }
 0x663   : > { %v1373_v39 = vsel %vm1372_vm11, %v1368_v22, inf  ;;  %vm1358_vm12 = vcmp.eq.f32.partialorder %v4729_v54, %v4822_v4 }
 0x664   : > { %1374 = vmin.xlane.f32.xlu1 %v1373_v39  ;;  %v1359_v49 = vsel %vm1358_vm12, %v1354_v14, inf  ;;  %v1419_v14 = vcvt.f32.s32 %v4792_v56 }
 0x665   : > { %v4829_v24 = vpop.xlane.xlu1 %1482  ;;  %1360 = vmin.xlane.f32.xlu0 %v1359_v49  ;;  %v1308_v49 = vshll.u32 %v1307_v3, 16 }
 0x666   : > { %v4832_v7 = vpop.xlane.xlu0 %1468  ;;  %vm1484_vm13 = vcmp.eq.f32.partialorder %v4739_v8, %v4829_v24  ;;  %v1382_v8 = vcvt.s32.f32 %v1380_v1  ;;  %v1335_v1 = vcvt.f32.s32 %v4802_v47 }
 0x667   : > { %v1485_v38 = vsel %vm1484_vm13, %v1480_v25, inf  ;;  %vm1470_vm14 = vcmp.eq.f32.partialorder %v4745_v17, %v4832_v7  ;;  %v1434_v25 = vshll.u32 %v1433_v28, 16 }
 0x668   : > { %1486 = vmin.xlane.f32.xlu1 %v1485_v38  ;;  %v1471_v54 = vsel %vm1470_vm14, %v1466_v51, inf  ;;  %v1420_v38 = vshll.u32 %v1419_v14, 16 }
 0x669   : > { %v4839_v53 = vpop.xlane.xlu1 %1398  ;;  %1472 = vmin.xlane.f32.xlu0 %v1471_v54 }
 0x66a   : > { %v4842_v40 = vpop.xlane.xlu0 %1384  ;;  %vm1400_vm15 = vcmp.eq.f32.partialorder %v4755_v12, %v4839_v53 }
 0x66b   : > { %v1401_v36 = vsel %vm1400_vm15, %v1396_v11, inf  ;;  %vm1386_vm2 = vcmp.eq.f32.partialorder %v4761_v16, %v4842_v40  ;;  %v1321_v16 = vcvt.f32.s32 %v4779_v48 }
 0x66c   : > { %1402 = vmin.xlane.f32.xlu1 %v1401_v36  ;;  %v1387_v17 = vsel %vm1386_vm2, %v1382_v8, inf  ;;  %v1350_v8 = vshll.u32 %v1349_v13, 16  ;;  %v1336_v36 = vshll.u32 %v1335_v1, 16 }
 0x66d   : > { %v4848_v21 = vpop.xlane.xlu1 %1510  ;;  %1388 = vmin.xlane.f32.xlu0 %v1387_v17  ;;  %v1322_v60 = vshll.u32 %v1321_v16, 16 }
 0x66e   : > { %v4850_v19 = vpop.xlane.xlu0 %1496  ;;  %vm1512_vm3 = vcmp.eq.f32.partialorder %v4770_v23, %v4848_v21 }
 0x66f   : > { %v1513_v55 = vsel %vm1512_vm3, %v1508_v46, inf  ;;  %vm1498_vm4 = vcmp.eq.f32.partialorder %v4772_v57, %v4850_v19  ;;  %v3122_v57 = vsel %vm3120_vm5, %v4156_v59, %v4508_v34 }
 0x670   : > { %1514 = vmin.xlane.f32.xlu1 %v1513_v55  ;;  %v1499_v12 = vsel %vm1498_vm4, %v1494_v18, inf }
 0x671   : > { %1500 = vmin.xlane.f32.xlu0 %v1499_v12  ;;  %v3123_v12 = vsel %vm3120_vm5, %v6906_v32, %v4546_v45 }
 0x6e1   : > { %v1319_v22 = vpop.xlane.xlu1 %1318 }
 0x6e2   : > { %v1320_v23 = vcvt.f32.s32 %v1319_v22  ;;  %v1305_v39 = vpop.xlane.xlu0 %1304  ;;  %v1363_v22 = vcvt.f32.s32 %v4822_v4  ;;  %v6907_v4 = vld [vmem:[#allocation3_spill] sm:$0xff] }
 0x6e3   : > { %v1306_v9 = vcvt.f32.s32 %v1305_v39 }
 0x6e4   : > { %v1323_v48 = vadd.s32 %v1322_v60, %v1320_v23  ;;  %v1364_v13 = vshll.u32 %v1363_v22, 16  ;;  %v6917_v22 = vld [vmem:[#allocation8_spill] sm:$0xff] }
 0x6e5   : > { %v1309_v56 = vadd.s32 %v1308_v49, %v1306_v9  ;;  %v1431_v51 = vpop.xlane.xlu1 %1430  ;;  %v3132_v49 = vsel %vm3120_vm5, %v6907_v4, %v4557_v35  ;;  %v6908_v9 = vld [vmem:[#allocation4_spill] sm:$0xff]  ;;  %v1475_v35 = vcvt.f32.s32 %v4832_v7  ;;  %v1517_v4 = vcvt.f32.s32 %v4848_v21 }
 0x6e6   : > { %v4869_v54 = vsel %vm3137_vm6, %v3122_v57, %v1323_v48  ;;  %v1432_v33 = vcvt.f32.s32 %v1431_v51  ;;  %v1417_v11 = vpop.xlane.xlu0 %1416  ;;  %vm1521_vm7 = vcmp.eq.s32.totalorder %v3942_v26, %v1323_v48  ;;  %v3131_v57 = vsel %vm3120_vm5, %v6908_v9, %v4563_v37 }
 0x6e7   : > { %v4873_v59 = vsel %vm3137_vm6, %v3121_v44, %v1309_v56  ;;  %v1418_v62 = vcvt.f32.s32 %v1417_v11  ;;  %v4876_v34 = vsel %vm1521_vm7, 1e+30, %v4517_v58  ;;  %vm1520_vm8 = vcmp.eq.s32.totalorder %v3942_v26, %v1309_v56 }
 0x6e8   : > { %v1435_v47 = vadd.s32 %v1434_v25, %v1432_v33  ;;  %1554 = vmin.xlane.f32.xlu1 %v4876_v34  ;;  %v4887_v10 = vsel %vm1520_vm8, 1e+30, %v4525_v5  ;;  %v1461_v58 = vcvt.f32.s32 %v4809_v30  ;;  %v3124_v30 = vsel %vm3120_vm5, %v4187_v43, %v4539_v20 }
 0x6e9   : > { %v1421_v17 = vadd.s32 %v1420_v38, %v1418_v62  ;;  %v1347_v46 = vpop.xlane.xlu1 %1346  ;;  %1552 = vmin.xlane.f32.xlu0 %v4887_v10  ;;  %v1448_v43 = vshll.u32 %v1447_v42, 16  ;;  %v6910_v62 = vld [vmem:[#allocation14_spill] sm:$0xff] }
 0x6ea   : > { %v4893_v41 = vsel %vm3137_vm6, %v3130_v31, %v1435_v47  ;;  %v1348_v6 = vcvt.f32.s32 %v1347_v46  ;;  %v1333_v61 = vpop.xlane.xlu0 %1332  ;;  %vm1529_vm9 = vcmp.eq.s32.totalorder %v3942_v26, %v1435_v47  ;;  %v1462_v28 = vshll.u32 %v1461_v58, 16  ;;  %v6911_v31 = vld [vmem:[#allocation6_spill] sm:$0xff] }
 0x6eb   : > { %v4897_v5 = vsel %vm3137_vm6, %v3129_v15, %v1421_v17  ;;  %v1334_v18 = vcvt.f32.s32 %v1333_v61  ;;  %v4900_v55 = vsel %vm1529_vm9, 1e+30, %v4535_v2  ;;  %vm1528_vm10 = vcmp.eq.s32.totalorder %v3942_v26, %v1421_v17 }
 0x6ec   : > { %v1351_v16 = vadd.s32 %v1350_v8, %v1348_v6  ;;  %1570 = vmin.xlane.f32.xlu1 %v4900_v55  ;;  %v4911_v3 = vsel %vm1528_vm10, 1e+30, %v4543_v29  ;;  %v1377_v2 = vcvt.f32.s32 %v4819_v0  ;;  %v3125_v15 = vsel %vm3120_vm5, %v6911_v31, %v6910_v62  ;;  %v6912_v8 = vld [vmem:[#allocation13_spill] sm:$0xff]  ;;  %v6927_v62 = vld [vmem:[#allocation10_spill] sm:$0xff] }
 0x6ed   : > { %v1337_v60 = vadd.s32 %v1336_v36, %v1334_v18  ;;  %v1459_v14 = vpop.xlane.xlu1 %1458  ;;  %1568 = vmin.xlane.f32.xlu0 %v4911_v3  ;;  %v1391_v17 = vcvt.f32.s32 %v4842_v40  ;;  %v6914_v40 = vld [vmem:[#allocation16_spill] sm:$0xff] }
 0x6ee   : > { %v4917_v20 = vsel %vm3137_vm6, %v3124_v30, %v1351_v16  ;;  %v1460_v45 = vcvt.f32.s32 %v1459_v14  ;;  %v1445_v23 = vpop.xlane.xlu0 %1444  ;;  %vm1523_vm11 = vcmp.eq.s32.totalorder %v3942_v26, %v1351_v16  ;;  %v1378_v25 = vshll.u32 %v1377_v2, 16  ;;  %v6915_v16 = vld [vmem:[#allocation7_spill] sm:$0xff]  ;;  %v6916_v2 = vld [vmem:[#allocation18_spill] sm:$0xff] }
 0x6ef   : > { %v4921_v29 = vsel %vm3137_vm6, %v3123_v12, %v1337_v60  ;;  %v1446_v39 = vcvt.f32.s32 %v1445_v23  ;;  %v4924_v0 = vsel %vm1523_vm11, 1e+30, %v4553_v63  ;;  %vm1522_vm12 = vcmp.eq.s32.totalorder %v3942_v26, %v1337_v60  ;;  %v6913_v12 = vld [vmem:[#allocation15_spill] sm:$0xff] }
 0x6f0   : > { %v1463_v44 = vadd.s32 %v1462_v28, %v1460_v45  ;;  %1558 = vmin.xlane.f32.xlu1 %v4924_v0  ;;  %v4935_v48 = vsel %vm1522_vm12, 1e+30, %v4561_v27  ;;  %v1489_v63 = vcvt.f32.s32 %v4829_v24  ;;  %v6909_v24 = vld [vmem:[#allocation5_spill] sm:$0xff]  ;;  %v3134_v28 = vsel %vm3120_vm5, %v6915_v16, %v6914_v40  ;;  %v6934_v16 = vld [vmem:[#allocation24_spill] sm:$0xff] }
 0x6f1   : > { %v1449_v1 = vadd.s32 %v1448_v43, %v1446_v39  ;;  %v1375_v56 = vpop.xlane.xlu1 %1374  ;;  %1556 = vmin.xlane.f32.xlu0 %v4935_v48  ;;  %v3126_v7 = vsel %vm3120_vm5, %v6909_v24, %v4575_v50  ;;  %v1476_v50 = vshll.u32 %v1475_v35, 16  ;;  %v3133_v60 = vsel %vm3120_vm5, %v6917_v22, %v6916_v2  ;;  %v6918_v43 = vld [vmem:[#allocation17_spill] sm:$0xff] }
 0x6f2   : > { %v4941_v51 = vsel %vm3137_vm6, %v3132_v49, %v1463_v44  ;;  %v1376_v37 = vcvt.f32.s32 %v1375_v56  ;;  %v1361_v38 = vpop.xlane.xlu0 %1360  ;;  %vm1531_vm13 = vcmp.eq.s32.totalorder %v3942_v26, %v1463_v44  ;;  %v1490_v58 = vshll.u32 %v1489_v63, 16  ;;  %v6920_v56 = vld [vmem:[#allocation19_spill] sm:$0xff] }
 0x6f3   : > { %v4945_v27 = vsel %vm3137_vm6, %v3131_v57, %v1449_v1  ;;  %v1362_v33 = vcvt.f32.s32 %v1361_v38  ;;  %v4948_v11 = vsel %vm1531_vm13, 1e+30, %v4571_v52  ;;  %vm1530_vm14 = vcmp.eq.s32.totalorder %v3942_v26, %v1449_v1  ;;  %v6924_v38 = vld [vmem:[#allocation20_spill] sm:$0xff] }
 0x6f4   : > { %v1379_v47 = vadd.s32 %v1378_v25, %v1376_v37  ;;  %1574 = vmin.xlane.f32.xlu1 %v4948_v11  ;;  %v4959_v36 = vsel %vm1530_vm14, 1e+30, %v6912_v8  ;;  %v1405_v52 = vcvt.f32.s32 %v4839_v53  ;;  %v1392_v39 = vshll.u32 %v1391_v17, 16 }
 0x6f5   : > { %v1365_v46 = vadd.s32 %v1364_v13, %v1362_v33  ;;  %v1487_v42 = vpop.xlane.xlu1 %1486  ;;  %1572 = vmin.xlane.f32.xlu0 %v4959_v36  ;;  %v1503_v57 = vcvt.f32.s32 %v4850_v19  ;;  %v6922_v19 = vld [vmem:[#allocation21_spill] sm:$0xff] }
 0x6f6   : > { %v4965_v6 = vsel %vm3137_vm6, %v3126_v7, %v1379_v47  ;;  %v1488_v61 = vcvt.f32.s32 %v1487_v42  ;;  %v1473_v18 = vpop.xlane.xlu0 %1472  ;;  %vm1525_vm15 = vcmp.eq.s32.totalorder %v3942_v26, %v1379_v47  ;;  %v1406_v23 = vshll.u32 %v1405_v52, 16  ;;  %v6925_v33 = vld [vmem:[#allocation9_spill] sm:$0xff]  ;;  %v6926_v7 = vld [vmem:[#allocation22_spill] sm:$0xff] }
 0x6f7   : > { %v4969_v30 = vsel %vm3137_vm6, %v3125_v15, %v1365_v46  ;;  %v1474_v32 = vcvt.f32.s32 %v1473_v18  ;;  %v4972_v53 = vsel %vm1525_vm15, 1e+30, %v6913_v12  ;;  %vm1524_vm2 = vcmp.eq.s32.totalorder %v3942_v26, %v1365_v46  ;;  %v6932_v12 = vld [vmem:[#allocation25_spill] sm:$0xff] }
 0x6f8   : > { %v1491_v14 = vadd.s32 %v1490_v58, %v1488_v61  ;;  %1562 = vmin.xlane.f32.xlu1 %v4972_v53  ;;  %v4983_v45 = vsel %vm1524_vm2, 1e+30, %v6918_v43  ;;  %v3128_v24 = vsel %vm3120_vm5, %v6925_v33, %v6924_v38  ;;  %v3127_v31 = vsel %vm3120_vm5, %v6927_v62, %v6926_v7  ;;  %v6930_v61 = vld [vmem:[#allocation23_spill] sm:$0xff] }
 0x6f9   : > { %v1477_v49 = vadd.s32 %v1476_v50, %v1474_v32  ;;  %v1403_v9 = vpop.xlane.xlu1 %1402  ;;  %1560 = vmin.xlane.f32.xlu0 %v4983_v45  ;;  %v1518_v15 = vshll.u32 %v1517_v4, 16  ;;  %v1504_v58 = vshll.u32 %v1503_v57, 16  ;;  %v6940_v4 = vld [vmem:[#allocation27_spill] sm:$0xff] }
 0x6fa   : > { %v4989_v44 = vsel %vm3137_vm6, %v3134_v28, %v1491_v14  ;;  %v1404_v25 = vcvt.f32.s32 %v1403_v9  ;;  %v1389_v13 = vpop.xlane.xlu0 %1388  ;;  %vm1533_vm3 = vcmp.eq.s32.totalorder %v3942_v26, %v1491_v14  ;;  %v6935_v28 = vld [vmem:[#allocation11_spill] sm:$0xff]  ;;  %v6937_v14 = vld [vmem:[#allocation12_spill] sm:$0xff] }
 0x6fb   : > { %v4993_v63 = vsel %vm3137_vm6, %v3133_v60, %v1477_v49  ;;  %v1390_v1 = vcvt.f32.s32 %v1389_v13  ;;  %v4996_v35 = vsel %vm1533_vm3, 1e+30, %v6920_v56  ;;  %vm1532_vm4 = vcmp.eq.s32.totalorder %v3942_v26, %v1477_v49  ;;  %v6936_v60 = vld [vmem:[#allocation26_spill] sm:$0xff]  ;;  %v6942_v9 = vld [vmem:[#allocation28_spill] sm:$0xff] }
 0x6fc   : > { %6919 = vst [vmem:[#allocation2_spill] sm:$0xff] %v4993_v63  ;;  %6921 = vst [vmem:[#allocation3_spill] sm:$0xff] %v4996_v35  ;;  %v1407_v21 = vadd.s32 %v1406_v23, %v1404_v25  ;;  %1578 = vmin.xlane.f32.xlu1 %v4996_v35  ;;  %v5001_v37 = vsel %vm1532_vm4, 1e+30, %v6922_v19  ;;  %v3136_v2 = vsel %vm3120_vm5, %v6935_v28, %v6934_v16 }
 0x6fd   : > { %6923 = vst [vmem:[#allocation4_spill] sm:$0xff] %v5001_v37  ;;  %v1393_v47 = vadd.s32 %v1392_v39, %v1390_v1  ;;  %v1515_v8 = vpop.xlane.xlu1 %1514  ;;  %1576 = vmin.xlane.f32.xlu0 %v5001_v37  ;;  %v3135_v43 = vsel %vm3120_vm5, %v6937_v14, %v6936_v60 }
 0x6fe   : > { %v5011_v52 = vsel %vm3137_vm6, %v3128_v24, %v1407_v21  ;;  %v1516_v17 = vcvt.f32.s32 %v1515_v8  ;;  %v1501_v46 = vpop.xlane.xlu0 %1500  ;;  %vm1527_vm7 = vcmp.eq.s32.totalorder %v3942_v26, %v1407_v21 }
 0x6ff   : > { %6928 = vst [vmem:[#allocation5_spill] sm:$0xff] %v5011_v52  ;;  %v5015_v42 = vsel %vm3137_vm6, %v3127_v31, %v1393_v47  ;;  %v1502_v50 = vcvt.f32.s32 %v1501_v46  ;;  %v5018_v18 = vsel %vm1527_vm7, 1e+30, %v6930_v61  ;;  %vm1526_vm8 = vcmp.eq.s32.totalorder %v3942_v26, %v1393_v47 }
 0x700   : > { %6929 = vst [vmem:[#allocation14_spill] sm:$0xff] %v5015_v42  ;;  %6931 = vst [vmem:[#allocation6_spill] sm:$0xff] %v5018_v18  ;;  %v1519_v32 = vadd.s32 %v1518_v15, %v1516_v17  ;;  %1566 = vmin.xlane.f32.xlu1 %v5018_v18  ;;  %v5023_v40 = vsel %vm1526_vm8, 1e+30, %v6932_v12 }
 0x701   : > { %6933 = vst [vmem:[#allocation13_spill] sm:$0xff] %v5023_v40  ;;  %v1505_v22 = vadd.s32 %v1504_v58, %v1502_v50  ;;  %1564 = vmin.xlane.f32.xlu0 %v5023_v40 }
 0x702   : > { %v5033_v23 = vsel %vm3137_vm6, %v3136_v2, %v1519_v32  ;;  %vm1535_vm9 = vcmp.eq.s32.totalorder %v3942_v26, %v1519_v32 }
 0x703   : > { %6938 = vst [vmem:[#allocation15_spill] sm:$0xff] %v5033_v23  ;;  %v5037_v39 = vsel %vm3137_vm6, %v3135_v43, %v1505_v22  ;;  %v5040_v49 = vsel %vm1535_vm9, 1e+30, %v6940_v4  ;;  %vm1534_vm10 = vcmp.eq.s32.totalorder %v3942_v26, %v1505_v22 }
 0x704   : > { %6939 = vst [vmem:[#allocation16_spill] sm:$0xff] %v5037_v39  ;;  %6941 = vst [vmem:[#allocation7_spill] sm:$0xff] %v5040_v49  ;;  %1582 = vmin.xlane.f32.xlu1 %v5040_v49  ;;  %v5045_v57 = vsel %vm1534_vm10, 1e+30, %v6942_v9 }
 0x705   : > { %6943 = vst [vmem:[#allocation18_spill] sm:$0xff] %v5045_v57  ;;  %1580 = vmin.xlane.f32.xlu0 %v5045_v57 }
 0x775   : > { %v1555_v25 = vpop.xlane.xlu1 %1554 }
 0x776   : > { %vm1585_vm5 = vcmp.le.f32.partialorder %v4876_v34, %v1555_v25  ;;  %v1553_v13 = vpop.xlane.xlu0 %1552 }
 0x777   : > { %v5050_v1 = vsel %vm1585_vm5, %v3942_v26, 128  ;;  %vm1584_vm6 = vcmp.le.f32.partialorder %v4887_v10, %v1553_v13 }
 0x778   : > { %v1631_v56 = vshra.s32 %v5050_v1, 16  ;;  %v5055_v21 = vsel %vm1584_vm6, %v3942_v26, 128 }
 0x779   : > { %v1617_v19 = vshra.s32 %v5055_v21, 16  ;;  %v1571_v38 = vpop.xlane.xlu1 %1570 }
 0x77a   : > { %vm1593_vm11 = vcmp.le.f32.partialorder %v4900_v55, %v1571_v38  ;;  %v1569_v33 = vpop.xlane.xlu0 %1568  ;;  %v5059_v24 = vcvt.s32.f32 %v1631_v56 }
 0x77b   : > { %v5062_v7 = vsel %vm1593_vm11, %v3942_v26, 128  ;;  %vm1592_vm12 = vcmp.le.f32.partialorder %v4911_v3, %v1569_v33  ;;  %v5065_v62 = vcvt.s32.f32 %v1617_v19 }
 0x77c   : > { %v1743_v31 = vshra.s32 %v5062_v7, 16  ;;  %v5069_v15 = vsel %vm1592_vm12, %v3942_v26, 128  ;;  %1634 = vmin.xlane.f32.xlu1 %v5059_v24 }
 0x77d   : > { %v1729_v47 = vshra.s32 %v5069_v15, 16  ;;  %v1559_v8 = vpop.xlane.xlu1 %1558  ;;  %1620 = vmin.xlane.f32.xlu0 %v5065_v62 }
 0x77e   : > { %vm1587_vm13 = vcmp.le.f32.partialorder %v4924_v0, %v1559_v8  ;;  %v1557_v58 = vpop.xlane.xlu0 %1556  ;;  %v5075_v17 = vcvt.s32.f32 %v1743_v31 }
 0x77f   : > { %v5078_v46 = vsel %vm1587_vm13, %v3942_v26, 128  ;;  %vm1586_vm14 = vcmp.le.f32.partialorder %v4935_v48, %v1557_v58  ;;  %v5081_v50 = vcvt.s32.f32 %v1729_v47 }
 0x780   : > { %v1659_v61 = vshra.s32 %v5078_v46, 16  ;;  %v5085_v32 = vsel %vm1586_vm14, %v3942_v26, 128  ;;  %1746 = vmin.xlane.f32.xlu1 %v5075_v17 }
 0x781   : > { %v1645_v12 = vshra.s32 %v5085_v32, 16  ;;  %v1575_v16 = vpop.xlane.xlu1 %1574  ;;  %1732 = vmin.xlane.f32.xlu0 %v5081_v50 }
 0x782   : > { %vm1595_vm15 = vcmp.le.f32.partialorder %v4948_v11, %v1575_v16  ;;  %v1573_v28 = vpop.xlane.xlu0 %1572  ;;  %v5091_v2 = vcvt.s32.f32 %v1659_v61 }
 0x783   : > { %v5094_v22 = vsel %vm1595_vm15, %v3942_v26, 128  ;;  %vm1594_vm2 = vcmp.le.f32.partialorder %v4959_v36, %v1573_v28  ;;  %v5097_v60 = vcvt.s32.f32 %v1645_v12 }
 0x784   : > { %v1771_v14 = vshra.s32 %v5094_v22, 16  ;;  %v5101_v43 = vsel %vm1594_vm2, %v3942_v26, 128  ;;  %1662 = vmin.xlane.f32.xlu1 %v5091_v2 }
 0x785   : > { %v1757_v4 = vshra.s32 %v5101_v43, 16  ;;  %v1563_v9 = vpop.xlane.xlu1 %1562  ;;  %1648 = vmin.xlane.f32.xlu0 %v5097_v60 }
 0x786   : > { %vm1589_vm3 = vcmp.le.f32.partialorder %v4972_v53, %v1563_v9  ;;  %v1561_v25 = vpop.xlane.xlu0 %1560  ;;  %v5107_v13 = vcvt.s32.f32 %v1771_v14 }
 0x787   : > { %v5110_v56 = vsel %vm1589_vm3, %v3942_v26, 128  ;;  %vm1588_vm4 = vcmp.le.f32.partialorder %v4983_v45, %v1561_v25  ;;  %v5113_v19 = vcvt.s32.f32 %v1757_v4 }
 0x788   : > { %v1687_v38 = vshra.s32 %v5110_v56, 16  ;;  %v5117_v33 = vsel %vm1588_vm4, %v3942_v26, 128  ;;  %1774 = vmin.xlane.f32.xlu1 %v5107_v13 }
 0x789   : > { %v1673_v31 = vshra.s32 %v5117_v33, 16  ;;  %v1579_v47 = vpop.xlane.xlu1 %1578  ;;  %1760 = vmin.xlane.f32.xlu0 %v5113_v19 }
 0x78a   : > { %vm1597_vm7 = vcmp.le.f32.partialorder %v4996_v35, %v1579_v47  ;;  %v1577_v8 = vpop.xlane.xlu0 %1576  ;;  %v5123_v58 = vcvt.s32.f32 %v1687_v38 }
 0x78b   : > { %v5126_v61 = vsel %vm1597_vm7, %v3942_v26, 128  ;;  %vm1596_vm8 = vcmp.le.f32.partialorder %v5001_v37, %v1577_v8  ;;  %v5129_v12 = vcvt.s32.f32 %v1673_v31  ;;  %v1728_v37 = vand.u32 65535, %v5069_v15 }
 0x78c   : > { %v1799_v16 = vshra.s32 %v5126_v61, 16  ;;  %v5133_v28 = vsel %vm1596_vm8, %v3942_v26, 128  ;;  %1690 = vmin.xlane.f32.xlu1 %v5123_v58  ;;  %v1644_v15 = vand.u32 65535, %v5085_v32  ;;  %v1756_v32 = vand.u32 65535, %v5101_v43 }
 0x78d   : > { %v1785_v14 = vshra.s32 %v5133_v28, 16  ;;  %v1567_v4 = vpop.xlane.xlu1 %1566  ;;  %1676 = vmin.xlane.f32.xlu0 %v5129_v12  ;;  %v1672_v43 = vand.u32 65535, %v5117_v33  ;;  %v1784_v33 = vand.u32 65535, %v5133_v28 }
 0x78e   : > { %vm1591_vm9 = vcmp.le.f32.partialorder %v5018_v18, %v1567_v4  ;;  %v1565_v9 = vpop.xlane.xlu0 %1564  ;;  %v5139_v25 = vcvt.s32.f32 %v1799_v16 }
 0x78f   : > { %v5142_v38 = vsel %vm1591_vm9, %v3942_v26, 128  ;;  %vm1590_vm10 = vcmp.le.f32.partialorder %v5023_v40, %v1565_v9  ;;  %v5145_v31 = vcvt.s32.f32 %v1785_v14 }
 0x790   : > { %v1715_v47 = vshra.s32 %v5142_v38, 16  ;;  %v5149_v8 = vsel %vm1590_vm10, %v3942_v26, 128  ;;  %1802 = vmin.xlane.f32.xlu1 %v5139_v25 }
 0x791   : > { %v1701_v39 = vshra.s32 %v5149_v8, 16  ;;  %v1583_v4 = vpop.xlane.xlu1 %1582  ;;  %1788 = vmin.xlane.f32.xlu0 %v5145_v31  ;;  %v1700_v28 = vand.u32 65535, %v5149_v8 }
 0x792   : > { %vm1599_vm5 = vcmp.le.f32.partialorder %v5040_v49, %v1583_v4  ;;  %v1581_v16 = vpop.xlane.xlu0 %1580  ;;  %v5155_v23 = vcvt.s32.f32 %v1715_v47 }
 0x793   : > { %v5158_v14 = vsel %vm1599_vm5, %v3942_v26, 128  ;;  %vm1598_vm6 = vcmp.le.f32.partialorder %v5045_v57, %v1581_v16  ;;  %v5161_v9 = vcvt.s32.f32 %v1701_v39  ;;  %v1630_v39 = vand.u32 65535, %v5050_v1 }
 0x794   : > { %v1827_v40 = vshra.s32 %v5158_v14, 16  ;;  %v5165_v18 = vsel %vm1598_vm6, %v3942_v26, 128  ;;  %1718 = vmin.xlane.f32.xlu1 %v5155_v23  ;;  %v1616_v16 = vand.u32 65535, %v5055_v21  ;;  %v1742_v57 = vand.u32 65535, %v5062_v7 }
 0x795   : > { %v1813_v42 = vshra.s32 %v5165_v18, 16  ;;  %1704 = vmin.xlane.f32.xlu0 %v5161_v9  ;;  %v1632_v52 = vcvt.s32.f32 %v1630_v39  ;;  %v1658_v21 = vand.u32 65535, %v5078_v46  ;;  %v1770_v46 = vand.u32 65535, %v5094_v22 }
 0x796   : > { %v5170_v47 = vcvt.s32.f32 %v1827_v40  ;;  %v1744_v39 = vcvt.s32.f32 %v1742_v57  ;;  %v1686_v22 = vand.u32 65535, %v5110_v56  ;;  %v1798_v56 = vand.u32 65535, %v5126_v61 }
 0x797   : > { %v5172_v4 = vcvt.s32.f32 %v1813_v42  ;;  %v1618_v42 = vcvt.s32.f32 %v1616_v16  ;;  %v1660_v57 = vcvt.s32.f32 %v1658_v21  ;;  %v1714_v61 = vand.u32 65535, %v5142_v38 }
 0x798   : > { %1830 = vmin.xlane.f32.xlu1 %v5170_v47  ;;  %v1826_v38 = vand.u32 65535, %v5158_v14  ;;  %v1812_v8 = vand.u32 65535, %v5165_v18 }
 0x799   : > { %1816 = vmin.xlane.f32.xlu0 %v5172_v4 }
 0x79a   : > { %v1828_v14 = vcvt.s32.f32 %v1826_v38  ;;  %v1814_v18 = vcvt.s32.f32 %v1812_v8 }
 0x809   : > { %v5179_v49 = vpop.xlane.xlu1 %1634 }
 0x80a   : > { %v5182_v35 = vpop.xlane.xlu0 %1620  ;;  %vm1636_vm11 = vcmp.eq.f32.partialorder %v5059_v24, %v5179_v49  ;;  %v1730_v24 = vcvt.s32.f32 %v1728_v37  ;;  %v1646_v37 = vcvt.s32.f32 %v1644_v15 }
 0x80b   : > { %v1637_v40 = vsel %vm1636_vm11, %v1632_v52, inf  ;;  %vm1622_vm12 = vcmp.eq.f32.partialorder %v5065_v62, %v5182_v35 }
 0x80c   : > { %1638 = vmin.xlane.f32.xlu1 %v1637_v40  ;;  %v1623_v1 = vsel %vm1622_vm12, %v1618_v42, inf }
 0x80d   : > { %v5189_v7 = vpop.xlane.xlu1 %1746  ;;  %1624 = vmin.xlane.f32.xlu0 %v1623_v1  ;;  %v1772_v1 = vcvt.s32.f32 %v1770_v46 }
 0x80e   : > { %v5192_v63 = vpop.xlane.xlu0 %1732  ;;  %vm1748_vm13 = vcmp.eq.f32.partialorder %v5075_v17, %v5189_v7 }
 0x80f   : > { %v1749_v52 = vsel %vm1748_vm13, %v1744_v39, inf  ;;  %vm1734_vm14 = vcmp.eq.f32.partialorder %v5081_v50, %v5192_v63 }
 0x810   : > { %1750 = vmin.xlane.f32.xlu1 %v1749_v52  ;;  %v1735_v62 = vsel %vm1734_vm14, %v1730_v24, inf  ;;  %v1688_v24 = vcvt.s32.f32 %v1686_v22 }
 0x811   : > { %v5199_v16 = vpop.xlane.xlu1 %1662  ;;  %1736 = vmin.xlane.f32.xlu0 %v1735_v62 }
 0x812   : > { %v5202_v42 = vpop.xlane.xlu0 %1648  ;;  %vm1664_vm15 = vcmp.eq.f32.partialorder %v5091_v2, %v5199_v16  ;;  %v1758_v2 = vcvt.s32.f32 %v1756_v32 }
 0x813   : > { %v1665_v17 = vsel %vm1664_vm15, %v1660_v57, inf  ;;  %vm1650_vm2 = vcmp.eq.f32.partialorder %v5097_v60, %v5202_v42  ;;  %v1800_v57 = vcvt.s32.f32 %v1798_v56  ;;  %v1753_v56 = vcvt.f32.s32 %v5189_v7 }
 0x814   : > { %1666 = vmin.xlane.f32.xlu1 %v1665_v17  ;;  %v1651_v50 = vsel %vm1650_vm2, %v1646_v37, inf }
 0x815   : > { %v5209_v40 = vpop.xlane.xlu1 %1774  ;;  %1652 = vmin.xlane.f32.xlu0 %v1651_v50  ;;  %v1716_v50 = vcvt.s32.f32 %v1714_v61 }
 0x816   : > { %v5212_v21 = vpop.xlane.xlu0 %1760  ;;  %vm1776_vm3 = vcmp.eq.f32.partialorder %v5107_v13, %v5209_v40  ;;  %v1674_v13 = vcvt.s32.f32 %v1672_v43 }
 0x817   : > { %v1777_v39 = vsel %vm1776_vm3, %v1772_v1, inf  ;;  %vm1762_vm4 = vcmp.eq.f32.partialorder %v5113_v19, %v5212_v21 }
 0x818   : > { %1778 = vmin.xlane.f32.xlu1 %v1777_v39  ;;  %v1763_v60 = vsel %vm1762_vm4, %v1758_v2, inf }
 0x819   : > { %v5219_v15 = vpop.xlane.xlu1 %1690  ;;  %1764 = vmin.xlane.f32.xlu0 %v1763_v60  ;;  %v1627_v60 = vcvt.f32.s32 %v5182_v35 }
 0x81a   : > { %v5222_v52 = vpop.xlane.xlu0 %1676  ;;  %vm1692_vm7 = vcmp.eq.f32.partialorder %v5123_v58, %v5219_v15  ;;  %v1786_v58 = vcvt.s32.f32 %v1784_v33 }
 0x81b   : > { %v1693_v62 = vsel %vm1692_vm7, %v1688_v24, inf  ;;  %vm1678_vm8 = vcmp.eq.f32.partialorder %v5129_v12, %v5222_v52 }
 0x81c   : > { %1694 = vmin.xlane.f32.xlu1 %v1693_v62  ;;  %v1679_v19 = vsel %vm1678_vm8, %v1674_v13, inf  ;;  %v1739_v13 = vcvt.f32.s32 %v5192_v63 }
 0x81d   : > { %v5229_v46 = vpop.xlane.xlu1 %1802  ;;  %1680 = vmin.xlane.f32.xlu0 %v1679_v19  ;;  %v1628_v19 = vshll.u32 %v1627_v60, 16  ;;  %v1697_v60 = vcvt.f32.s32 %v5219_v15 }
 0x81e   : > { %v5232_v32 = vpop.xlane.xlu0 %1788  ;;  %vm1804_vm9 = vcmp.eq.f32.partialorder %v5139_v25, %v5229_v46  ;;  %v1702_v25 = vcvt.s32.f32 %v1700_v28  ;;  %v1754_v28 = vshll.u32 %v1753_v56, 16  ;;  %v1683_v56 = vcvt.f32.s32 %v5222_v52 }
 0x81f   : > { %v1805_v37 = vsel %vm1804_vm9, %v1800_v57, inf  ;;  %vm1790_vm10 = vcmp.eq.f32.partialorder %v5145_v31, %v5232_v32 }
 0x820   : > { %1806 = vmin.xlane.f32.xlu1 %v1805_v37  ;;  %v1791_v12 = vsel %vm1790_vm10, %v1786_v58, inf  ;;  %v1655_v58 = vcvt.f32.s32 %v5202_v42 }
 0x821   : > { %v5239_v17 = vpop.xlane.xlu1 %1718  ;;  %1792 = vmin.xlane.f32.xlu0 %v1791_v12  ;;  %v1740_v12 = vshll.u32 %v1739_v13, 16 }
 0x822   : > { %v5242_v22 = vpop.xlane.xlu0 %1704  ;;  %vm1720_vm5 = vcmp.eq.f32.partialorder %v5155_v23, %v5239_v17 }
 0x823   : > { %v1721_v1 = vsel %vm1720_vm5, %v1716_v50, inf  ;;  %vm1706_vm6 = vcmp.eq.f32.partialorder %v5161_v9, %v5242_v22  ;;  %v1641_v9 = vcvt.f32.s32 %v5179_v49 }
 0x824   : > { %1722 = vmin.xlane.f32.xlu1 %v1721_v1  ;;  %v1707_v31 = vsel %vm1706_vm6, %v1702_v25, inf  ;;  %v1656_v25 = vshll.u32 %v1655_v58, 16  ;;  %v1781_v1 = vcvt.f32.s32 %v5209_v40 }
 0x825   : > { %v5248_v43 = vpop.xlane.xlu1 %1830  ;;  %1708 = vmin.xlane.f32.xlu0 %v1707_v31  ;;  %v1642_v33 = vshll.u32 %v1641_v9, 16 }
 0x826   : > { %v5250_v2 = vpop.xlane.xlu0 %1816  ;;  %vm1832_vm11 = vcmp.eq.f32.partialorder %v5170_v47, %v5248_v43 }
 0x827   : > { %v1833_v39 = vsel %vm1832_vm11, %v1828_v14, inf  ;;  %vm1818_vm12 = vcmp.eq.f32.partialorder %v5172_v4, %v5250_v2  ;;  %v1669_v4 = vcvt.f32.s32 %v5199_v16 }
 0x828   : > { %1834 = vmin.xlane.f32.xlu1 %v1833_v39  ;;  %v1819_v23 = vsel %vm1818_vm12, %v1814_v18, inf }
 0x829   : > { %1820 = vmin.xlane.f32.xlu0 %v1819_v23  ;;  %v1670_v8 = vshll.u32 %v1669_v4, 16 }
 0x899   : > { %v1639_v24 = vpop.xlane.xlu1 %1638 }
 0x89a   : > { %v1640_v62 = vcvt.f32.s32 %v1639_v24  ;;  %v1625_v47 = vpop.xlane.xlu0 %1624 }
 0x89b   : > { %v1626_v61 = vcvt.f32.s32 %v1625_v47 }
 0x89c   : > { %v1643_v57 = vadd.s32 %v1642_v33, %v1640_v62 }
 0x89d   : > { %v1629_v37 = vadd.s32 %v1628_v19, %v1626_v61  ;;  %v1751_v49 = vpop.xlane.xlu1 %1750  ;;  %v1698_v19 = vshll.u32 %v1697_v60, 16  ;;  %v1684_v61 = vshll.u32 %v1683_v56, 16 }
 0x89e   : > { %v5264_v35 = vsel %vm251_vm0, %v4869_v54, %v1643_v57  ;;  %v1752_v7 = vcvt.f32.s32 %v1751_v49  ;;  %v1737_v38 = vpop.xlane.xlu0 %1736  ;;  %vm1841_vm13 = vcmp.eq.s32.totalorder %v3942_v26, %v1643_v57  ;;  %v1809_v57 = vcvt.f32.s32 %v5229_v46 }
 0x89f   : > { %v5269_v63 = vsel %vm251_vm0, %v4873_v59, %v1629_v37  ;;  %v1738_v50 = vcvt.f32.s32 %v1737_v38  ;;  %v5272_v16 = vsel %vm1841_vm13, 1e+30, %v4876_v34  ;;  %vm1840_vm14 = vcmp.eq.s32.totalorder %v3942_v26, %v1629_v37 }
 0x8a0   : > { %v1755_v42 = vadd.s32 %v1754_v28, %v1752_v7  ;;  %1874 = vmin.xlane.f32.xlu1 %v5272_v16  ;;  %v5277_v54 = vsel %vm1840_vm14, 1e+30, %v4887_v10  ;;  %v1767_v59 = vcvt.f32.s32 %v5212_v21  ;;  %v1782_v21 = vshll.u32 %v1781_v1, 16 }
 0x8a1   : > { %v1741_v31 = vadd.s32 %v1740_v12, %v1738_v50  ;;  %v1667_v14 = vpop.xlane.xlu1 %1666  ;;  %1872 = vmin.xlane.f32.xlu0 %v5277_v54  ;;  %v1725_v7 = vcvt.f32.s32 %v5239_v17  ;;  %v1711_v38 = vcvt.f32.s32 %v5242_v22 }
 0x8a2   : > { %v5284_v34 = vsel %vm251_vm0, %v4893_v41, %v1755_v42  ;;  %v1668_v18 = vcvt.f32.s32 %v1667_v14  ;;  %v1653_v39 = vpop.xlane.xlu0 %1652  ;;  %vm1849_vm15 = vcmp.eq.s32.totalorder %v3942_v26, %v1755_v42  ;;  %v1768_v33 = vshll.u32 %v1767_v59, 16 }
 0x8a3   : > { %v5289_v10 = vsel %vm251_vm0, %v4897_v5, %v1741_v31  ;;  %v1654_v23 = vcvt.f32.s32 %v1653_v39  ;;  %v5292_v40 = vsel %vm1849_vm15, 1e+30, %v4900_v55  ;;  %vm1848_vm2 = vcmp.eq.s32.totalorder %v3942_v26, %v1741_v31 }
 0x8a4   : > { %v1671_v9 = vadd.s32 %v1670_v8, %v1668_v18  ;;  %1890 = vmin.xlane.f32.xlu1 %v5292_v40  ;;  %v5297_v41 = vsel %vm1848_vm2, 1e+30, %v4911_v3  ;;  %v1726_v31 = vshll.u32 %v1725_v7, 16  ;;  %v1712_v14 = vshll.u32 %v1711_v38, 16  ;;  %v6958_v7 = vld [vmem:[#allocation15_spill] sm:$0xff] }
 0x8a5   : > { %v1657_v24 = vadd.s32 %v1656_v25, %v1654_v23  ;;  %v1779_v5 = vpop.xlane.xlu1 %1778  ;;  %1888 = vmin.xlane.f32.xlu0 %v5297_v41  ;;  %v1837_v59 = vcvt.f32.s32 %v5248_v43  ;;  %v6946_v43 = vld [vmem:[#allocation3_spill] sm:$0xff] }
 0x8a6   : > { %v5304_v55 = vsel %vm251_vm0, %v4917_v20, %v1671_v9  ;;  %v1780_v13 = vcvt.f32.s32 %v1779_v5  ;;  %v1765_v62 = vpop.xlane.xlu0 %1764  ;;  %vm1843_vm3 = vcmp.eq.s32.totalorder %v3942_v26, %v1671_v9 }
 0x8a7   : > { %v5309_v3 = vsel %vm251_vm0, %v4921_v29, %v1657_v24  ;;  %v1766_v15 = vcvt.f32.s32 %v1765_v62  ;;  %v5312_v52 = vsel %vm1843_vm3, 1e+30, %v4924_v0  ;;  %vm1842_vm4 = vcmp.eq.s32.totalorder %v3942_v26, %v1657_v24 }
 0x8a8   : > { %v1783_v47 = vadd.s32 %v1782_v21, %v1780_v13  ;;  %1878 = vmin.xlane.f32.xlu1 %v5312_v52  ;;  %v5317_v20 = vsel %vm1842_vm4, 1e+30, %v4935_v48  ;;  %v1795_v29 = vcvt.f32.s32 %v5232_v32  ;;  %v1810_v32 = vshll.u32 %v1809_v57, 16  ;;  %v6952_v57 = vld [vmem:[#allocation14_spill] sm:$0xff] }
 0x8a9   : > { %v1769_v28 = vadd.s32 %v1768_v33, %v1766_v15  ;;  %v1695_v4 = vpop.xlane.xlu1 %1694  ;;  %1876 = vmin.xlane.f32.xlu0 %v5317_v20  ;;  %v1838_v5 = vshll.u32 %v1837_v59, 16  ;;  %v6950_v15 = vld [vmem:[#allocation5_spill] sm:$0xff] }
 0x8aa   : > { %v5324_v0 = vsel %vm251_vm0, %v4941_v51, %v1783_v47  ;;  %v1696_v58 = vcvt.f32.s32 %v1695_v4  ;;  %v1681_v37 = vpop.xlane.xlu0 %1680  ;;  %vm1851_vm7 = vcmp.eq.s32.totalorder %v3942_v26, %v1783_v47  ;;  %v1796_v42 = vshll.u32 %v1795_v29, 16  ;;  %v6954_v29 = vld [vmem:[#allocation6_spill] sm:$0xff] }
 0x8ab   : > { %v5329_v48 = vsel %vm251_vm0, %v4945_v27, %v1769_v28  ;;  %v1682_v49 = vcvt.f32.s32 %v1681_v37  ;;  %v5332_v46 = vsel %vm1851_vm7, 1e+30, %v4948_v11  ;;  %vm1850_vm8 = vcmp.eq.s32.totalorder %v3942_v26, %v1769_v28 }
 0x8ac   : > { %v1699_v12 = vadd.s32 %v1698_v19, %v1696_v58  ;;  %1894 = vmin.xlane.f32.xlu1 %v5332_v46  ;;  %v5337_v51 = vsel %vm1850_vm8, 1e+30, %v4959_v36 }
 0x8ad   : > { %v1685_v50 = vadd.s32 %v1684_v61, %v1682_v49  ;;  %v1807_v27 = vpop.xlane.xlu1 %1806  ;;  %1892 = vmin.xlane.f32.xlu0 %v5337_v51  ;;  %v6956_v49 = vld [vmem:[#allocation13_spill] sm:$0xff] }
 0x8ae   : > { %v5344_v11 = vsel %vm251_vm0, %v4965_v6, %v1699_v12  ;;  %v1808_v8 = vcvt.f32.s32 %v1807_v27  ;;  %v1793_v25 = vpop.xlane.xlu0 %1792  ;;  %vm1845_vm9 = vcmp.eq.s32.totalorder %v3942_v26, %v1699_v12 }
 0x8af   : > { %v5349_v36 = vsel %vm251_vm0, %v4969_v30, %v1685_v50  ;;  %v1794_v17 = vcvt.f32.s32 %v1793_v25  ;;  %v5352_v22 = vsel %vm1845_vm9, 1e+30, %v4972_v53  ;;  %vm1844_vm10 = vcmp.eq.s32.totalorder %v3942_v26, %v1685_v50  ;;  %v6960_v50 = vld [vmem:[#allocation16_spill] sm:$0xff]  ;;  %v6964_v25 = vld [vmem:[#allocation18_spill] sm:$0xff] }
 0x8b0   : > { %v1811_v1 = vadd.s32 %v1810_v32, %v1808_v8  ;;  %1882 = vmin.xlane.f32.xlu1 %v5352_v22  ;;  %v5357_v6 = vsel %vm1844_vm10, 1e+30, %v4983_v45  ;;  %v1823_v30 = vcvt.f32.s32 %v5250_v2  ;;  %v6944_v45 = vld [vmem:[#allocation2_spill] sm:$0xff]  ;;  %v6948_v2 = vld [vmem:[#allocation4_spill] sm:$0xff] }
 0x8b1   : > { %v1797_v18 = vadd.s32 %v1796_v42, %v1794_v17  ;;  %v1723_v39 = vpop.xlane.xlu1 %1722  ;;  %1880 = vmin.xlane.f32.xlu0 %v5357_v6  ;;  %v6962_v42 = vld [vmem:[#allocation7_spill] sm:$0xff] }
 0x8b2   : > { %v5364_v53 = vsel %vm251_vm0, %v4989_v44, %v1811_v1  ;;  %v1724_v23 = vcvt.f32.s32 %v1723_v39  ;;  %v1709_v9 = vpop.xlane.xlu0 %1708  ;;  %vm1853_vm5 = vcmp.eq.s32.totalorder %v3942_v26, %v1811_v1  ;;  %v1824_v62 = vshll.u32 %v1823_v30, 16 }
 0x8b3   : > { %v5369_v21 = vsel %vm251_vm0, %v6944_v45, %v1797_v18  ;;  %v1710_v60 = vcvt.f32.s32 %v1709_v9  ;;  %v5372_v56 = vsel %vm1853_vm5, 1e+30, %v6946_v43  ;;  %vm1852_vm6 = vcmp.eq.s32.totalorder %v3942_v26, %v1797_v18 }
 0x8b4   : > { %6945 = vst [vmem:[#allocation8_spill] sm:$0xff] %v5369_v21  ;;  %6947 = vst [vmem:[#allocation17_spill] sm:$0xff] %v5372_v56  ;;  %v1727_v24 = vadd.s32 %v1726_v31, %v1724_v23  ;;  %1898 = vmin.xlane.f32.xlu1 %v5372_v56  ;;  %v5377_v44 = vsel %vm1852_vm6, 1e+30, %v6948_v2 }
 0x8b5   : > { %6949 = vst [vmem:[#allocation19_spill] sm:$0xff] %v5377_v44  ;;  %v1713_v33 = vadd.s32 %v1712_v14, %v1710_v60  ;;  %v1835_v13 = vpop.xlane.xlu1 %1834  ;;  %1896 = vmin.xlane.f32.xlu0 %v5377_v44 }
 0x8b6   : > { %v5382_v47 = vsel %vm251_vm0, %v6950_v15, %v1727_v24  ;;  %v1836_v19 = vcvt.f32.s32 %v1835_v13  ;;  %v1821_v61 = vpop.xlane.xlu0 %1820  ;;  %vm1847_vm11 = vcmp.eq.s32.totalorder %v3942_v26, %v1727_v24 }
 0x8b7   : > { %6951 = vst [vmem:[#allocation21_spill] sm:$0xff] %v5382_v47  ;;  %v5387_v28 = vsel %vm251_vm0, %v6952_v57, %v1713_v33  ;;  %v1822_v4 = vcvt.f32.s32 %v1821_v61  ;;  %v5390_v58 = vsel %vm1847_vm11, 1e+30, %v6954_v29  ;;  %vm1846_vm12 = vcmp.eq.s32.totalorder %v3942_v26, %v1713_v33 }
 0x8b8   : > { %6953 = vst [vmem:[#allocation20_spill] sm:$0xff] %v5387_v28  ;;  %6955 = vst [vmem:[#allocation9_spill] sm:$0xff] %v5390_v58  ;;  %v1839_v37 = vadd.s32 %v1838_v5, %v1836_v19  ;;  %1886 = vmin.xlane.f32.xlu1 %v5390_v58  ;;  %v5395_v12 = vsel %vm1846_vm12, 1e+30, %v6956_v49 }
 0x8b9   : > { %6957 = vst [vmem:[#allocation22_spill] sm:$0xff] %v5395_v12  ;;  %v1825_v32 = vadd.s32 %v1824_v62, %v1822_v4  ;;  %1884 = vmin.xlane.f32.xlu0 %v5395_v12 }
 0x8ba   : > { %v5400_v38 = vsel %vm251_vm0, %v6958_v7, %v1839_v37  ;;  %vm1855_vm13 = vcmp.eq.s32.totalorder %v3942_v26, %v1839_v37 }
 0x8bb   : > { %6959 = vst [vmem:[#allocation10_spill] sm:$0xff] %v5400_v38  ;;  %v5405_v27 = vsel %vm251_vm0, %v6960_v50, %v1825_v32  ;;  %v5408_v8 = vsel %vm1855_vm13, 1e+30, %v6962_v42  ;;  %vm1854_vm14 = vcmp.eq.s32.totalorder %v3942_v26, %v1825_v32 }
 0x8bc   : > { %6961 = vst [vmem:[#allocation23_spill] sm:$0xff] %v5405_v27  ;;  %6963 = vst [vmem:[#allocation25_spill] sm:$0xff] %v5408_v8  ;;  %1902 = vmin.xlane.f32.xlu1 %v5408_v8  ;;  %v5413_v17 = vsel %vm1854_vm14, 1e+30, %v6964_v25 }
 0x8bd   : > { %6965 = vst [vmem:[#allocation24_spill] sm:$0xff] %v5413_v17  ;;  %1900 = vmin.xlane.f32.xlu0 %v5413_v17 }
 0x92d   : > { %v1875_v1 = vpop.xlane.xlu1 %1874 }
 0x92e   : > { %vm1905_vm15 = vcmp.le.f32.partialorder %v5272_v16, %v1875_v1  ;;  %v1873_v31 = vpop.xlane.xlu0 %1872 }
 0x92f   : > { %v5418_v14 = vsel %vm1905_vm15, %v3942_v26, 128  ;;  %vm1904_vm0 = vcmp.le.f32.partialorder %v5277_v54, %v1873_v31 }
 0x930   : > { %v1951_v59 = vshra.s32 %v5418_v14, 16  ;;  %v5423_v18 = vsel %vm1904_vm0, %v3942_v26, 128 }
 0x931   : > { %v1937_v39 = vshra.s32 %v5423_v18, 16  ;;  %v1891_v30 = vpop.xlane.xlu1 %1890 }
 0x932   : > { %vm1913_vm2 = vcmp.le.f32.partialorder %v5292_v40, %v1891_v30  ;;  %v1889_v23 = vpop.xlane.xlu0 %1888  ;;  %v5427_v9 = vcvt.s32.f32 %v1951_v59 }
 0x933   : > { %v5430_v45 = vsel %vm1913_vm2, %v3942_v26, 128  ;;  %vm1912_vm3 = vcmp.le.f32.partialorder %v5297_v41, %v1889_v23  ;;  %v5433_v60 = vcvt.s32.f32 %v1937_v39 }
 0x934   : > { %v2063_v43 = vshra.s32 %v5430_v45, 16  ;;  %v5437_v24 = vsel %vm1912_vm3, %v3942_v26, 128  ;;  %1954 = vmin.xlane.f32.xlu1 %v5427_v9 }
 0x935   : > { %v2049_v2 = vshra.s32 %v5437_v24, 16  ;;  %v1879_v5 = vpop.xlane.xlu1 %1878  ;;  %1940 = vmin.xlane.f32.xlu0 %v5433_v60 }
 0x936   : > { %vm1907_vm4 = vcmp.le.f32.partialorder %v5312_v52, %v1879_v5  ;;  %v1877_v33 = vpop.xlane.xlu0 %1876  ;;  %v5443_v13 = vcvt.s32.f32 %v2063_v43 }
 0x937   : > { %v5446_v62 = vsel %vm1907_vm4, %v3942_v26, 128  ;;  %vm1906_vm7 = vcmp.le.f32.partialorder %v5317_v20, %v1877_v33  ;;  %v5449_v15 = vcvt.s32.f32 %v2049_v2 }
 0x938   : > { %v1979_v19 = vshra.s32 %v5446_v62, 16  ;;  %v5453_v61 = vsel %vm1906_vm7, %v3942_v26, 128  ;;  %2066 = vmin.xlane.f32.xlu1 %v5443_v13 }
 0x939   : > { %v1965_v57 = vshra.s32 %v5453_v61, 16  ;;  %v1895_v4 = vpop.xlane.xlu1 %1894  ;;  %2052 = vmin.xlane.f32.xlu0 %v5449_v15 }
 0x93a   : > { %vm1915_vm8 = vcmp.le.f32.partialorder %v5332_v46, %v1895_v4  ;;  %v1893_v29 = vpop.xlane.xlu0 %1892  ;;  %v5459_v37 = vcvt.s32.f32 %v1979_v19 }
 0x93b   : > { %v5462_v49 = vsel %vm1915_vm8, %v3942_v26, 128  ;;  %vm1914_vm9 = vcmp.le.f32.partialorder %v5337_v51, %v1893_v29  ;;  %v5465_v32 = vcvt.s32.f32 %v1965_v57 }
 0x93c   : > { %v2091_v7 = vshra.s32 %v5462_v49, 16  ;;  %v5469_v50 = vsel %vm1914_vm9, %v3942_v26, 128  ;;  %1982 = vmin.xlane.f32.xlu1 %v5459_v37 }
 0x93d   : > { %v2077_v42 = vshra.s32 %v5469_v50, 16  ;;  %v1883_v25 = vpop.xlane.xlu1 %1882  ;;  %1968 = vmin.xlane.f32.xlu0 %v5465_v32 }
 0x93e   : > { %vm1909_vm10 = vcmp.le.f32.partialorder %v5352_v22, %v1883_v25  ;;  %v1881_v1 = vpop.xlane.xlu0 %1880  ;;  %v5475_v31 = vcvt.s32.f32 %v2091_v7 }
 0x93f   : > { %v5478_v59 = vsel %vm1909_vm10, %v3942_v26, 128  ;;  %vm1908_vm5 = vcmp.le.f32.partialorder %v5357_v6, %v1881_v1  ;;  %v5481_v39 = vcvt.s32.f32 %v2077_v42 }
 0x940   : > { %v2007_v30 = vshra.s32 %v5478_v59, 16  ;;  %v5485_v23 = vsel %vm1908_vm5, %v3942_v26, 128  ;;  %2094 = vmin.xlane.f32.xlu1 %v5475_v31 }
 0x941   : > { %v1993_v43 = vshra.s32 %v5485_v23, 16  ;;  %v1899_v2 = vpop.xlane.xlu1 %1898  ;;  %2080 = vmin.xlane.f32.xlu0 %v5481_v39 }
 0x942   : > { %vm1917_vm6 = vcmp.le.f32.partialorder %v5372_v56, %v1899_v2  ;;  %v1897_v5 = vpop.xlane.xlu0 %1896  ;;  %v5491_v33 = vcvt.s32.f32 %v2007_v30 }
 0x943   : > { %v5494_v19 = vsel %vm1917_vm6, %v3942_v26, 128  ;;  %vm1916_vm11 = vcmp.le.f32.partialorder %v5377_v44, %v1897_v5  ;;  %v5497_v57 = vcvt.s32.f32 %v1993_v43  ;;  %v2048_v44 = vand.u32 65535, %v5437_v24 }
 0x944   : > { %v2119_v4 = vshra.s32 %v5494_v19, 16  ;;  %v5501_v29 = vsel %vm1916_vm11, %v3942_v26, 128  ;;  %2010 = vmin.xlane.f32.xlu1 %v5491_v33  ;;  %v1964_v24 = vand.u32 65535, %v5453_v61  ;;  %v2076_v61 = vand.u32 65535, %v5469_v50 }
 0x945   : > { %v2105_v7 = vshra.s32 %v5501_v29, 16  ;;  %v1887_v42 = vpop.xlane.xlu1 %1886  ;;  %1996 = vmin.xlane.f32.xlu0 %v5497_v57  ;;  %v1992_v50 = vand.u32 65535, %v5485_v23  ;;  %v2104_v23 = vand.u32 65535, %v5501_v29 }
 0x946   : > { %vm1911_vm12 = vcmp.le.f32.partialorder %v5390_v58, %v1887_v42  ;;  %v1885_v25 = vpop.xlane.xlu0 %1884  ;;  %v5507_v1 = vcvt.s32.f32 %v2119_v4 }
 0x947   : > { %v5510_v30 = vsel %vm1911_vm12, %v3942_v26, 128  ;;  %vm1910_vm13 = vcmp.le.f32.partialorder %v5395_v12, %v1885_v25  ;;  %v5513_v43 = vcvt.s32.f32 %v2105_v7 }
 0x948   : > { %v2035_v2 = vshra.s32 %v5510_v30, 16  ;;  %v5517_v5 = vsel %vm1910_vm13, %v3942_v26, 128  ;;  %2122 = vmin.xlane.f32.xlu1 %v5507_v1 }
 0x949   : > { %v2021_v27 = vshra.s32 %v5517_v5, 16  ;;  %v1903_v42 = vpop.xlane.xlu1 %1902  ;;  %2108 = vmin.xlane.f32.xlu0 %v5513_v43  ;;  %v2020_v29 = vand.u32 65535, %v5517_v5 }
 0x94a   : > { %vm1919_vm14 = vcmp.le.f32.partialorder %v5408_v8, %v1903_v42  ;;  %v1901_v4 = vpop.xlane.xlu0 %1900  ;;  %v5523_v38 = vcvt.s32.f32 %v2035_v2 }
 0x94b   : > { %v5526_v7 = vsel %vm1919_vm14, %v3942_v26, 128  ;;  %vm1918_vm15 = vcmp.le.f32.partialorder %v5413_v17, %v1901_v4  ;;  %v5529_v25 = vcvt.s32.f32 %v2021_v27  ;;  %v1950_v27 = vand.u32 65535, %v5418_v14 }
 0x94c   : > { %v2147_v12 = vshra.s32 %v5526_v7, 16  ;;  %v5533_v58 = vsel %vm1918_vm15, %v3942_v26, 128  ;;  %2038 = vmin.xlane.f32.xlu1 %v5523_v38  ;;  %v1936_v4 = vand.u32 65535, %v5423_v18  ;;  %v2062_v17 = vand.u32 65535, %v5430_v45 }
 0x94d   : > { %v2133_v28 = vshra.s32 %v5533_v58, 16  ;;  %2024 = vmin.xlane.f32.xlu0 %v5529_v25  ;;  %v1952_v47 = vcvt.s32.f32 %v1950_v27  ;;  %v1978_v18 = vand.u32 65535, %v5446_v62  ;;  %v2090_v62 = vand.u32 65535, %v5462_v49 }
 0x94e   : > { %v5538_v2 = vcvt.s32.f32 %v2147_v12  ;;  %v2064_v27 = vcvt.s32.f32 %v2062_v17  ;;  %v2006_v49 = vand.u32 65535, %v5478_v59  ;;  %v2118_v59 = vand.u32 65535, %v5494_v19 }
 0x94f   : > { %v5540_v42 = vcvt.s32.f32 %v2133_v28  ;;  %v1938_v28 = vcvt.s32.f32 %v1936_v4  ;;  %v1980_v17 = vcvt.s32.f32 %v1978_v18  ;;  %v2034_v19 = vand.u32 65535, %v5510_v30 }
 0x950   : > { %2150 = vmin.xlane.f32.xlu1 %v5538_v2  ;;  %v2146_v30 = vand.u32 65535, %v5526_v7  ;;  %v2132_v5 = vand.u32 65535, %v5533_v58 }
 0x951   : > { %2136 = vmin.xlane.f32.xlu0 %v5540_v42 }
 0x952   : > { %v2148_v7 = vcvt.s32.f32 %v2146_v30  ;;  %v2134_v58 = vcvt.s32.f32 %v2132_v5 }
 0x9c1   : > { %v5547_v8 = vpop.xlane.xlu1 %1954 }
 0x9c2   : > { %v5550_v56 = vpop.xlane.xlu0 %1940  ;;  %vm1956_vm0 = vcmp.eq.f32.partialorder %v5427_v9, %v5547_v8  ;;  %v2050_v9 = vcvt.s32.f32 %v2048_v44  ;;  %v1966_v44 = vcvt.s32.f32 %v1964_v24 }
 0x9c3   : > { %v1957_v12 = vsel %vm1956_vm0, %v1952_v47, inf  ;;  %vm1942_vm2 = vcmp.eq.f32.partialorder %v5433_v60, %v5550_v56 }
 0x9c4   : > { %1958 = vmin.xlane.f32.xlu1 %v1957_v12  ;;  %v1943_v14 = vsel %vm1942_vm2, %v1938_v28, inf }
 0x9c5   : > { %v5557_v45 = vpop.xlane.xlu1 %2066  ;;  %1944 = vmin.xlane.f32.xlu0 %v1943_v14  ;;  %v2092_v14 = vcvt.s32.f32 %v2090_v62 }
 0x9c6   : > { %v5560_v21 = vpop.xlane.xlu0 %2052  ;;  %vm2068_vm3 = vcmp.eq.f32.partialorder %v5443_v13, %v5557_v45 }
 0x9c7   : > { %v2069_v47 = vsel %vm2068_vm3, %v2064_v27, inf  ;;  %vm2054_vm4 = vcmp.eq.f32.partialorder %v5449_v15, %v5560_v21 }
 0x9c8   : > { %2070 = vmin.xlane.f32.xlu1 %v2069_v47  ;;  %v2055_v60 = vsel %vm2054_vm4, %v2050_v9, inf  ;;  %v2008_v9 = vcvt.s32.f32 %v2006_v49 }
 0x9c9   : > { %v5567_v4 = vpop.xlane.xlu1 %1982  ;;  %2056 = vmin.xlane.f32.xlu0 %v2055_v60 }
 0x9ca   : > { %v5570_v28 = vpop.xlane.xlu0 %1968  ;;  %vm1984_vm7 = vcmp.eq.f32.partialorder %v5459_v37, %v5567_v4  ;;  %v2078_v37 = vcvt.s32.f32 %v2076_v61 }
 0x9cb   : > { %v1985_v13 = vsel %vm1984_vm7, %v1980_v17, inf  ;;  %vm1970_vm8 = vcmp.eq.f32.partialorder %v5465_v32, %v5570_v28  ;;  %v2120_v17 = vcvt.s32.f32 %v2118_v59  ;;  %v2073_v59 = vcvt.f32.s32 %v5557_v45 }
 0x9cc   : > { %1986 = vmin.xlane.f32.xlu1 %v1985_v13  ;;  %v1971_v15 = vsel %vm1970_vm8, %v1966_v44, inf }
 0x9cd   : > { %v5577_v12 = vpop.xlane.xlu1 %2094  ;;  %1972 = vmin.xlane.f32.xlu0 %v1971_v15  ;;  %v2036_v15 = vcvt.s32.f32 %v2034_v19 }
 0x9ce   : > { %v5580_v18 = vpop.xlane.xlu0 %2080  ;;  %vm2096_vm9 = vcmp.eq.f32.partialorder %v5475_v31, %v5577_v12  ;;  %v1994_v31 = vcvt.s32.f32 %v1992_v50 }
 0x9cf   : > { %v2097_v27 = vsel %vm2096_vm9, %v2092_v14, inf  ;;  %vm2082_vm10 = vcmp.eq.f32.partialorder %v5481_v39, %v5580_v18 }
 0x9d0   : > { %2098 = vmin.xlane.f32.xlu1 %v2097_v27  ;;  %v2083_v32 = vsel %vm2082_vm10, %v2078_v37, inf }
 0x9d1   : > { %v5587_v24 = vpop.xlane.xlu1 %2010  ;;  %2084 = vmin.xlane.f32.xlu0 %v2083_v32  ;;  %v1947_v32 = vcvt.f32.s32 %v5550_v56 }
 0x9d2   : > { %v5590_v47 = vpop.xlane.xlu0 %1996  ;;  %vm2012_vm5 = vcmp.eq.f32.partialorder %v5491_v33, %v5587_v24  ;;  %v2106_v33 = vcvt.s32.f32 %v2104_v23 }
 0x9d3   : > { %v2013_v60 = vsel %vm2012_vm5, %v2008_v9, inf  ;;  %vm1998_vm6 = vcmp.eq.f32.partialorder %v5497_v57, %v5590_v47 }
 0x9d4   : > { %2014 = vmin.xlane.f32.xlu1 %v2013_v60  ;;  %v1999_v39 = vsel %vm1998_vm6, %v1994_v31, inf  ;;  %v2059_v31 = vcvt.f32.s32 %v5560_v21 }
 0x9d5   : > { %v5597_v62 = vpop.xlane.xlu1 %2122  ;;  %2000 = vmin.xlane.f32.xlu0 %v1999_v39  ;;  %v1948_v39 = vshll.u32 %v1947_v32, 16  ;;  %v2017_v32 = vcvt.f32.s32 %v5587_v24 }
 0x9d6   : > { %v5600_v61 = vpop.xlane.xlu0 %2108  ;;  %vm2124_vm11 = vcmp.eq.f32.partialorder %v5507_v1, %v5597_v62  ;;  %v2022_v1 = vcvt.s32.f32 %v2020_v29  ;;  %v2074_v29 = vshll.u32 %v2073_v59, 16  ;;  %v2003_v59 = vcvt.f32.s32 %v5590_v47 }
 0x9d7   : > { %v2125_v44 = vsel %vm2124_vm11, %v2120_v17, inf  ;;  %vm2110_vm12 = vcmp.eq.f32.partialorder %v5513_v43, %v5600_v61 }
 0x9d8   : > { %2126 = vmin.xlane.f32.xlu1 %v2125_v44  ;;  %v2111_v57 = vsel %vm2110_vm12, %v2106_v33, inf  ;;  %v1975_v33 = vcvt.f32.s32 %v5570_v28 }
 0x9d9   : > { %v5607_v13 = vpop.xlane.xlu1 %2038  ;;  %2112 = vmin.xlane.f32.xlu0 %v2111_v57  ;;  %v2060_v57 = vshll.u32 %v2059_v31, 16 }
 0x9da   : > { %v5610_v49 = vpop.xlane.xlu0 %2024  ;;  %vm2040_vm13 = vcmp.eq.f32.partialorder %v5523_v38, %v5607_v13 }
 0x9db   : > { %v2041_v14 = vsel %vm2040_vm13, %v2036_v15, inf  ;;  %vm2026_vm14 = vcmp.eq.f32.partialorder %v5529_v25, %v5610_v49  ;;  %v1961_v25 = vcvt.f32.s32 %v5547_v8 }
 0x9dc   : > { %2042 = vmin.xlane.f32.xlu1 %v2041_v14  ;;  %v2027_v43 = vsel %vm2026_vm14, %v2022_v1, inf  ;;  %v1976_v1 = vshll.u32 %v1975_v33, 16  ;;  %v2101_v14 = vcvt.f32.s32 %v5577_v12 }
 0x9dd   : > { %v5616_v50 = vpop.xlane.xlu1 %2150  ;;  %2028 = vmin.xlane.f32.xlu0 %v2027_v43  ;;  %v1962_v23 = vshll.u32 %v1961_v25, 16 }
 0x9de   : > { %v5618_v37 = vpop.xlane.xlu0 %2136  ;;  %vm2152_vm15 = vcmp.eq.f32.partialorder %v5538_v2, %v5616_v50 }
 0x9df   : > { %v2153_v27 = vsel %vm2152_vm15, %v2148_v7, inf  ;;  %vm2138_vm0 = vcmp.eq.f32.partialorder %v5540_v42, %v5618_v37  ;;  %v1989_v42 = vcvt.f32.s32 %v5567_v4 }
 0x9e0   : > { %2154 = vmin.xlane.f32.xlu1 %v2153_v27  ;;  %v2139_v38 = vsel %vm2138_vm0, %v2134_v58, inf }
 0x9e1   : > { %2140 = vmin.xlane.f32.xlu0 %v2139_v38  ;;  %v1990_v5 = vshll.u32 %v1989_v42, 16 }
 0xa51   : > { %v1959_v9 = vpop.xlane.xlu1 %1958 }
 0xa52   : > { %v1960_v60 = vcvt.f32.s32 %v1959_v9  ;;  %v1945_v2 = vpop.xlane.xlu0 %1944 }
 0xa53   : > { %v1946_v19 = vcvt.f32.s32 %v1945_v2 }
 0xa54   : > { %v1963_v17 = vadd.s32 %v1962_v23, %v1960_v60 }
 0xa55   : > { %v1949_v44 = vadd.s32 %v1948_v39, %v1946_v19  ;;  %v2071_v8 = vpop.xlane.xlu1 %2070  ;;  %v2018_v39 = vshll.u32 %v2017_v32, 16  ;;  %v2004_v19 = vshll.u32 %v2003_v59, 16 }
 0xa56   : > { %v5632_v56 = vsel %vm348_vm1, %v5264_v35, %v1963_v17  ;;  %v2072_v45 = vcvt.f32.s32 %v2071_v8  ;;  %v2057_v30 = vpop.xlane.xlu0 %2056  ;;  %vm2161_vm2 = vcmp.eq.s32.totalorder %v3942_v26, %v1963_v17  ;;  %v2129_v17 = vcvt.f32.s32 %v5597_v62 }
 0xa57   : > { %v5637_v21 = vsel %vm348_vm1, %v5269_v63, %v1949_v44  ;;  %v2058_v15 = vcvt.f32.s32 %v2057_v30  ;;  %v5640_v4 = vsel %vm2161_vm2, 1e+30, %v5272_v16  ;;  %vm2160_vm3 = vcmp.eq.s32.totalorder %v3942_v26, %v1949_v44 }
 0xa58   : > { %v2075_v28 = vadd.s32 %v2074_v29, %v2072_v45  ;;  %2194 = vmin.xlane.f32.xlu1 %v5640_v4  ;;  %v5645_v35 = vsel %vm2160_vm3, 1e+30, %v5277_v54  ;;  %v2087_v63 = vcvt.f32.s32 %v5580_v18  ;;  %v2102_v18 = vshll.u32 %v2101_v14, 16 }
 0xa59   : > { %v2061_v43 = vadd.s32 %v2060_v57, %v2058_v15  ;;  %v1987_v7 = vpop.xlane.xlu1 %1986  ;;  %2192 = vmin.xlane.f32.xlu0 %v5645_v35  ;;  %v2045_v45 = vcvt.f32.s32 %v5607_v13  ;;  %v2031_v30 = vcvt.f32.s32 %v5610_v49 }
 0xa5a   : > { %v5652_v16 = vsel %vm348_vm1, %v5284_v34, %v2075_v28  ;;  %v1988_v58 = vcvt.f32.s32 %v1987_v7  ;;  %v1973_v27 = vpop.xlane.xlu0 %1972  ;;  %vm2169_vm4 = vcmp.eq.s32.totalorder %v3942_v26, %v2075_v28  ;;  %v2088_v23 = vshll.u32 %v2087_v63, 16 }
 0xa5b   : > { %v5657_v54 = vsel %vm348_vm1, %v5289_v10, %v2061_v43  ;;  %v1974_v38 = vcvt.f32.s32 %v1973_v27  ;;  %v5660_v12 = vsel %vm2169_vm4, 1e+30, %v5292_v40  ;;  %vm2168_vm7 = vcmp.eq.s32.totalorder %v3942_v26, %v2061_v43 }
 0xa5c   : > { %v1991_v25 = vadd.s32 %v1990_v5, %v1988_v58  ;;  %2210 = vmin.xlane.f32.xlu1 %v5660_v12  ;;  %v5665_v34 = vsel %vm2168_vm7, 1e+30, %v5297_v41  ;;  %v2046_v43 = vshll.u32 %v2045_v45, 16  ;;  %v2032_v7 = vshll.u32 %v2031_v30, 16  ;;  %v6980_v45 = vld [vmem:[#allocation10_spill] sm:$0xff] }
 0xa5d   : > { %v1977_v9 = vadd.s32 %v1976_v1, %v1974_v38  ;;  %v2099_v10 = vpop.xlane.xlu1 %2098  ;;  %2208 = vmin.xlane.f32.xlu0 %v5665_v34  ;;  %v2157_v63 = vcvt.f32.s32 %v5616_v50  ;;  %v6968_v50 = vld [vmem:[#allocation17_spill] sm:$0xff] }
 0xa5e   : > { %v5672_v40 = vsel %vm348_vm1, %v5304_v55, %v1991_v25  ;;  %v2100_v31 = vcvt.f32.s32 %v2099_v10  ;;  %v2085_v60 = vpop.xlane.xlu0 %2084  ;;  %vm2163_vm8 = vcmp.eq.s32.totalorder %v3942_v26, %v1991_v25 }
 0xa5f   : > { %v5677_v41 = vsel %vm348_vm1, %v5309_v3, %v1977_v9  ;;  %v2086_v24 = vcvt.f32.s32 %v2085_v60  ;;  %v5680_v47 = vsel %vm2163_vm8, 1e+30, %v5312_v52  ;;  %vm2162_vm9 = vcmp.eq.s32.totalorder %v3942_v26, %v1977_v9 }
 0xa60   : > { %v2103_v2 = vadd.s32 %v2102_v18, %v2100_v31  ;;  %2198 = vmin.xlane.f32.xlu1 %v5680_v47  ;;  %v5685_v55 = vsel %vm2162_vm9, 1e+30, %v5317_v20  ;;  %v2115_v3 = vcvt.f32.s32 %v5600_v61  ;;  %v2130_v61 = vshll.u32 %v2129_v17, 16  ;;  %v6974_v17 = vld [vmem:[#allocation20_spill] sm:$0xff] }
 0xa61   : > { %v2089_v29 = vadd.s32 %v2088_v23, %v2086_v24  ;;  %v2015_v42 = vpop.xlane.xlu1 %2014  ;;  %2196 = vmin.xlane.f32.xlu0 %v5685_v55  ;;  %v2158_v10 = vshll.u32 %v2157_v63, 16  ;;  %v6972_v24 = vld [vmem:[#allocation21_spill] sm:$0xff] }
 0xa62   : > { %v5692_v52 = vsel %vm348_vm1, %v5324_v0, %v2103_v2  ;;  %v2016_v33 = vcvt.f32.s32 %v2015_v42  ;;  %v2001_v44 = vpop.xlane.xlu0 %2000  ;;  %vm2171_vm10 = vcmp.eq.s32.totalorder %v3942_v26, %v2103_v2  ;;  %v2116_v28 = vshll.u32 %v2115_v3, 16  ;;  %v6976_v3 = vld [vmem:[#allocation9_spill] sm:$0xff] }
 0xa63   : > { %v5697_v20 = vsel %vm348_vm1, %v5329_v48, %v2089_v29  ;;  %v2002_v8 = vcvt.f32.s32 %v2001_v44  ;;  %v5700_v62 = vsel %vm2171_vm10, 1e+30, %v5332_v46  ;;  %vm2170_vm5 = vcmp.eq.s32.totalorder %v3942_v26, %v2089_v29 }
 0xa64   : > { %v2019_v57 = vadd.s32 %v2018_v39, %v2016_v33  ;;  %2214 = vmin.xlane.f32.xlu1 %v5700_v62  ;;  %v5705_v0 = vsel %vm2170_vm5, 1e+30, %v5337_v51 }
 0xa65   : > { %v2005_v15 = vadd.s32 %v2004_v19, %v2002_v8  ;;  %v2127_v48 = vpop.xlane.xlu1 %2126  ;;  %2212 = vmin.xlane.f32.xlu0 %v5705_v0  ;;  %v6978_v8 = vld [vmem:[#allocation22_spill] sm:$0xff] }
 0xa66   : > { %v5712_v46 = vsel %vm348_vm1, %v5344_v11, %v2019_v57  ;;  %v2128_v5 = vcvt.f32.s32 %v2127_v48  ;;  %v2113_v1 = vpop.xlane.xlu0 %2112  ;;  %vm2165_vm6 = vcmp.eq.s32.totalorder %v3942_v26, %v2019_v57 }
 0xa67   : > { %v5717_v51 = vsel %vm348_vm1, %v5349_v36, %v2005_v15  ;;  %v2114_v13 = vcvt.f32.s32 %v2113_v1  ;;  %v5720_v49 = vsel %vm2165_vm6, 1e+30, %v5352_v22  ;;  %vm2164_vm11 = vcmp.eq.s32.totalorder %v3942_v26, %v2005_v15  ;;  %v6982_v15 = vld [vmem:[#allocation23_spill] sm:$0xff]  ;;  %v6986_v1 = vld [vmem:[#allocation24_spill] sm:$0xff] }
 0xa68   : > { %v2131_v14 = vadd.s32 %v2130_v61, %v2128_v5  ;;  %2202 = vmin.xlane.f32.xlu1 %v5720_v49  ;;  %v5725_v11 = vsel %vm2164_vm11, 1e+30, %v5357_v6  ;;  %v2143_v36 = vcvt.f32.s32 %v5618_v37  ;;  %v6966_v6 = vld [vmem:[#allocation8_spill] sm:$0xff]  ;;  %v6970_v37 = vld [vmem:[#allocation19_spill] sm:$0xff] }
 0xa69   : > { %v2117_v58 = vadd.s32 %v2116_v28, %v2114_v13  ;;  %v2043_v27 = vpop.xlane.xlu1 %2042  ;;  %2200 = vmin.xlane.f32.xlu0 %v5725_v11  ;;  %v6984_v28 = vld [vmem:[#allocation25_spill] sm:$0xff] }
 0xa6a   : > { %v5732_v22 = vsel %vm348_vm1, %v5364_v53, %v2131_v14  ;;  %v2044_v38 = vcvt.f32.s32 %v2043_v27  ;;  %v2029_v25 = vpop.xlane.xlu0 %2028  ;;  %vm2173_vm12 = vcmp.eq.s32.totalorder %v3942_v26, %v2131_v14  ;;  %v2144_v60 = vshll.u32 %v2143_v36, 16 }
 0xa6b   : > { %v5737_v18 = vsel %vm348_vm1, %v6966_v6, %v2117_v58  ;;  %v2030_v32 = vcvt.f32.s32 %v2029_v25  ;;  %v5740_v59 = vsel %vm2173_vm12, 1e+30, %v6968_v50  ;;  %vm2172_vm13 = vcmp.eq.s32.totalorder %v3942_v26, %v2117_v58 }
 0xa6c   : > { %6967 = vst [vmem:[#allocation11_spill] sm:$0xff] %v5737_v18  ;;  %6969 = vst [vmem:[#allocation26_spill] sm:$0xff] %v5740_v59  ;;  %v2047_v9 = vadd.s32 %v2046_v43, %v2044_v38  ;;  %2218 = vmin.xlane.f32.xlu1 %v5740_v59  ;;  %v5745_v53 = vsel %vm2172_vm13, 1e+30, %v6970_v37 }
 0xa6d   : > { %6971 = vst [vmem:[#allocation12_spill] sm:$0xff] %v5745_v53  ;;  %v2033_v23 = vadd.s32 %v2032_v7, %v2030_v32  ;;  %v2155_v31 = vpop.xlane.xlu1 %2154  ;;  %2216 = vmin.xlane.f32.xlu0 %v5745_v53 }
 0xa6e   : > { %v5750_v2 = vsel %vm348_vm1, %v6972_v24, %v2047_v9  ;;  %v2156_v39 = vcvt.f32.s32 %v2155_v31  ;;  %v2141_v19 = vpop.xlane.xlu0 %2140  ;;  %vm2167_vm14 = vcmp.eq.s32.totalorder %v3942_v26, %v2047_v9 }
 0xa6f   : > { %6973 = vst [vmem:[#allocation27_spill] sm:$0xff] %v5750_v2  ;;  %v5755_v29 = vsel %vm348_vm1, %v6974_v17, %v2033_v23  ;;  %v2142_v42 = vcvt.f32.s32 %v2141_v19  ;;  %v5758_v33 = vsel %vm2167_vm14, 1e+30, %v6976_v3  ;;  %vm2166_vm15 = vcmp.eq.s32.totalorder %v3942_v26, %v2033_v23 }
 0xa70   : > { %6975 = vst [vmem:[#allocation28_spill] sm:$0xff] %v5755_v29  ;;  %6977 = vst [vmem:[#allocation2_spill] sm:$0xff] %v5758_v33  ;;  %v2159_v44 = vadd.s32 %v2158_v10, %v2156_v39  ;;  %2206 = vmin.xlane.f32.xlu1 %v5758_v33  ;;  %v5763_v57 = vsel %vm2166_vm15, 1e+30, %v6978_v8 }
 0xa71   : > { %6979 = vst [vmem:[#allocation3_spill] sm:$0xff] %v5763_v57  ;;  %v2145_v61 = vadd.s32 %v2144_v60, %v2142_v42  ;;  %2204 = vmin.xlane.f32.xlu0 %v5763_v57 }
 0xa72   : > { %v5768_v30 = vsel %vm348_vm1, %v6980_v45, %v2159_v44  ;;  %vm2175_vm0 = vcmp.eq.s32.totalorder %v3942_v26, %v2159_v44 }
 0xa73   : > { %6981 = vst [vmem:[#allocation4_spill] sm:$0xff] %v5768_v30  ;;  %v5773_v48 = vsel %vm348_vm1, %v6982_v15, %v2145_v61  ;;  %v5776_v5 = vsel %vm2175_vm0, 1e+30, %v6984_v28  ;;  %vm2174_vm2 = vcmp.eq.s32.totalorder %v3942_v26, %v2145_v61 }
 0xa74   : > { %6983 = vst [vmem:[#allocation5_spill] sm:$0xff] %v5773_v48  ;;  %6985 = vst [vmem:[#allocation14_spill] sm:$0xff] %v5776_v5  ;;  %2222 = vmin.xlane.f32.xlu1 %v5776_v5  ;;  %v5781_v13 = vsel %vm2174_vm2, 1e+30, %v6986_v1 }
 0xa75   : > { %6987 = vst [vmem:[#allocation6_spill] sm:$0xff] %v5781_v13  ;;  %2220 = vmin.xlane.f32.xlu0 %v5781_v13 }
 0xae5   : > { %v2195_v14 = vpop.xlane.xlu1 %2194 }
 0xae6   : > { %vm2225_vm3 = vcmp.le.f32.partialorder %v5640_v4, %v2195_v14  ;;  %v2193_v43 = vpop.xlane.xlu0 %2192 }
 0xae7   : > { %v5786_v7 = vsel %vm2225_vm3, %v3942_v26, 128  ;;  %vm2224_vm1 = vcmp.le.f32.partialorder %v5645_v35, %v2193_v43 }
 0xae8   : > { %v2271_v63 = vshra.s32 %v5786_v7, 16  ;;  %v5791_v58 = vsel %vm2224_vm1, %v3942_v26, 128 }
 0xae9   : > { %v2257_v27 = vshra.s32 %v5791_v58, 16  ;;  %v2211_v36 = vpop.xlane.xlu1 %2210 }
 0xaea   : > { %vm2233_vm4 = vcmp.le.f32.partialorder %v5660_v12, %v2211_v36  ;;  %v2209_v38 = vpop.xlane.xlu0 %2208  ;;  %v5795_v25 = vcvt.s32.f32 %v2271_v63 }
 0xaeb   : > { %v5798_v6 = vsel %vm2233_vm4, %v3942_v26, 128  ;;  %vm2232_vm7 = vcmp.le.f32.partialorder %v5665_v34, %v2209_v38  ;;  %v5801_v32 = vcvt.s32.f32 %v2257_v27 }
 0xaec   : > { %v2383_v50 = vshra.s32 %v5798_v6, 16  ;;  %v5805_v9 = vsel %vm2232_vm7, %v3942_v26, 128  ;;  %2274 = vmin.xlane.f32.xlu1 %v5795_v25 }
 0xaed   : > { %v2369_v37 = vshra.s32 %v5805_v9, 16  ;;  %v2199_v10 = vpop.xlane.xlu1 %2198  ;;  %2260 = vmin.xlane.f32.xlu0 %v5801_v32 }
 0xaee   : > { %vm2227_vm8 = vcmp.le.f32.partialorder %v5680_v47, %v2199_v10  ;;  %v2197_v23 = vpop.xlane.xlu0 %2196  ;;  %v5811_v31 = vcvt.s32.f32 %v2383_v50 }
 0xaef   : > { %v5814_v60 = vsel %vm2227_vm8, %v3942_v26, 128  ;;  %vm2226_vm9 = vcmp.le.f32.partialorder %v5685_v55, %v2197_v23  ;;  %v5817_v24 = vcvt.s32.f32 %v2369_v37 }
 0xaf0   : > { %v2299_v39 = vshra.s32 %v5814_v60, 16  ;;  %v5821_v19 = vsel %vm2226_vm9, %v3942_v26, 128  ;;  %2386 = vmin.xlane.f32.xlu1 %v5811_v31 }
 0xaf1   : > { %v2285_v17 = vshra.s32 %v5821_v19, 16  ;;  %v2215_v42 = vpop.xlane.xlu1 %2214  ;;  %2372 = vmin.xlane.f32.xlu0 %v5817_v24 }
 0xaf2   : > { %vm2235_vm10 = vcmp.le.f32.partialorder %v5700_v62, %v2215_v42  ;;  %v2213_v3 = vpop.xlane.xlu0 %2212  ;;  %v5827_v44 = vcvt.s32.f32 %v2299_v39 }
 0xaf3   : > { %v5830_v8 = vsel %vm2235_vm10, %v3942_v26, 128  ;;  %vm2234_vm5 = vcmp.le.f32.partialorder %v5705_v0, %v2213_v3  ;;  %v5833_v61 = vcvt.s32.f32 %v2285_v17 }
 0xaf4   : > { %v2411_v45 = vshra.s32 %v5830_v8, 16  ;;  %v5837_v15 = vsel %vm2234_vm5, %v3942_v26, 128  ;;  %2302 = vmin.xlane.f32.xlu1 %v5827_v44 }
 0xaf5   : > { %v2397_v28 = vshra.s32 %v5837_v15, 16  ;;  %v2203_v1 = vpop.xlane.xlu1 %2202  ;;  %2288 = vmin.xlane.f32.xlu0 %v5833_v61 }
 0xaf6   : > { %vm2229_vm6 = vcmp.le.f32.partialorder %v5720_v49, %v2203_v1  ;;  %v2201_v14 = vpop.xlane.xlu0 %2200  ;;  %v5843_v43 = vcvt.s32.f32 %v2411_v45 }
 0xaf7   : > { %v5846_v63 = vsel %vm2229_vm6, %v3942_v26, 128  ;;  %vm2228_vm11 = vcmp.le.f32.partialorder %v5725_v11, %v2201_v14  ;;  %v5849_v27 = vcvt.s32.f32 %v2397_v28 }
 0xaf8   : > { %v2327_v36 = vshra.s32 %v5846_v63, 16  ;;  %v5853_v38 = vsel %vm2228_vm11, %v3942_v26, 128  ;;  %2414 = vmin.xlane.f32.xlu1 %v5843_v43 }
 0xaf9   : > { %v2313_v50 = vshra.s32 %v5853_v38, 16  ;;  %v2219_v37 = vpop.xlane.xlu1 %2218  ;;  %2400 = vmin.xlane.f32.xlu0 %v5849_v27 }
 0xafa   : > { %vm2237_vm12 = vcmp.le.f32.partialorder %v5740_v59, %v2219_v37  ;;  %v2217_v10 = vpop.xlane.xlu0 %2216  ;;  %v5859_v23 = vcvt.s32.f32 %v2327_v36 }
 0xafb   : > { %v5862_v39 = vsel %vm2237_vm12, %v3942_v26, 128  ;;  %vm2236_vm13 = vcmp.le.f32.partialorder %v5745_v53, %v2217_v10  ;;  %v5865_v17 = vcvt.s32.f32 %v2313_v50  ;;  %v2368_v53 = vand.u32 65535, %v5805_v9 }
 0xafc   : > { %v2439_v42 = vshra.s32 %v5862_v39, 16  ;;  %v5869_v3 = vsel %vm2236_vm13, %v3942_v26, 128  ;;  %2330 = vmin.xlane.f32.xlu1 %v5859_v23  ;;  %v2284_v9 = vand.u32 65535, %v5821_v19  ;;  %v2396_v19 = vand.u32 65535, %v5837_v15 }
 0xafd   : > { %v2425_v45 = vshra.s32 %v5869_v3, 16  ;;  %v2207_v28 = vpop.xlane.xlu1 %2206  ;;  %2316 = vmin.xlane.f32.xlu0 %v5865_v17  ;;  %v2312_v15 = vand.u32 65535, %v5853_v38  ;;  %v2424_v38 = vand.u32 65535, %v5869_v3 }
 0xafe   : > { %vm2231_vm14 = vcmp.le.f32.partialorder %v5758_v33, %v2207_v28  ;;  %v2205_v1 = vpop.xlane.xlu0 %2204  ;;  %v5875_v14 = vcvt.s32.f32 %v2439_v42 }
 0xaff   : > { %v5878_v36 = vsel %vm2231_vm14, %v3942_v26, 128  ;;  %vm2230_vm15 = vcmp.le.f32.partialorder %v5763_v57, %v2205_v1  ;;  %v5881_v50 = vcvt.s32.f32 %v2425_v45 }
 0xb00   : > { %v2355_v37 = vshra.s32 %v5878_v36, 16  ;;  %v5885_v10 = vsel %vm2230_vm15, %v3942_v26, 128  ;;  %2442 = vmin.xlane.f32.xlu1 %v5875_v14 }
 0xb01   : > { %v2341_v48 = vshra.s32 %v5885_v10, 16  ;;  %v2223_v28 = vpop.xlane.xlu1 %2222  ;;  %2428 = vmin.xlane.f32.xlu0 %v5881_v50  ;;  %v2340_v3 = vand.u32 65535, %v5885_v10 }
 0xb02   : > { %vm2239_vm0 = vcmp.le.f32.partialorder %v5776_v5, %v2223_v28  ;;  %v2221_v42 = vpop.xlane.xlu0 %2220  ;;  %v5891_v30 = vcvt.s32.f32 %v2355_v37 }
 0xb03   : > { %v5894_v45 = vsel %vm2239_vm0, %v3942_v26, 128  ;;  %vm2238_vm2 = vcmp.le.f32.partialorder %v5781_v13, %v2221_v42  ;;  %v5897_v1 = vcvt.s32.f32 %v2341_v48  ;;  %v2270_v48 = vand.u32 65535, %v5786_v7 }
 0xb04   : > { %v2467_v57 = vshra.s32 %v5894_v45, 16  ;;  %v5901_v33 = vsel %vm2238_vm2, %v3942_v26, 128  ;;  %2358 = vmin.xlane.f32.xlu1 %v5891_v30  ;;  %v2256_v42 = vand.u32 65535, %v5791_v58  ;;  %v2382_v13 = vand.u32 65535, %v5798_v6 }
 0xb05   : > { %v2453_v29 = vshra.s32 %v5901_v33, 16  ;;  %2344 = vmin.xlane.f32.xlu0 %v5897_v1  ;;  %v2272_v2 = vcvt.s32.f32 %v2270_v48  ;;  %v2298_v58 = vand.u32 65535, %v5814_v60  ;;  %v2410_v60 = vand.u32 65535, %v5830_v8 }
 0xb06   : > { %v5906_v37 = vcvt.s32.f32 %v2467_v57  ;;  %v2384_v48 = vcvt.s32.f32 %v2382_v13  ;;  %v2326_v8 = vand.u32 65535, %v5846_v63  ;;  %v2438_v63 = vand.u32 65535, %v5862_v39 }
 0xb07   : > { %v5908_v28 = vcvt.s32.f32 %v2453_v29  ;;  %v2258_v29 = vcvt.s32.f32 %v2256_v42  ;;  %v2300_v13 = vcvt.s32.f32 %v2298_v58  ;;  %v2354_v39 = vand.u32 65535, %v5878_v36 }
 0xb08   : > { %2470 = vmin.xlane.f32.xlu1 %v5906_v37  ;;  %v2466_v36 = vand.u32 65535, %v5894_v45  ;;  %v2452_v10 = vand.u32 65535, %v5901_v33 }
 0xb09   : > { %2456 = vmin.xlane.f32.xlu0 %v5908_v28 }
 0xb0a   : > { %v2468_v45 = vcvt.s32.f32 %v2466_v36  ;;  %v2454_v33 = vcvt.s32.f32 %v2452_v10 }
 0xb79   : > { %v5915_v5 = vpop.xlane.xlu1 %2274 }
 0xb7a   : > { %v5918_v59 = vpop.xlane.xlu0 %2260  ;;  %vm2276_vm3 = vcmp.eq.f32.partialorder %v5795_v25, %v5915_v5  ;;  %v2370_v25 = vcvt.s32.f32 %v2368_v53  ;;  %v2286_v53 = vcvt.s32.f32 %v2284_v9 }
 0xb7b   : > { %v2277_v57 = vsel %vm2276_vm3, %v2272_v2, inf  ;;  %vm2262_vm1 = vcmp.eq.f32.partialorder %v5801_v32, %v5918_v59  ;;  %vm3186_vm3 = vcmask 39936  }
 0xb7c   : > { %2278 = vmin.xlane.f32.xlu1 %v2277_v57  ;;  %v2263_v7 = vsel %vm2262_vm1, %v2258_v29, inf }
 0xb7d   : > { %v5925_v6 = vpop.xlane.xlu1 %2386  ;;  %2264 = vmin.xlane.f32.xlu0 %v2263_v7  ;;  %v2412_v7 = vcvt.s32.f32 %v2410_v60 }
 0xb7e   : > { %v5928_v18 = vpop.xlane.xlu0 %2372  ;;  %vm2388_vm4 = vcmp.eq.f32.partialorder %v5811_v31, %v5925_v6 }
 0xb7f   : > { %v2389_v2 = vsel %vm2388_vm4, %v2384_v48, inf  ;;  %vm2374_vm7 = vcmp.eq.f32.partialorder %v5817_v24, %v5928_v18 }
 0xb80   : > { %2390 = vmin.xlane.f32.xlu1 %v2389_v2  ;;  %v2375_v32 = vsel %vm2374_vm7, %v2370_v25, inf  ;;  %v2328_v25 = vcvt.s32.f32 %v2326_v8 }
 0xb81   : > { %v5935_v42 = vpop.xlane.xlu1 %2302  ;;  %2376 = vmin.xlane.f32.xlu0 %v2375_v32 }
 0xb82   : > { %v5938_v29 = vpop.xlane.xlu0 %2288  ;;  %vm2304_vm8 = vcmp.eq.f32.partialorder %v5827_v44, %v5935_v42  ;;  %v2398_v44 = vcvt.s32.f32 %v2396_v19 }
 0xb83   : > { %v2305_v31 = vsel %vm2304_vm8, %v2300_v13, inf  ;;  %vm2290_vm9 = vcmp.eq.f32.partialorder %v5833_v61, %v5938_v29  ;;  %v2440_v13 = vcvt.s32.f32 %v2438_v63  ;;  %v2393_v63 = vcvt.f32.s32 %v5925_v6 }
 0xb84   : > { %2306 = vmin.xlane.f32.xlu1 %v2305_v31  ;;  %v2291_v24 = vsel %vm2290_vm9, %v2286_v53, inf }
 0xb85   : > { %v5945_v57 = vpop.xlane.xlu1 %2414  ;;  %2292 = vmin.xlane.f32.xlu0 %v2291_v24  ;;  %v2356_v24 = vcvt.s32.f32 %v2354_v39 }
 0xb86   : > { %v5948_v58 = vpop.xlane.xlu0 %2400  ;;  %vm2416_vm10 = vcmp.eq.f32.partialorder %v5843_v43, %v5945_v57  ;;  %v2314_v43 = vcvt.s32.f32 %v2312_v15 }
 0xb87   : > { %v2417_v48 = vsel %vm2416_vm10, %v2412_v7, inf  ;;  %vm2402_vm5 = vcmp.eq.f32.partialorder %v5849_v27, %v5948_v58 }
 0xb88   : > { %2418 = vmin.xlane.f32.xlu1 %v2417_v48  ;;  %v2403_v61 = vsel %vm2402_vm5, %v2398_v44, inf }
 0xb89   : > { %v5955_v9 = vpop.xlane.xlu1 %2330  ;;  %2404 = vmin.xlane.f32.xlu0 %v2403_v61  ;;  %v2267_v61 = vcvt.f32.s32 %v5918_v59 }
 0xb8a   : > { %v5958_v2 = vpop.xlane.xlu0 %2316  ;;  %vm2332_vm6 = vcmp.eq.f32.partialorder %v5859_v23, %v5955_v9  ;;  %v2426_v23 = vcvt.s32.f32 %v2424_v38 }
 0xb8b   : > { %v2333_v32 = vsel %vm2332_vm6, %v2328_v25, inf  ;;  %vm2318_vm11 = vcmp.eq.f32.partialorder %v5865_v17, %v5958_v2 }
 0xb8c   : > { %2334 = vmin.xlane.f32.xlu1 %v2333_v32  ;;  %v2319_v27 = vsel %vm2318_vm11, %v2314_v43, inf  ;;  %v2379_v43 = vcvt.f32.s32 %v5928_v18 }
 0xb8d   : > { %v5965_v60 = vpop.xlane.xlu1 %2442  ;;  %2320 = vmin.xlane.f32.xlu0 %v2319_v27  ;;  %v2268_v27 = vshll.u32 %v2267_v61, 16  ;;  %v2337_v61 = vcvt.f32.s32 %v5955_v9 }
 0xb8e   : > { %v5968_v19 = vpop.xlane.xlu0 %2428  ;;  %vm2444_vm12 = vcmp.eq.f32.partialorder %v5875_v14, %v5965_v60  ;;  %v2342_v14 = vcvt.s32.f32 %v2340_v3  ;;  %v2309_v3 = vcvt.f32.s32 %v5935_v42  ;;  %v2380_v59 = vshll.u32 %v2379_v43, 16 }
 0xb8f   : > { %v2445_v53 = vsel %vm2444_vm12, %v2440_v13, inf  ;;  %vm2430_vm13 = vcmp.eq.f32.partialorder %v5881_v50, %v5968_v19 }
 0xb90   : > { %2446 = vmin.xlane.f32.xlu1 %v2445_v53  ;;  %v2431_v17 = vsel %vm2430_vm13, %v2426_v23, inf  ;;  %v2295_v23 = vcvt.f32.s32 %v5938_v29  ;;  %v2310_v10 = vshll.u32 %v2309_v3, 16 }
 0xb91   : > { %v5975_v31 = vpop.xlane.xlu1 %2358  ;;  %2432 = vmin.xlane.f32.xlu0 %v2431_v17 }
 0xb92   : > { %v5978_v8 = vpop.xlane.xlu0 %2344  ;;  %vm2360_vm14 = vcmp.eq.f32.partialorder %v5891_v30, %v5975_v31 }
 0xb93   : > { %v2361_v7 = vsel %vm2360_vm14, %v2356_v24, inf  ;;  %vm2346_vm15 = vcmp.eq.f32.partialorder %v5897_v1, %v5978_v8  ;;  %v2281_v1 = vcvt.f32.s32 %v5915_v5 }
 0xb94   : > { %2362 = vmin.xlane.f32.xlu1 %v2361_v7  ;;  %v2347_v50 = vsel %vm2346_vm15, %v2342_v14, inf  ;;  %v2296_v14 = vshll.u32 %v2295_v23, 16  ;;  %v2421_v7 = vcvt.f32.s32 %v5945_v57 }
 0xb95   : > { %v5984_v15 = vpop.xlane.xlu1 %2470  ;;  %2348 = vmin.xlane.f32.xlu0 %v2347_v50  ;;  %v2282_v38 = vshll.u32 %v2281_v1, 16 }
 0xb96   : > { %v5986_v44 = vpop.xlane.xlu0 %2456  ;;  %vm2472_vm0 = vcmp.eq.f32.partialorder %v5906_v37, %v5984_v15 }
 0xb97   : > { %v2473_v48 = vsel %vm2472_vm0, %v2468_v45, inf  ;;  %vm2458_vm2 = vcmp.eq.f32.partialorder %v5908_v28, %v5986_v44  ;;  %v2394_v28 = vshll.u32 %v2393_v63, 16  ;;  %v2323_v63 = vcvt.f32.s32 %v5958_v2 }
 0xb98   : > { %2474 = vmin.xlane.f32.xlu1 %v2473_v48  ;;  %v2459_v30 = vsel %vm2458_vm2, %v2454_v33, inf }
 0xb99   : > { %2460 = vmin.xlane.f32.xlu0 %v2459_v30 }
 0xc09   : > { %v2279_v25 = vpop.xlane.xlu1 %2278 }
 0xc0a   : > { %v2280_v32 = vcvt.f32.s32 %v2279_v25  ;;  %v2265_v37 = vpop.xlane.xlu0 %2264 }
 0xc0b   : > { %v2266_v39 = vcvt.f32.s32 %v2265_v37 }
 0xc0c   : > { %v2283_v13 = vadd.s32 %v2282_v38, %v2280_v32 }
 0xc0d   : > { %v2269_v5 = vadd.s32 %v2268_v27, %v2266_v39  ;;  %v2391_v53 = vpop.xlane.xlu1 %2390  ;;  %v2338_v27 = vshll.u32 %v2337_v61, 16  ;;  %v2324_v39 = vshll.u32 %v2323_v63, 16 }
 0xc0e   : > { %v6000_v6 = vsel %vm3186_vm3, %v5632_v56, %v2283_v13  ;;  %v2392_v17 = vcvt.f32.s32 %v2391_v53  ;;  %v2377_v18 = vpop.xlane.xlu0 %2376  ;;  %vm2481_vm1 = vcmp.eq.s32.totalorder %v3942_v26, %v2283_v13  ;;  %v2449_v13 = vcvt.f32.s32 %v5965_v60 }
 0xc0f   : > { %v6005_v36 = vsel %vm3186_vm3, %v5637_v21, %v2269_v5  ;;  %v2378_v24 = vcvt.f32.s32 %v2377_v18  ;;  %v6008_v42 = vsel %vm2481_vm1, 1e+30, %v5640_v4  ;;  %vm2480_vm4 = vcmp.eq.s32.totalorder %v3942_v26, %v2269_v5 }
 0xc10   : > { %v2395_v29 = vadd.s32 %v2394_v28, %v2392_v17  ;;  %2514 = vmin.xlane.f32.xlu1 %v6008_v42  ;;  %v6013_v56 = vsel %vm2480_vm4, 1e+30, %v5645_v35  ;;  %v2407_v21 = vcvt.f32.s32 %v5948_v58  ;;  %v2422_v58 = vshll.u32 %v2421_v7, 16 }
 0xc11   : > { %v2381_v50 = vadd.s32 %v2380_v59, %v2378_v24  ;;  %v2307_v45 = vpop.xlane.xlu1 %2306  ;;  %2512 = vmin.xlane.f32.xlu0 %v6013_v56  ;;  %v2365_v17 = vcvt.f32.s32 %v5975_v31  ;;  %v2351_v18 = vcvt.f32.s32 %v5978_v8 }
 0xc12   : > { %v6020_v4 = vsel %vm3186_vm3, %v5652_v16, %v2395_v29  ;;  %v2308_v33 = vcvt.f32.s32 %v2307_v45  ;;  %v2293_v48 = vpop.xlane.xlu0 %2292  ;;  %vm2489_vm7 = vcmp.eq.s32.totalorder %v3942_v26, %v2395_v29  ;;  %v2408_v38 = vshll.u32 %v2407_v21, 16 }
 0xc13   : > { %v6025_v35 = vsel %vm3186_vm3, %v5657_v54, %v2381_v50  ;;  %v2294_v30 = vcvt.f32.s32 %v2293_v48  ;;  %v6028_v57 = vsel %vm2489_vm7, 1e+30, %v5660_v12  ;;  %vm2488_vm8 = vcmp.eq.s32.totalorder %v3942_v26, %v2381_v50 }
 0xc14   : > { %v2311_v1 = vadd.s32 %v2310_v10, %v2308_v33  ;;  %2530 = vmin.xlane.f32.xlu1 %v6028_v57  ;;  %v6033_v16 = vsel %vm2488_vm8, 1e+30, %v5665_v34  ;;  %v2366_v50 = vshll.u32 %v2365_v17, 16  ;;  %v2352_v45 = vshll.u32 %v2351_v18, 16  ;;  %v7001_v17 = vld [vmem:[#allocation4_spill] sm:$0xff] }
 0xc15   : > { %v2297_v25 = vadd.s32 %v2296_v14, %v2294_v30  ;;  %v2419_v54 = vpop.xlane.xlu1 %2418  ;;  %2528 = vmin.xlane.f32.xlu0 %v6033_v16  ;;  %v2477_v21 = vcvt.f32.s32 %v5984_v15  ;;  %v6989_v15 = vld [vmem:[#allocation26_spill] sm:$0xff] }
 0xc16   : > { %v6040_v12 = vsel %vm3186_vm3, %v5672_v40, %v2311_v1  ;;  %v2420_v43 = vcvt.f32.s32 %v2419_v54  ;;  %v2405_v32 = vpop.xlane.xlu0 %2404  ;;  %vm2483_vm9 = vcmp.eq.s32.totalorder %v3942_v26, %v2311_v1 }
 0xc17   : > { %v6045_v34 = vsel %vm3186_vm3, %v5677_v41, %v2297_v25  ;;  %v2406_v9 = vcvt.f32.s32 %v2405_v32  ;;  %v6048_v2 = vsel %vm2483_vm9, 1e+30, %v5680_v47  ;;  %vm2482_vm10 = vcmp.eq.s32.totalorder %v3942_v26, %v2297_v25 }
 0xc18   : > { %v2423_v37 = vadd.s32 %v2422_v58, %v2420_v43  ;;  %2518 = vmin.xlane.f32.xlu1 %v6048_v2  ;;  %v6053_v40 = vsel %vm2482_vm10, 1e+30, %v5685_v55  ;;  %v2435_v41 = vcvt.f32.s32 %v5968_v19  ;;  %v2450_v19 = vshll.u32 %v2449_v13, 16  ;;  %v6995_v13 = vld [vmem:[#allocation28_spill] sm:$0xff] }
 0xc19   : > { %v2409_v28 = vadd.s32 %v2408_v38, %v2406_v9  ;;  %v2335_v3 = vpop.xlane.xlu1 %2334  ;;  %2516 = vmin.xlane.f32.xlu0 %v6053_v40  ;;  %v2478_v54 = vshll.u32 %v2477_v21, 16  ;;  %v6993_v9 = vld [vmem:[#allocation27_spill] sm:$0xff] }
 0xc1a   : > { %v6060_v47 = vsel %vm3186_vm3, %v5692_v52, %v2423_v37  ;;  %v2336_v23 = vcvt.f32.s32 %v2335_v3  ;;  %v2321_v5 = vpop.xlane.xlu0 %2320  ;;  %vm2491_vm5 = vcmp.eq.s32.totalorder %v3942_v26, %v2423_v37  ;;  %v2436_v29 = vshll.u32 %v2435_v41, 16  ;;  %v6997_v41 = vld [vmem:[#allocation2_spill] sm:$0xff] }
 0xc1b   : > { %v6065_v55 = vsel %vm3186_vm3, %v5697_v20, %v2409_v28  ;;  %v2322_v53 = vcvt.f32.s32 %v2321_v5  ;;  %v6068_v60 = vsel %vm2491_vm5, 1e+30, %v5700_v62  ;;  %vm2490_vm6 = vcmp.eq.s32.totalorder %v3942_v26, %v2409_v28 }
 0xc1c   : > { %v2339_v59 = vadd.s32 %v2338_v27, %v2336_v23  ;;  %2534 = vmin.xlane.f32.xlu1 %v6068_v60  ;;  %v6073_v52 = vsel %vm2490_vm6, 1e+30, %v5705_v0 }
 0xc1d   : > { %v2325_v24 = vadd.s32 %v2324_v39, %v2322_v53  ;;  %v2447_v20 = vpop.xlane.xlu1 %2446  ;;  %2532 = vmin.xlane.f32.xlu0 %v6073_v52  ;;  %v6999_v53 = vld [vmem:[#allocation3_spill] sm:$0xff] }
 0xc1e   : > { %v6080_v62 = vsel %vm3186_vm3, %v5712_v46, %v2339_v59  ;;  %v2448_v10 = vcvt.f32.s32 %v2447_v20  ;;  %v2433_v14 = vpop.xlane.xlu0 %2432  ;;  %vm2485_vm11 = vcmp.eq.s32.totalorder %v3942_v26, %v2339_v59 }
 0xc1f   : > { %v6085_v0 = vsel %vm3186_vm3, %v5717_v51, %v2325_v24  ;;  %v2434_v31 = vcvt.f32.s32 %v2433_v14  ;;  %v6088_v8 = vsel %vm2485_vm11, 1e+30, %v5720_v49  ;;  %vm2484_vm12 = vcmp.eq.s32.totalorder %v3942_v26, %v2325_v24  ;;  %v7003_v24 = vld [vmem:[#allocation5_spill] sm:$0xff]  ;;  %v7007_v14 = vld [vmem:[#allocation6_spill] sm:$0xff] }
 0xc20   : > { %v2451_v7 = vadd.s32 %v2450_v19, %v2448_v10  ;;  %2522 = vmin.xlane.f32.xlu1 %v6088_v8  ;;  %v6093_v46 = vsel %vm2484_vm12, 1e+30, %v5725_v11  ;;  %v2463_v51 = vcvt.f32.s32 %v5986_v44  ;;  %v6988_v11 = vld [vmem:[#allocation11_spill] sm:$0xff]  ;;  %v6991_v44 = vld [vmem:[#allocation12_spill] sm:$0xff] }
 0xc21   : > { %v2437_v33 = vadd.s32 %v2436_v29, %v2434_v31  ;;  %v2363_v48 = vpop.xlane.xlu1 %2362  ;;  %2520 = vmin.xlane.f32.xlu0 %v6093_v46  ;;  %v7005_v29 = vld [vmem:[#allocation14_spill] sm:$0xff] }
 0xc22   : > { %v6100_v49 = vsel %vm3186_vm3, %v5732_v22, %v2451_v7  ;;  %v2364_v30 = vcvt.f32.s32 %v2363_v48  ;;  %v2349_v1 = vpop.xlane.xlu0 %2348  ;;  %vm2493_vm13 = vcmp.eq.s32.totalorder %v3942_v26, %v2451_v7  ;;  %v2464_v32 = vshll.u32 %v2463_v51, 16 }
 0xc23   : > { %v6105_v58 = vsel %vm3186_vm3, %v6988_v11, %v2437_v33  ;;  %v2350_v61 = vcvt.f32.s32 %v2349_v1  ;;  %v6108_v63 = vsel %vm2493_vm13, 1e+30, %v6989_v15  ;;  %vm2492_vm14 = vcmp.eq.s32.totalorder %v3942_v26, %v2437_v33 }
 0xc24   : > { %6990 = vst [vmem:[#allocation13_spill] sm:$0xff] %v6108_v63  ;;  %v2367_v25 = vadd.s32 %v2366_v50, %v2364_v30  ;;  %2538 = vmin.xlane.f32.xlu1 %v6108_v63  ;;  %v6113_v22 = vsel %vm2492_vm14, 1e+30, %v6991_v44 }
 0xc25   : > { %6992 = vst [vmem:[#allocation15_spill] sm:$0xff] %v6113_v22  ;;  %v2353_v38 = vadd.s32 %v2352_v45, %v2350_v61  ;;  %v2475_v43 = vpop.xlane.xlu1 %2474  ;;  %2536 = vmin.xlane.f32.xlu0 %v6113_v22 }
 0xc26   : > { %v6118_v37 = vsel %vm3186_vm3, %v6993_v9, %v2367_v25  ;;  %v2476_v27 = vcvt.f32.s32 %v2475_v43  ;;  %v2461_v39 = vpop.xlane.xlu0 %2460  ;;  %vm2487_vm15 = vcmp.eq.s32.totalorder %v3942_v26, %v2367_v25 }
 0xc27   : > { %6994 = vst [vmem:[#allocation16_spill] sm:$0xff] %v6118_v37  ;;  %v6123_v28 = vsel %vm3186_vm3, %v6995_v13, %v2353_v38  ;;  %v2462_v3 = vcvt.f32.s32 %v2461_v39  ;;  %v6126_v23 = vsel %vm2487_vm15, 1e+30, %v6997_v41  ;;  %vm2486_vm0 = vcmp.eq.s32.totalorder %v3942_v26, %v2353_v38 }
 0xc28   : > { %6996 = vst [vmem:[#allocation7_spill] sm:$0xff] %v6123_v28  ;;  %6998 = vst [vmem:[#allocation18_spill] sm:$0xff] %v6126_v23  ;;  %v2479_v5 = vadd.s32 %v2478_v54, %v2476_v27  ;;  %2526 = vmin.xlane.f32.xlu1 %v6126_v23  ;;  %v6131_v59 = vsel %vm2486_vm0, 1e+30, %v6999_v53 }
 0xc29   : > { %7000 = vst [vmem:[#allocation8_spill] sm:$0xff] %v6131_v59  ;;  %v2465_v19 = vadd.s32 %v2464_v32, %v2462_v3  ;;  %2524 = vmin.xlane.f32.xlu0 %v6131_v59 }
 0xc2a   : > { %v6136_v18 = vsel %vm3186_vm3, %v7001_v17, %v2479_v5  ;;  %vm2495_vm2 = vcmp.eq.s32.totalorder %v3942_v26, %v2479_v5 }
 0xc2b   : > { %7002 = vst [vmem:[#allocation17_spill] sm:$0xff] %v6136_v18  ;;  %v6141_v20 = vsel %vm3186_vm3, %v7003_v24, %v2465_v19  ;;  %v6144_v10 = vsel %vm2495_vm2, 1e+30, %v7005_v29  ;;  %vm2494_vm1 = vcmp.eq.s32.totalorder %v3942_v26, %v2465_v19 }
 0xc2c   : > { %7004 = vst [vmem:[#allocation19_spill] sm:$0xff] %v6141_v20  ;;  %7006 = vst [vmem:[#allocation21_spill] sm:$0xff] %v6144_v10  ;;  %2542 = vmin.xlane.f32.xlu1 %v6144_v10  ;;  %v6149_v31 = vsel %vm2494_vm1, 1e+30, %v7007_v14 }
 0xc2d   : > { %7008 = vst [vmem:[#allocation20_spill] sm:$0xff] %v6149_v31  ;;  %2540 = vmin.xlane.f32.xlu0 %v6149_v31 }
 0xc9d   : > { %v2515_v7 = vpop.xlane.xlu1 %2514 }
 0xc9e   : > { %vm2545_vm4 = vcmp.le.f32.partialorder %v6008_v42, %v2515_v7  ;;  %v2513_v50 = vpop.xlane.xlu0 %2512 }
 0xc9f   : > { %v6154_v45 = vsel %vm2545_vm4, %v3942_v26, 128  ;;  %vm2544_vm3 = vcmp.le.f32.partialorder %v6013_v56, %v2513_v50 }
 0xca0   : > { %v2591_v21 = vshra.s32 %v6154_v45, 16  ;;  %v6159_v33 = vsel %vm2544_vm3, %v3942_v26, 128 }
 0xca1   : > { %v2577_v48 = vshra.s32 %v6159_v33, 16  ;;  %v2531_v51 = vpop.xlane.xlu1 %2530 }
 0xca2   : > { %v6162_v30 = vcvt.s32.f32 %v2591_v21  ;;  %vm2553_vm7 = vcmp.le.f32.partialorder %v6028_v57, %v2531_v51  ;;  %v2529_v1 = vpop.xlane.xlu0 %2528 }
 0xca3   : > { %v6165_v11 = vcvt.s32.f32 %v2577_v48  ;;  %v6168_v61 = vsel %vm2553_vm7, %v3942_v26, 128  ;;  %vm2552_vm8 = vcmp.le.f32.partialorder %v6033_v16, %v2529_v1 }
 0xca4   : > { %v2703_v15 = vshra.s32 %v6168_v61, 16  ;;  %v6173_v25 = vsel %vm2552_vm8, %v3942_v26, 128  ;;  %2594 = vmin.xlane.f32.xlu1 %v6162_v30  ;;  %v2702_v28 = vand.u32 65535, %v6168_v61 }
 0xca5   : > { %v2689_v44 = vshra.s32 %v6173_v25, 16  ;;  %v2519_v54 = vpop.xlane.xlu1 %2518  ;;  %2580 = vmin.xlane.f32.xlu0 %v6165_v11 }
 0xca6   : > { %v6178_v38 = vcvt.s32.f32 %v2703_v15  ;;  %vm2547_vm9 = vcmp.le.f32.partialorder %v6048_v2, %v2519_v54  ;;  %v2517_v43 = vpop.xlane.xlu0 %2516 }
 0xca7   : > { %v6181_v32 = vcvt.s32.f32 %v2689_v44  ;;  %v6184_v9 = vsel %vm2547_vm9, %v3942_v26, 128  ;;  %vm2546_vm10 = vcmp.le.f32.partialorder %v6053_v40, %v2517_v43 }
 0xca8   : > { %v2619_v27 = vshra.s32 %v6184_v9, 16  ;;  %v6189_v39 = vsel %vm2546_vm10, %v3942_v26, 128  ;;  %2706 = vmin.xlane.f32.xlu1 %v6178_v38 }
 0xca9   : > { %v2605_v13 = vshra.s32 %v6189_v39, 16  ;;  %v2535_v3 = vpop.xlane.xlu1 %2534  ;;  %2692 = vmin.xlane.f32.xlu0 %v6181_v32 }
 0xcaa   : > { %v6194_v41 = vcvt.s32.f32 %v2619_v27  ;;  %vm2555_vm5 = vcmp.le.f32.partialorder %v6068_v60, %v2535_v3  ;;  %v2533_v5 = vpop.xlane.xlu0 %2532 }
 0xcab   : > { %v6197_v53 = vcvt.s32.f32 %v2605_v13  ;;  %v6200_v19 = vsel %vm2555_vm5, %v3942_v26, 128  ;;  %vm2554_vm6 = vcmp.le.f32.partialorder %v6073_v52, %v2533_v5 }
 0xcac   : > { %v2731_v17 = vshra.s32 %v6200_v19, 16  ;;  %v6205_v24 = vsel %vm2554_vm6, %v3942_v26, 128  ;;  %2622 = vmin.xlane.f32.xlu1 %v6194_v41 }
 0xcad   : > { %v2717_v29 = vshra.s32 %v6205_v24, 16  ;;  %v2523_v14 = vpop.xlane.xlu1 %2522  ;;  %2608 = vmin.xlane.f32.xlu0 %v6197_v53 }
 0xcae   : > { %v6210_v7 = vcvt.s32.f32 %v2731_v17  ;;  %vm2549_vm11 = vcmp.le.f32.partialorder %v6088_v8, %v2523_v14  ;;  %v2521_v50 = vpop.xlane.xlu0 %2520 }
 0xcaf   : > { %v6213_v21 = vcvt.s32.f32 %v2717_v29  ;;  %v6216_v48 = vsel %vm2549_vm11, %v3942_v26, 128  ;;  %vm2548_vm12 = vcmp.le.f32.partialorder %v6093_v46, %v2521_v50 }
 0xcb0   : > { %v2647_v51 = vshra.s32 %v6216_v48, 16  ;;  %v6221_v1 = vsel %vm2548_vm12, %v3942_v26, 128  ;;  %2734 = vmin.xlane.f32.xlu1 %v6210_v7 }
 0xcb1   : > { %v2633_v15 = vshra.s32 %v6221_v1, 16  ;;  %v2539_v44 = vpop.xlane.xlu1 %2538  ;;  %2720 = vmin.xlane.f32.xlu0 %v6213_v21 }
 0xcb2   : > { %v6226_v54 = vcvt.s32.f32 %v2647_v51  ;;  %vm2557_vm13 = vcmp.le.f32.partialorder %v6108_v63, %v2539_v44  ;;  %v2537_v43 = vpop.xlane.xlu0 %2536  ;;  %v2688_v63 = vand.u32 65535, %v6173_v25  ;;  %v2604_v25 = vand.u32 65535, %v6189_v39 }
 0xcb3   : > { %v6229_v27 = vcvt.s32.f32 %v2633_v15  ;;  %v6232_v13 = vsel %vm2557_vm13, %v3942_v26, 128  ;;  %vm2556_vm14 = vcmp.le.f32.partialorder %v6113_v22, %v2537_v43  ;;  %v2716_v39 = vand.u32 65535, %v6205_v24 }
 0xcb4   : > { %v2759_v3 = vshra.s32 %v6232_v13, 16  ;;  %v6237_v5 = vsel %vm2556_vm14, %v3942_v26, 128  ;;  %2650 = vmin.xlane.f32.xlu1 %v6226_v54  ;;  %v2632_v24 = vand.u32 65535, %v6221_v1 }
 0xcb5   : > { %v2745_v17 = vshra.s32 %v6237_v5, 16  ;;  %v2527_v29 = vpop.xlane.xlu1 %2526  ;;  %2636 = vmin.xlane.f32.xlu0 %v6229_v27  ;;  %v2744_v1 = vand.u32 65535, %v6237_v5 }
 0xcb6   : > { %v6242_v14 = vcvt.s32.f32 %v2759_v3  ;;  %vm2551_vm15 = vcmp.le.f32.partialorder %v6126_v23, %v2527_v29  ;;  %v2525_v50 = vpop.xlane.xlu0 %2524 }
 0xcb7   : > { %v6245_v51 = vcvt.s32.f32 %v2745_v17  ;;  %v6248_v15 = vsel %vm2551_vm15, %v3942_v26, 128  ;;  %vm2550_vm0 = vcmp.le.f32.partialorder %v6131_v59, %v2525_v50 }
 0xcb8   : > { %v2675_v44 = vshra.s32 %v6248_v15, 16  ;;  %v6253_v43 = vsel %vm2550_vm0, %v3942_v26, 128  ;;  %2762 = vmin.xlane.f32.xlu1 %v6242_v14 }
 0xcb9   : > { %v2661_v3 = vshra.s32 %v6253_v43, 16  ;;  %v2543_v20 = vpop.xlane.xlu1 %2542  ;;  %2748 = vmin.xlane.f32.xlu0 %v6245_v51  ;;  %v2660_v5 = vand.u32 65535, %v6253_v43 }
 0xcba   : > { %v6258_v29 = vcvt.s32.f32 %v2675_v44  ;;  %vm2559_vm2 = vcmp.le.f32.partialorder %v6144_v10, %v2543_v20  ;;  %v2541_v17 = vpop.xlane.xlu0 %2540 }
 0xcbb   : > { %v6261_v18 = vcvt.s32.f32 %v2661_v3  ;;  %v6264_v50 = vsel %vm2559_vm2, %v3942_v26, 128  ;;  %vm2558_vm1 = vcmp.le.f32.partialorder %v6149_v31, %v2541_v17  ;;  %v2590_v17 = vand.u32 65535, %v6154_v45 }
 0xcbc   : > { %v2787_v59 = vshra.s32 %v6264_v50, 16  ;;  %v6269_v23 = vsel %vm2558_vm1, %v3942_v26, 128  ;;  %2678 = vmin.xlane.f32.xlu1 %v6258_v29  ;;  %v2576_v31 = vand.u32 65535, %v6159_v33  ;;  %v2704_v33 = vcvt.s32.f32 %v2702_v28 }
 0xcbd   : > { %v2773_v44 = vshra.s32 %v6269_v23, 16  ;;  %2664 = vmin.xlane.f32.xlu0 %v6261_v18  ;;  %v2592_v10 = vcvt.s32.f32 %v2590_v17  ;;  %v2618_v17 = vand.u32 65535, %v6184_v9  ;;  %v2772_v43 = vand.u32 65535, %v6269_v23 }
 0xcbe   : > { %v6274_v20 = vcvt.s32.f32 %v2787_v59  ;;  %v2578_v22 = vcvt.s32.f32 %v2576_v31  ;;  %v2690_v31 = vcvt.s32.f32 %v2688_v63  ;;  %v2606_v63 = vcvt.s32.f32 %v2604_v25 }
 0xcbf   : > { %v6276_v3 = vcvt.s32.f32 %v2773_v44  ;;  %v2620_v28 = vcvt.s32.f32 %v2618_v17  ;;  %v2718_v17 = vcvt.s32.f32 %v2716_v39  ;;  %v2746_v39 = vcvt.s32.f32 %v2744_v1 }
 0xcc0   : > { %2790 = vmin.xlane.f32.xlu1 %v6274_v20 }
 0xcc1   : > { %2776 = vmin.xlane.f32.xlu0 %v6276_v3 }
 0xd31   : > { %v6283_v37 = vpop.xlane.xlu1 %2594 }
 0xd32   : > { %vm2596_vm4 = vcmp.eq.f32.partialorder %v6162_v30, %v6283_v37  ;;  %v6288_v59 = vpop.xlane.xlu0 %2580 }
 0xd33   : > { %vm2582_vm3 = vcmp.eq.f32.partialorder %v6165_v11, %v6288_v59  ;;  %v2597_v44 = vsel %vm2596_vm4, %v2592_v10, inf  ;;  %v2730_v11 = vand.u32 65535, %v6200_v19  ;;  %v2646_v19 = vand.u32 65535, %v6216_v48 }
 0xd34   : > { %2598 = vmin.xlane.f32.xlu1 %v2597_v44  ;;  %v2583_v45 = vsel %vm2582_vm3, %v2578_v22, inf  ;;  %v2758_v48 = vand.u32 65535, %v6232_v13  ;;  %v2674_v13 = vand.u32 65535, %v6248_v15  ;;  %v2786_v15 = vand.u32 65535, %v6264_v50 }
 0xd35   : > { %v6293_v61 = vpop.xlane.xlu1 %2706  ;;  %2584 = vmin.xlane.f32.xlu0 %v2583_v45  ;;  %v2732_v45 = vcvt.s32.f32 %v2730_v11  ;;  %v2648_v25 = vcvt.s32.f32 %v2646_v19  ;;  %v2662_v19 = vcvt.s32.f32 %v2660_v5  ;;  %v2774_v50 = vcvt.s32.f32 %v2772_v43 }
 0xd36   : > { %vm2708_vm7 = vcmp.eq.f32.partialorder %v6178_v38, %v6293_v61  ;;  %v6298_v30 = vpop.xlane.xlu0 %2692  ;;  %v2760_v11 = vcvt.s32.f32 %v2758_v48  ;;  %v2713_v48 = vcvt.f32.s32 %v6293_v61  ;;  %vm3203_vm4 = vcmask 48128  }
 0xd37   : > { %vm2694_vm8 = vcmp.eq.f32.partialorder %v6181_v32, %v6298_v30  ;;  %v2709_v10 = vsel %vm2708_vm7, %v2704_v33, inf }
 0xd38   : > { %2710 = vmin.xlane.f32.xlu1 %v2709_v10  ;;  %v2695_v22 = vsel %vm2694_vm8, %v2690_v31, inf }
 0xd39   : > { %v6303_v9 = vpop.xlane.xlu1 %2622  ;;  %2696 = vmin.xlane.f32.xlu0 %v2695_v22  ;;  %v2634_v22 = vcvt.s32.f32 %v2632_v24  ;;  %v2788_v24 = vcvt.s32.f32 %v2786_v15 }
 0xd3a   : > { %vm2624_vm9 = vcmp.eq.f32.partialorder %v6194_v41, %v6303_v9  ;;  %v6308_v38 = vpop.xlane.xlu0 %2608  ;;  %v2629_v5 = vcvt.f32.s32 %v6303_v9 }
 0xd3b   : > { %vm2610_vm10 = vcmp.eq.f32.partialorder %v6197_v53, %v6308_v38  ;;  %v2625_v32 = vsel %vm2624_vm9, %v2620_v28, inf }
 0xd3c   : > { %2626 = vmin.xlane.f32.xlu1 %v2625_v32  ;;  %v2611_v44 = vsel %vm2610_vm10, %v2606_v63, inf  ;;  %v2630_v43 = vshll.u32 %v2629_v5, 16 }
 0xd3d   : > { %v6313_v33 = vpop.xlane.xlu1 %2734  ;;  %2612 = vmin.xlane.f32.xlu0 %v2611_v44  ;;  %v2676_v44 = vcvt.s32.f32 %v2674_v13 }
 0xd3e   : > { %vm2736_vm5 = vcmp.eq.f32.partialorder %v6210_v7, %v6313_v33  ;;  %v6318_v41 = vpop.xlane.xlu0 %2720 }
 0xd3f   : > { %vm2722_vm6 = vcmp.eq.f32.partialorder %v6213_v21, %v6318_v41  ;;  %v2737_v53 = vsel %vm2736_vm5, %v2732_v45, inf }
 0xd40   : > { %2738 = vmin.xlane.f32.xlu1 %v2737_v53  ;;  %v2723_v31 = vsel %vm2722_vm6, %v2718_v17, inf }
 0xd41   : > { %v6323_v10 = vpop.xlane.xlu1 %2650  ;;  %2724 = vmin.xlane.f32.xlu0 %v2723_v31 }
 0xd42   : > { %vm2652_vm11 = vcmp.eq.f32.partialorder %v6226_v54, %v6323_v10  ;;  %v6328_v7 = vpop.xlane.xlu0 %2636 }
 0xd43   : > { %vm2638_vm12 = vcmp.eq.f32.partialorder %v6229_v27, %v6328_v7  ;;  %v2653_v21 = vsel %vm2652_vm11, %v2648_v25, inf  ;;  %v2587_v25 = vcvt.f32.s32 %v6288_v59 }
 0xd44   : > { %2654 = vmin.xlane.f32.xlu1 %v2653_v21  ;;  %v2639_v28 = vsel %vm2638_vm12, %v2634_v22, inf  ;;  %v2699_v21 = vcvt.f32.s32 %v6298_v30 }
 0xd45   : > { %v6333_v63 = vpop.xlane.xlu1 %2762  ;;  %2640 = vmin.xlane.f32.xlu0 %v2639_v28 }
 0xd46   : > { %vm2764_vm13 = vcmp.eq.f32.partialorder %v6242_v14, %v6333_v63  ;;  %v6338_v54 = vpop.xlane.xlu0 %2748  ;;  %v2700_v59 = vshll.u32 %v2699_v21, 16 }
 0xd47   : > { %vm2750_vm14 = vcmp.eq.f32.partialorder %v6245_v51, %v6338_v54  ;;  %v2765_v27 = vsel %vm2764_vm13, %v2760_v11, inf  ;;  %v2588_v11 = vshll.u32 %v2587_v25, 16 }
 0xd48   : > { %2766 = vmin.xlane.f32.xlu1 %v2765_v27  ;;  %v2751_v32 = vsel %vm2750_vm14, %v2746_v39, inf  ;;  %v2714_v39 = vshll.u32 %v2713_v48, 16  ;;  %v2615_v27 = vcvt.f32.s32 %v6308_v38  ;;  %v2657_v48 = vcvt.f32.s32 %v6323_v10 }
 0xd49   : > { %v6343_v45 = vpop.xlane.xlu1 %2678  ;;  %2752 = vmin.xlane.f32.xlu0 %v2751_v32 }
 0xd4a   : > { %vm2680_vm15 = vcmp.eq.f32.partialorder %v6258_v29, %v6343_v45  ;;  %v6348_v14 = vpop.xlane.xlu0 %2664 }
 0xd4b   : > { %vm2666_vm0 = vcmp.eq.f32.partialorder %v6261_v18, %v6348_v14  ;;  %v2681_v51 = vsel %vm2680_vm15, %v2676_v44, inf  ;;  %v2601_v18 = vcvt.f32.s32 %v6283_v37 }
 0xd4c   : > { %2682 = vmin.xlane.f32.xlu1 %v2681_v51  ;;  %v2667_v17 = vsel %vm2666_vm0, %v2662_v19, inf  ;;  %v2616_v51 = vshll.u32 %v2615_v27, 16 }
 0xd4d   : > { %v6352_v53 = vpop.xlane.xlu1 %2790  ;;  %2668 = vmin.xlane.f32.xlu0 %v2667_v17  ;;  %v2602_v1 = vshll.u32 %v2601_v18, 16  ;;  %v2741_v17 = vcvt.f32.s32 %v6313_v33 }
 0xd4e   : > { %vm2792_vm2 = vcmp.eq.f32.partialorder %v6274_v20, %v6352_v53  ;;  %v6356_v23 = vpop.xlane.xlu0 %2776 }
 0xd4f   : > { %vm2778_vm1 = vcmp.eq.f32.partialorder %v6276_v3, %v6356_v23  ;;  %v2793_v29 = vsel %vm2792_vm2, %v2788_v24, inf }
 0xd50   : > { %2794 = vmin.xlane.f32.xlu1 %v2793_v29  ;;  %v2779_v31 = vsel %vm2778_vm1, %v2774_v50, inf }
 0xd51   : > { %2780 = vmin.xlane.f32.xlu0 %v2779_v31 }
 0xdc1   : > { %v2599_v22 = vpop.xlane.xlu1 %2598 }
 0xdc2   : > { %v2600_v20 = vcvt.f32.s32 %v2599_v22  ;;  %v2585_v28 = vpop.xlane.xlu0 %2584  ;;  %v2643_v22 = vcvt.f32.s32 %v6328_v7 }
 0xdc3   : > { %v2586_v13 = vcvt.f32.s32 %v2585_v28 }
 0xdc4   : > { %v2603_v3 = vadd.s32 %v2602_v1, %v2600_v20 }
 0xdc5   : > { %v2589_v37 = vadd.s32 %v2588_v11, %v2586_v13  ;;  %v2711_v32 = vpop.xlane.xlu1 %2710  ;;  %v2658_v13 = vshll.u32 %v2657_v48, 16 }
 0xdc6   : > { %v6368_v61 = vsel %vm3203_vm4, %v6000_v6, %v2603_v3  ;;  %v2712_v44 = vcvt.f32.s32 %v2711_v32  ;;  %v2697_v30 = vpop.xlane.xlu0 %2696  ;;  %vm2801_vm3 = vcmp.eq.s32.totalorder %v3942_v26, %v2603_v3  ;;  %v2644_v3 = vshll.u32 %v2643_v22, 16 }
 0xdc7   : > { %v6373_v15 = vsel %vm3203_vm4, %v6005_v36, %v2589_v37  ;;  %v2698_v19 = vcvt.f32.s32 %v2697_v30  ;;  %v6376_v9 = vsel %vm2801_vm3, 1e+30, %v6008_v42  ;;  %vm2800_vm7 = vcmp.eq.s32.totalorder %v3942_v26, %v2589_v37 }
 0xdc8   : > { %v2715_v38 = vadd.s32 %v2714_v39, %v2712_v44  ;;  %2834 = vmin.xlane.f32.xlu1 %v6376_v9  ;;  %v6381_v6 = vsel %vm2800_vm7, 1e+30, %v6013_v56  ;;  %v2727_v36 = vcvt.f32.s32 %v6318_v41  ;;  %v2742_v41 = vshll.u32 %v2741_v17, 16 }
 0xdc9   : > { %v2701_v24 = vadd.s32 %v2700_v59, %v2698_v19  ;;  %v2627_v50 = vpop.xlane.xlu1 %2626  ;;  %2832 = vmin.xlane.f32.xlu0 %v6381_v6  ;;  %v2769_v39 = vcvt.f32.s32 %v6333_v63  ;;  %v2685_v30 = vcvt.f32.s32 %v6343_v45  ;;  %v2671_v19 = vcvt.f32.s32 %v6348_v14 }
 0xdca   : > { %v6388_v42 = vsel %vm3203_vm4, %v6020_v4, %v2715_v38  ;;  %v2628_v29 = vcvt.f32.s32 %v2627_v50  ;;  %v2613_v31 = vpop.xlane.xlu0 %2612  ;;  %vm2809_vm8 = vcmp.eq.s32.totalorder %v3942_v26, %v2715_v38  ;;  %v2728_v21 = vshll.u32 %v2727_v36, 16 }
 0xdcb   : > { %v6393_v56 = vsel %vm3203_vm4, %v6025_v35, %v2701_v24  ;;  %v2614_v18 = vcvt.f32.s32 %v2613_v31  ;;  %v6396_v33 = vsel %vm2809_vm8, 1e+30, %v6028_v57  ;;  %vm2808_vm9 = vcmp.eq.s32.totalorder %v3942_v26, %v2701_v24 }
 0xdcc   : > { %v2631_v25 = vadd.s32 %v2630_v43, %v2628_v29  ;;  %2850 = vmin.xlane.f32.xlu1 %v6396_v33  ;;  %v6401_v4 = vsel %vm2808_vm9, 1e+30, %v6033_v16  ;;  %v2686_v50 = vshll.u32 %v2685_v30, 16  ;;  %v2672_v36 = vshll.u32 %v2671_v19, 16  ;;  %v7016_v19 = vld [vmem:[#allocation19_spill] sm:$0xff] }
 0xdcd   : > { %v2617_v1 = vadd.s32 %v2616_v51, %v2614_v18  ;;  %v2739_v35 = vpop.xlane.xlu1 %2738  ;;  %2848 = vmin.xlane.f32.xlu0 %v6401_v4  ;;  %v2797_v29 = vcvt.f32.s32 %v6352_v53  ;;  %v7009_v53 = vld [vmem:[#allocation13_spill] sm:$0xff] }
 0xdce   : > { %v6408_v57 = vsel %vm3203_vm4, %v6040_v12, %v2631_v25  ;;  %v2740_v20 = vcvt.f32.s32 %v2739_v35  ;;  %v2725_v28 = vpop.xlane.xlu0 %2724  ;;  %vm2803_vm10 = vcmp.eq.s32.totalorder %v3942_v26, %v2631_v25 }
 0xdcf   : > { %v6413_v16 = vsel %vm3203_vm4, %v6045_v34, %v2617_v1  ;;  %v2726_v10 = vcvt.f32.s32 %v2725_v28  ;;  %v6416_v7 = vsel %vm2803_vm10, 1e+30, %v6048_v2  ;;  %vm2802_vm5 = vcmp.eq.s32.totalorder %v3942_v26, %v2617_v1 }
 0xdd0   : > { %v2743_v11 = vadd.s32 %v2742_v41, %v2740_v20  ;;  %2838 = vmin.xlane.f32.xlu1 %v6416_v7  ;;  %v6421_v12 = vsel %vm2802_vm5, 1e+30, %v6053_v40  ;;  %v2755_v34 = vcvt.f32.s32 %v6338_v54  ;;  %v2770_v54 = vshll.u32 %v2769_v39, 16 }
 0xdd1   : > { %v2729_v5 = vadd.s32 %v2728_v21, %v2726_v10  ;;  %v2655_v27 = vpop.xlane.xlu1 %2654  ;;  %2836 = vmin.xlane.f32.xlu0 %v6421_v12  ;;  %v2798_v35 = vshll.u32 %v2797_v29, 16 }
 0xdd2   : > { %v6428_v2 = vsel %vm3203_vm4, %v6060_v47, %v2743_v11  ;;  %v2656_v37 = vcvt.f32.s32 %v2655_v27  ;;  %v2641_v32 = vpop.xlane.xlu0 %2640  ;;  %vm2811_vm6 = vcmp.eq.s32.totalorder %v3942_v26, %v2743_v11  ;;  %v2756_v43 = vshll.u32 %v2755_v34, 16  ;;  %v7013_v27 = vld [vmem:[#allocation18_spill] sm:$0xff] }
 0xdd3   : > { %v6433_v40 = vsel %vm3203_vm4, %v6065_v55, %v2729_v5  ;;  %v2642_v59 = vcvt.f32.s32 %v2641_v32  ;;  %v6436_v63 = vsel %vm2811_vm6, 1e+30, %v6068_v60  ;;  %vm2810_vm11 = vcmp.eq.s32.totalorder %v3942_v26, %v2729_v5  ;;  %v7014_v32 = vld [vmem:[#allocation8_spill] sm:$0xff] }
 0xdd4   : > { %v2659_v44 = vadd.s32 %v2658_v13, %v2656_v37  ;;  %2854 = vmin.xlane.f32.xlu1 %v6436_v63  ;;  %v6441_v47 = vsel %vm2810_vm11, 1e+30, %v6073_v52 }
 0xdd5   : > { %v2645_v38 = vadd.s32 %v2644_v3, %v2642_v59  ;;  %v2767_v55 = vpop.xlane.xlu1 %2766  ;;  %2852 = vmin.xlane.f32.xlu0 %v6441_v47  ;;  %v7012_v3 = vld [vmem:[#allocation7_spill] sm:$0xff] }
 0xdd6   : > { %v6448_v60 = vsel %vm3203_vm4, %v6080_v62, %v2659_v44  ;;  %v2768_v51 = vcvt.f32.s32 %v2767_v55  ;;  %v2753_v17 = vpop.xlane.xlu0 %2752  ;;  %vm2805_vm12 = vcmp.eq.s32.totalorder %v3942_v26, %v2659_v44  ;;  %v7017_v55 = vld [vmem:[#allocation21_spill] sm:$0xff] }
 0xdd7   : > { %v6453_v52 = vsel %vm3203_vm4, %v6085_v0, %v2645_v38  ;;  %v2754_v45 = vcvt.f32.s32 %v2753_v17  ;;  %v6456_v14 = vsel %vm2805_vm12, 1e+30, %v6088_v8  ;;  %vm2804_vm13 = vcmp.eq.s32.totalorder %v3942_v26, %v2645_v38 }
 0xdd8   : > { %v2771_v24 = vadd.s32 %v2770_v54, %v2768_v51  ;;  %2842 = vmin.xlane.f32.xlu1 %v6456_v14  ;;  %v6461_v62 = vsel %vm2804_vm13, 1e+30, %v6093_v46  ;;  %v2783_v0 = vcvt.f32.s32 %v6356_v23  ;;  %v7010_v23 = vld [vmem:[#allocation15_spill] sm:$0xff]  ;;  %v7015_v54 = vld [vmem:[#allocation17_spill] sm:$0xff]  ;;  %v7018_v51 = vld [vmem:[#allocation20_spill] sm:$0xff] }
 0xdd9   : > { %v2757_v31 = vadd.s32 %v2756_v43, %v2754_v45  ;;  %v2683_v18 = vpop.xlane.xlu1 %2682  ;;  %2840 = vmin.xlane.f32.xlu0 %v6461_v62 }
 0xdda   : > { %v6468_v8 = vsel %vm3203_vm4, %v6100_v49, %v2771_v24  ;;  %v2684_v25 = vcvt.f32.s32 %v2683_v18  ;;  %v2669_v41 = vpop.xlane.xlu0 %2668  ;;  %vm2813_vm14 = vcmp.eq.s32.totalorder %v3942_v26, %v2771_v24  ;;  %v2784_v28 = vshll.u32 %v2783_v0, 16 }
 0xddb   : > { %v6473_v46 = vsel %vm3203_vm4, %v6105_v58, %v2757_v31  ;;  %v2670_v48 = vcvt.f32.s32 %v2669_v41  ;;  %v6476_v22 = vsel %vm2813_vm14, 1e+30, %v7009_v53  ;;  %vm2812_vm15 = vcmp.eq.s32.totalorder %v3942_v26, %v2757_v31  ;;  %v7011_v58 = vld [vmem:[#allocation16_spill] sm:$0xff] }
 0xddc   : > { %v2687_v1 = vadd.s32 %v2686_v50, %v2684_v25  ;;  %2858 = vmin.xlane.f32.xlu1 %v6476_v22  ;;  %v6481_v49 = vsel %vm2812_vm15, 1e+30, %v7010_v23 }
 0xddd   : > { %v2673_v21 = vadd.s32 %v2672_v36, %v2670_v48  ;;  %v2795_v20 = vpop.xlane.xlu1 %2794  ;;  %2856 = vmin.xlane.f32.xlu0 %v6481_v49 }
 0xdde   : > { %v6486_v10 = vsel %vm3203_vm4, %v7011_v58, %v2687_v1  ;;  %v2796_v11 = vcvt.f32.s32 %v2795_v20  ;;  %v2781_v13 = vpop.xlane.xlu0 %2780  ;;  %vm2807_vm0 = vcmp.eq.s32.totalorder %v3942_v26, %v2687_v1 }
 0xddf   : > { %v6491_v39 = vsel %vm3203_vm4, %v7012_v3, %v2673_v21  ;;  %v2782_v5 = vcvt.f32.s32 %v2781_v13  ;;  %v6494_v34 = vsel %vm2807_vm0, 1e+30, %v7013_v27  ;;  %vm2806_vm2 = vcmp.eq.s32.totalorder %v3942_v26, %v2673_v21 }
 0xde0   : > { %v2799_v37 = vadd.s32 %v2798_v35, %v2796_v11  ;;  %2846 = vmin.xlane.f32.xlu1 %v6494_v34  ;;  %v6499_v59 = vsel %vm2806_vm2, 1e+30, %v7014_v32 }
 0xde1   : > { %v2785_v44 = vadd.s32 %v2784_v28, %v2782_v5  ;;  %2844 = vmin.xlane.f32.xlu0 %v6499_v59 }
 0xde2   : > { %v6504_v30 = vsel %vm3203_vm4, %v7015_v54, %v2799_v37  ;;  %vm2815_vm1 = vcmp.eq.s32.totalorder %v3942_v26, %v2799_v37 }
 0xde3   : > { %v6509_v38 = vsel %vm3203_vm4, %v7016_v19, %v2785_v44  ;;  %v6512_v43 = vsel %vm2815_vm1, 1e+30, %v7017_v55  ;;  %vm2814_vm3 = vcmp.eq.s32.totalorder %v3942_v26, %v2785_v44 }
 0xde4   : > { %2862 = vmin.xlane.f32.xlu1 %v6512_v43  ;;  %v6517_v17 = vsel %vm2814_vm3, 1e+30, %v7018_v51 }
 0xde5   : > { %2860 = vmin.xlane.f32.xlu0 %v6517_v17 }
 0xe55   : > { %v2835_v45 = vpop.xlane.xlu1 %2834 }
 0xe56   : > { %vm2865_vm7 = vcmp.le.f32.partialorder %v6376_v9, %v2835_v45  ;;  %v2833_v24 = vpop.xlane.xlu0 %2832 }
 0xe57   : > { %v6522_v50 = vsel %vm2865_vm7, %v3942_v26, 128  ;;  %vm2864_vm4 = vcmp.le.f32.partialorder %v6381_v6, %v2833_v24 }
 0xe58   : > { %v2911_v36 = vshra.s32 %v6522_v50, 16  ;;  %v6527_v29 = vsel %vm2864_vm4, %v3942_v26, 128 }
 0xe59   : > { %v2897_v31 = vshra.s32 %v6527_v29, 16  ;;  %v2851_v18 = vpop.xlane.xlu1 %2850 }
 0xe5a   : > { %v6530_v0 = vcvt.s32.f32 %v2911_v36  ;;  %vm2873_vm8 = vcmp.le.f32.partialorder %v6396_v33, %v2851_v18  ;;  %v2849_v25 = vpop.xlane.xlu0 %2848 }
 0xe5b   : > { %v6533_v9 = vcvt.s32.f32 %v2897_v31  ;;  %v6536_v41 = vsel %vm2873_vm8, %v3942_v26, 128  ;;  %vm2872_vm9 = vcmp.le.f32.partialorder %v6401_v4, %v2849_v25 }
 0xe5c   : > { %v3023_v6 = vshra.s32 %v6536_v41, 16  ;;  %v6541_v48 = vsel %vm2872_vm9, %v3942_v26, 128  ;;  %2914 = vmin.xlane.f32.xlu1 %v6530_v0 }
 0xe5d   : > { %v3009_v53 = vshra.s32 %v6541_v48, 16  ;;  %v2839_v1 = vpop.xlane.xlu1 %2838  ;;  %2900 = vmin.xlane.f32.xlu0 %v6533_v9 }
 0xe5e   : > { %v6546_v33 = vcvt.s32.f32 %v3023_v6  ;;  %vm2867_vm10 = vcmp.le.f32.partialorder %v6416_v7, %v2839_v1  ;;  %v2837_v23 = vpop.xlane.xlu0 %2836 }
 0xe5f   : > { %v6549_v35 = vcvt.s32.f32 %v3009_v53  ;;  %v6552_v4 = vsel %vm2867_vm10, %v3942_v26, 128  ;;  %vm2866_vm5 = vcmp.le.f32.partialorder %v6421_v12, %v2837_v23 }
 0xe60   : > { %v2939_v21 = vshra.s32 %v6552_v4, 16  ;;  %v6557_v20 = vsel %vm2866_vm5, %v3942_v26, 128  ;;  %3026 = vmin.xlane.f32.xlu1 %v6546_v33 }
 0xe61   : > { %v2925_v28 = vshra.s32 %v6557_v20, 16  ;;  %v2855_v58 = vpop.xlane.xlu1 %2854  ;;  %3012 = vmin.xlane.f32.xlu0 %v6549_v35 }
 0xe62   : > { %v6562_v7 = vcvt.s32.f32 %v2939_v21  ;;  %vm2875_vm6 = vcmp.le.f32.partialorder %v6436_v63, %v2855_v58  ;;  %v2853_v11 = vpop.xlane.xlu0 %2852 }
 0xe63   : > { %v6565_v13 = vcvt.s32.f32 %v2925_v28  ;;  %v6568_v12 = vsel %vm2875_vm6, %v3942_v26, 128  ;;  %vm2874_vm11 = vcmp.le.f32.partialorder %v6441_v47, %v2853_v11 }
 0xe64   : > { %v3051_v3 = vshra.s32 %v6568_v12, 16  ;;  %v6573_v5 = vsel %vm2874_vm11, %v3942_v26, 128  ;;  %2942 = vmin.xlane.f32.xlu1 %v6562_v7 }
 0xe65   : > { %v3037_v27 = vshra.s32 %v6573_v5, 16  ;;  %v2843_v37 = vpop.xlane.xlu1 %2842  ;;  %2928 = vmin.xlane.f32.xlu0 %v6565_v13 }
 0xe66   : > { %v6578_v63 = vcvt.s32.f32 %v3051_v3  ;;  %vm2869_vm12 = vcmp.le.f32.partialorder %v6456_v14, %v2843_v37  ;;  %v2841_v32 = vpop.xlane.xlu0 %2840 }
 0xe67   : > { %v6581_v44 = vcvt.s32.f32 %v3037_v27  ;;  %v6584_v47 = vsel %vm2869_vm12, %v3942_v26, 128  ;;  %vm2868_vm13 = vcmp.le.f32.partialorder %v6461_v62, %v2841_v32 }
 0xe68   : > { %v2967_v54 = vshra.s32 %v6584_v47, 16  ;;  %v6589_v19 = vsel %vm2868_vm13, %v3942_v26, 128  ;;  %3054 = vmin.xlane.f32.xlu1 %v6578_v63 }
 0xe69   : > { %v2953_v55 = vshra.s32 %v6589_v19, 16  ;;  %v2859_v51 = vpop.xlane.xlu1 %2858  ;;  %3040 = vmin.xlane.f32.xlu0 %v6581_v44 }
 0xe6a   : > { %v6594_v14 = vcvt.s32.f32 %v2967_v54  ;;  %vm2877_vm14 = vcmp.le.f32.partialorder %v6476_v22, %v2859_v51  ;;  %v2857_v45 = vpop.xlane.xlu0 %2856  ;;  %v2896_v54 = vand.u32 65535, %v6527_v29 }
 0xe6b   : > { %v6597_v24 = vcvt.s32.f32 %v2953_v55  ;;  %v6600_v62 = vsel %vm2877_vm14, %v3942_v26, 128  ;;  %vm2876_vm15 = vcmp.le.f32.partialorder %v6481_v49, %v2857_v45  ;;  %v3022_v55 = vand.u32 65535, %v6536_v41 }
 0xe6c   : > { %v3079_v36 = vshra.s32 %v6600_v62, 16  ;;  %v6605_v31 = vsel %vm2876_vm15, %v3942_v26, 128  ;;  %2970 = vmin.xlane.f32.xlu1 %v6594_v14  ;;  %v2898_v45 = vcvt.s32.f32 %v2896_v54 }
 0xe6d   : > { %v3065_v18 = vshra.s32 %v6605_v31, 16  ;;  %v2847_v25 = vpop.xlane.xlu1 %2846  ;;  %2956 = vmin.xlane.f32.xlu0 %v6597_v24  ;;  %v3024_v29 = vcvt.s32.f32 %v3022_v55 }
 0xe6e   : > { %v6610_v22 = vcvt.s32.f32 %v3079_v36  ;;  %vm2871_vm0 = vcmp.le.f32.partialorder %v6494_v34, %v2847_v25  ;;  %v2845_v6 = vpop.xlane.xlu0 %2844  ;;  %v3008_v36 = vand.u32 65535, %v6541_v48  ;;  %v2924_v48 = vand.u32 65535, %v6557_v20 }
 0xe6f   : > { %v6613_v53 = vcvt.s32.f32 %v3065_v18  ;;  %v6616_v49 = vsel %vm2871_vm0, %v3942_v26, 128  ;;  %vm2870_vm2 = vcmp.le.f32.partialorder %v6499_v59, %v2845_v6  ;;  %v2938_v6 = vand.u32 65535, %v6552_v4 }
 0xe70   : > { %v2995_v1 = vshra.s32 %v6616_v49, 16  ;;  %v6621_v23 = vsel %vm2870_vm2, %v3942_v26, 128  ;;  %3082 = vmin.xlane.f32.xlu1 %v6610_v22  ;;  %v3050_v4 = vand.u32 65535, %v6568_v12  ;;  %v3036_v20 = vand.u32 65535, %v6573_v5 }
 0xe71   : > { %v2981_v21 = vshra.s32 %v6621_v23, 16  ;;  %v2863_v28 = vpop.xlane.xlu1 %2862  ;;  %3068 = vmin.xlane.f32.xlu0 %v6613_v53  ;;  %v2966_v12 = vand.u32 65535, %v6584_v47  ;;  %v2952_v5 = vand.u32 65535, %v6589_v19  ;;  %v3078_v47 = vand.u32 65535, %v6600_v62 }
 0xe72   : > { %v6626_v34 = vcvt.s32.f32 %v2995_v1  ;;  %vm2879_vm1 = vcmp.le.f32.partialorder %v6512_v43, %v2863_v28  ;;  %v2861_v58 = vpop.xlane.xlu0 %2860  ;;  %v3010_v1 = vcvt.s32.f32 %v3008_v36  ;;  %v2940_v28 = vcvt.s32.f32 %v2938_v6 }
 0xe73   : > { %v6629_v11 = vcvt.s32.f32 %v2981_v21  ;;  %v6632_v59 = vsel %vm2879_vm1, %v3942_v26, 128  ;;  %vm2878_vm3 = vcmp.le.f32.partialorder %v6517_v17, %v2861_v58  ;;  %v2910_v17 = vand.u32 65535, %v6522_v50 }
 0xe74   : > { %v3107_v3 = vshra.s32 %v6632_v59, 16  ;;  %v6637_v27 = vsel %vm2878_vm3, %v3942_v26, 128  ;;  %2998 = vmin.xlane.f32.xlu1 %v6626_v34  ;;  %v3064_v19 = vand.u32 65535, %v6605_v31  ;;  %v2994_v62 = vand.u32 65535, %v6616_v49 }
 0xe75   : > { %v3093_v37 = vshra.s32 %v6637_v27, 16  ;;  %2984 = vmin.xlane.f32.xlu0 %v6629_v11  ;;  %v2912_v26 = vcvt.s32.f32 %v2910_v17  ;;  %v3052_v17 = vcvt.s32.f32 %v3050_v4  ;;  %v2980_v31 = vand.u32 65535, %v6621_v23 }
 0xe76   : > { %v6642_v43 = vcvt.s32.f32 %v3107_v3  ;;  %v2926_v3 = vcvt.s32.f32 %v2924_v48  ;;  %v3106_v49 = vand.u32 65535, %v6632_v59  ;;  %v3092_v23 = vand.u32 65535, %v6637_v27 }
 0xe77   : > { %v6644_v32 = vcvt.s32.f32 %v3093_v37 }
 0xe78   : > { %3110 = vmin.xlane.f32.xlu1 %v6642_v43  ;;  %v3094_v59 = vcvt.s32.f32 %v3092_v23 }
 0xe79   : > { %3096 = vmin.xlane.f32.xlu0 %v6644_v32 }
 0xee9   : > { %v6651_v51 = vpop.xlane.xlu1 %2914 }
 0xeea   : > { %vm2916_vm7 = vcmp.eq.f32.partialorder %v6530_v0, %v6651_v51  ;;  %v6656_v18 = vpop.xlane.xlu0 %2900 }
 0xeeb   : > { %vm2902_vm4 = vcmp.eq.f32.partialorder %v6533_v9, %v6656_v18  ;;  %v2917_v25 = vsel %vm2916_vm7, %v2912_v26, inf  ;;  %v3038_v26 = vcvt.s32.f32 %v3036_v20  ;;  %vm3220_vm7 = vcmask 56320  }
 0xeec   : > { %2918 = vmin.xlane.f32.xlu1 %v2917_v25  ;;  %v2903_v50 = vsel %vm2902_vm4, %v2898_v45, inf  ;;  %v2968_v45 = vcvt.s32.f32 %v2966_v12  ;;  %v2954_v25 = vcvt.s32.f32 %v2952_v5  ;;  %vm3237_vm4 = vcmask 64512  }
 0xeed   : > { %v6661_v41 = vpop.xlane.xlu1 %3026  ;;  %2904 = vmin.xlane.f32.xlu0 %v2903_v50 }
 0xeee   : > { %vm3028_vm8 = vcmp.eq.f32.partialorder %v6546_v33, %v6661_v41  ;;  %v6666_v0 = vpop.xlane.xlu0 %3012 }
 0xeef   : > { %vm3014_vm9 = vcmp.eq.f32.partialorder %v6549_v35, %v6666_v0  ;;  %v3029_v9 = vsel %vm3028_vm8, %v3024_v29, inf  ;;  %v3080_v29 = vcvt.s32.f32 %v3078_v47 }
 0xef0   : > { %3030 = vmin.xlane.f32.xlu1 %v3029_v9  ;;  %v3015_v21 = vsel %vm3014_vm9, %v3010_v1, inf  ;;  %v3066_v1 = vcvt.s32.f32 %v3064_v19  ;;  %v2996_v9 = vcvt.s32.f32 %v2994_v62 }
 0xef1   : > { %v6671_v58 = vpop.xlane.xlu1 %2942  ;;  %3016 = vmin.xlane.f32.xlu0 %v3015_v21 }
 0xef2   : > { %vm2944_vm10 = vcmp.eq.f32.partialorder %v6562_v7, %v6671_v58  ;;  %v6676_v33 = vpop.xlane.xlu0 %2928 }
 0xef3   : > { %vm2930_vm5 = vcmp.eq.f32.partialorder %v6565_v13, %v6676_v33  ;;  %v2945_v35 = vsel %vm2944_vm10, %v2940_v28, inf  ;;  %v2982_v28 = vcvt.s32.f32 %v2980_v31 }
 0xef4   : > { %2946 = vmin.xlane.f32.xlu1 %v2945_v35  ;;  %v2931_v37 = vsel %vm2930_vm5, %v2926_v3, inf  ;;  %v3108_v3 = vcvt.s32.f32 %v3106_v49  ;;  %v2921_v35 = vcvt.f32.s32 %v6651_v51 }
 0xef5   : > { %v6681_v54 = vpop.xlane.xlu1 %3054  ;;  %2932 = vmin.xlane.f32.xlu0 %v2931_v37  ;;  %v2907_v37 = vcvt.f32.s32 %v6656_v18 }
 0xef6   : > { %vm3056_vm6 = vcmp.eq.f32.partialorder %v6578_v63, %v6681_v54  ;;  %v6686_v7 = vpop.xlane.xlu0 %3040  ;;  %v2922_v12 = vshll.u32 %v2921_v35, 16 }
 0xef7   : > { %vm3042_vm11 = vcmp.eq.f32.partialorder %v6581_v44, %v6686_v7  ;;  %v3057_v13 = vsel %vm3056_vm6, %v3052_v17, inf }
 0xef8   : > { %3058 = vmin.xlane.f32.xlu1 %v3057_v13  ;;  %v3043_v55 = vsel %vm3042_vm11, %v3038_v26, inf  ;;  %v3033_v26 = vcvt.f32.s32 %v6661_v41  ;;  %v2908_v13 = vshll.u32 %v2907_v37, 16  ;;  %v2949_v41 = vcvt.f32.s32 %v6671_v58 }
 0xef9   : > { %v6691_v36 = vpop.xlane.xlu1 %2970  ;;  %3044 = vmin.xlane.f32.xlu0 %v3043_v55  ;;  %v3019_v55 = vcvt.f32.s32 %v6666_v0 }
 0xefa   : > { %vm2972_vm12 = vcmp.eq.f32.partialorder %v6594_v14, %v6691_v36  ;;  %v6696_v63 = vpop.xlane.xlu0 %2956  ;;  %v3034_v47 = vshll.u32 %v3033_v26, 16 }
 0xefb   : > { %vm2958_vm13 = vcmp.eq.f32.partialorder %v6597_v24, %v6696_v63  ;;  %v2973_v44 = vsel %vm2972_vm12, %v2968_v45, inf  ;;  %v2963_v35 = vcvt.f32.s32 %v6696_v63 }
 0xefc   : > { %2974 = vmin.xlane.f32.xlu1 %v2973_v44  ;;  %v2959_v50 = vsel %vm2958_vm13, %v2954_v25, inf  ;;  %v3020_v44 = vshll.u32 %v3019_v55, 16 }
 0xefd   : > { %v6701_v6 = vpop.xlane.xlu1 %3082  ;;  %2960 = vmin.xlane.f32.xlu0 %v2959_v50  ;;  %v2935_v50 = vcvt.f32.s32 %v6676_v33 }
 0xefe   : > { %vm3084_vm14 = vcmp.eq.f32.partialorder %v6610_v22, %v6701_v6  ;;  %v6706_v14 = vpop.xlane.xlu0 %3068 }
 0xeff   : > { %vm3070_vm15 = vcmp.eq.f32.partialorder %v6613_v53, %v6706_v14  ;;  %v3085_v24 = vsel %vm3084_vm14, %v3080_v29, inf  ;;  %v2936_v49 = vshll.u32 %v2935_v50, 16  ;;  %v3075_v55 = vcvt.f32.s32 %v6706_v14 }
 0xf00   : > { %3086 = vmin.xlane.f32.xlu1 %v3085_v24  ;;  %v3071_v48 = vsel %vm3070_vm15, %v3066_v1, inf  ;;  %v2950_v24 = vshll.u32 %v2949_v41, 16 }
 0xf01   : > { %v6711_v21 = vpop.xlane.xlu1 %2998  ;;  %3072 = vmin.xlane.f32.xlu0 %v3071_v48 }
 0xf02   : > { %vm3000_vm0 = vcmp.eq.f32.partialorder %v6626_v34, %v6711_v21  ;;  %v6716_v22 = vpop.xlane.xlu0 %2984 }
 0xf03   : > { %vm2986_vm2 = vcmp.eq.f32.partialorder %v6629_v11, %v6716_v22  ;;  %v3001_v53 = vsel %vm3000_vm0, %v2996_v9, inf }
 0xf04   : > { %3002 = vmin.xlane.f32.xlu1 %v3001_v53  ;;  %v2987_v4 = vsel %vm2986_vm2, %v2982_v28, inf  ;;  %v3047_v28 = vcvt.f32.s32 %v6686_v7 }
 0xf05   : > { %v6720_v20 = vpop.xlane.xlu1 %3110  ;;  %2988 = vmin.xlane.f32.xlu0 %v2987_v4 }
 0xf06   : > { %vm3112_vm1 = vcmp.eq.f32.partialorder %v6642_v43, %v6720_v20  ;;  %v6724_v27 = vpop.xlane.xlu0 %3096 }
 0xf07   : > { %vm3098_vm3 = vcmp.eq.f32.partialorder %v6644_v32, %v6724_v27  ;;  %v3113_v34 = vsel %vm3112_vm1, %v3108_v3, inf }
 0xf08   : > { %3114 = vmin.xlane.f32.xlu1 %v3113_v34  ;;  %v3099_v11 = vsel %vm3098_vm3, %v3094_v59, inf }
 0xf09   : > { %3100 = vmin.xlane.f32.xlu0 %v3099_v11  ;;  %v3048_v11 = vshll.u32 %v3047_v28, 16 }
 0xf79   : > { %v2919_v17 = vpop.xlane.xlu1 %2918 }
 0xf7a   : > { %v2920_v5 = vcvt.f32.s32 %v2919_v17  ;;  %v2905_v43 = vpop.xlane.xlu0 %2904 }
 0xf7b   : > { %v2906_v32 = vcvt.f32.s32 %v2905_v43 }
 0xf7c   : > { %v2923_v51 = vadd.s32 %v2922_v12, %v2920_v5 }
 0xf7d   : > { %v2909_v18 = vadd.s32 %v2908_v13, %v2906_v32  ;;  %v3031_v45 = vpop.xlane.xlu1 %3030  ;;  %v2964_v13 = vshll.u32 %v2963_v35, 16 }
 0xf7e   : > { %v3222_v25 = vsel %vm3220_vm7, %v6368_v61, %v2923_v51  ;;  %v3032_v0 = vcvt.f32.s32 %v3031_v45  ;;  %v3017_v19 = vpop.xlane.xlu0 %3016  ;;  %v3061_v61 = vcvt.f32.s32 %v6681_v54 }
 0xf7f   : > { %3239 = vst.msk [vmem:[%s6736_s22 + $0x8] sm:$0xff] %vm3237_vm4, %v3222_v25  ;;  %v3221_v29 = vsel %vm3220_vm7, %v6373_v15, %v2909_v18  ;;  %v3018_v62 = vcvt.f32.s32 %v3017_v19  ;;  %v3076_v25 = vshll.u32 %v3075_v55, 16 }
 0xf80   : > { %3238 = vst.msk [vmem:[%s6736_s22] sm:$0xff] %vm3237_vm4, %v3221_v29  ;;  %v3035_v1 = vadd.s32 %v3034_v47, %v3032_v0  ;;  %v3062_v3 = vshll.u32 %v3061_v61, 16  ;;  %v2991_v0 = vcvt.f32.s32 %v6716_v22 }
 0xf81   : > { %v3021_v58 = vadd.s32 %v3020_v44, %v3018_v62  ;;  %v2947_v31 = vpop.xlane.xlu1 %2946 }
 0xf82   : > { %v3230_v48 = vsel %vm3220_vm7, %v6388_v42, %v3035_v1  ;;  %v2948_v9 = vcvt.f32.s32 %v2947_v31  ;;  %v2933_v33 = vpop.xlane.xlu0 %2932  ;;  %v2977_v42 = vcvt.f32.s32 %v6691_v36  ;;  %v3103_v31 = vcvt.f32.s32 %v6724_v27 }
 0xf83   : > { %3247 = vst.msk [vmem:[%s6736_s22 + $0x48] sm:$0xff] %vm3237_vm4, %v3230_v48  ;;  %v3229_v15 = vsel %vm3220_vm7, %v6393_v56, %v3021_v58  ;;  %v2934_v23 = vcvt.f32.s32 %v2933_v33  ;;  %v2992_v58 = vshll.u32 %v2991_v0, 16 }
 0xf84   : > { %3246 = vst.msk [vmem:[%s6736_s22 + $0x40] sm:$0xff] %vm3237_vm4, %v3229_v15  ;;  %v2951_v53 = vadd.s32 %v2950_v24, %v2948_v9  ;;  %v2978_v26 = vshll.u32 %v2977_v42, 16 }
 0xf85   : > { %v2937_v54 = vadd.s32 %v2936_v49, %v2934_v23  ;;  %v3059_v4 = vpop.xlane.xlu1 %3058  ;;  %v3104_v49 = vshll.u32 %v3103_v31, 16 }
 0xf86   : > { %v3224_v59 = vsel %vm3220_vm7, %v6408_v57, %v2951_v53  ;;  %v3060_v34 = vcvt.f32.s32 %v3059_v4  ;;  %v3045_v7 = vpop.xlane.xlu0 %3044  ;;  %v3089_v57 = vcvt.f32.s32 %v6701_v6 }
 0xf87   : > { %3241 = vst.msk [vmem:[%s6736_s22 + $0x18] sm:$0xff] %vm3237_vm4, %v3224_v59  ;;  %v3223_v56 = vsel %vm3220_vm7, %v6413_v16, %v2937_v54  ;;  %v3046_v37 = vcvt.f32.s32 %v3045_v7 }
 0xf88   : > { %3240 = vst.msk [vmem:[%s6736_s22 + $0x10] sm:$0xff] %vm3237_vm4, %v3223_v56  ;;  %v3063_v17 = vadd.s32 %v3062_v3, %v3060_v34  ;;  %v3090_v45 = vshll.u32 %v3089_v57, 16 }
 0xf89   : > { %v3049_v36 = vadd.s32 %v3048_v11, %v3046_v37  ;;  %v2975_v12 = vpop.xlane.xlu1 %2974 }
 0xf8a   : > { %v3232_v5 = vsel %vm3220_vm7, %v6428_v2, %v3063_v17  ;;  %v2976_v43 = vcvt.f32.s32 %v2975_v12  ;;  %v2961_v63 = vpop.xlane.xlu0 %2960  ;;  %v3005_v2 = vcvt.f32.s32 %v6711_v21 }
 0xf8b   : > { %3249 = vst.msk [vmem:[%s6736_s22 + $0x58] sm:$0xff] %vm3237_vm4, %v3232_v5  ;;  %v3231_v16 = vsel %vm3220_vm7, %v6433_v40, %v3049_v36  ;;  %v2962_v32 = vcvt.f32.s32 %v2961_v63 }
 0xf8c   : > { %3248 = vst.msk [vmem:[%s6736_s22 + $0x50] sm:$0xff] %vm3237_vm4, %v3231_v16  ;;  %v2979_v51 = vadd.s32 %v2978_v26, %v2976_v43  ;;  %v3006_v29 = vshll.u32 %v3005_v2, 16 }
 0xf8d   : > { %v2965_v6 = vadd.s32 %v2964_v13, %v2962_v32  ;;  %v3087_v18 = vpop.xlane.xlu1 %3086 }
 0xf8e   : > { %v3226_v47 = vsel %vm3220_vm7, %v6448_v60, %v2979_v51  ;;  %v3088_v41 = vcvt.f32.s32 %v3087_v18  ;;  %v3073_v14 = vpop.xlane.xlu0 %3072  ;;  %v3117_v60 = vcvt.f32.s32 %v6720_v20 }
 0xf8f   : > { %3243 = vst.msk [vmem:[%s6736_s22 + $0x28] sm:$0xff] %vm3237_vm4, %v3226_v47  ;;  %v3225_v40 = vsel %vm3220_vm7, %v6453_v52, %v2965_v6  ;;  %v3074_v19 = vcvt.f32.s32 %v3073_v14 }
 0xf90   : > { %3242 = vst.msk [vmem:[%s6736_s22 + $0x20] sm:$0xff] %vm3237_vm4, %v3225_v40  ;;  %v3091_v44 = vadd.s32 %v3090_v45, %v3088_v41  ;;  %v3118_v48 = vshll.u32 %v3117_v60, 16 }
 0xf91   : > { %v3077_v21 = vadd.s32 %v3076_v25, %v3074_v19  ;;  %v3003_v50 = vpop.xlane.xlu1 %3002 }
 0xf92   : > { %v3234_v62 = vsel %vm3220_vm7, %v6468_v8, %v3091_v44  ;;  %v3004_v1 = vcvt.f32.s32 %v3003_v50  ;;  %v2989_v22 = vpop.xlane.xlu0 %2988 }
 0xf93   : > { %3251 = vst.msk [vmem:[%s6736_s22 + $0x68] sm:$0xff] %vm3237_vm4, %v3234_v62  ;;  %v3233_v52 = vsel %vm3220_vm7, %v6473_v46, %v3077_v21  ;;  %v2990_v24 = vcvt.f32.s32 %v2989_v22 }
 0xf94   : > { %3250 = vst.msk [vmem:[%s6736_s22 + $0x60] sm:$0xff] %vm3237_vm4, %v3233_v52  ;;  %v3007_v20 = vadd.s32 %v3006_v29, %v3004_v1 }
 0xf95   : > { %v2993_v61 = vadd.s32 %v2992_v58, %v2990_v24  ;;  %v3115_v8 = vpop.xlane.xlu1 %3114 }
 0xf96   : > { %v3228_v9 = vsel %vm3220_vm7, %v6486_v10, %v3007_v20  ;;  %v3116_v33 = vcvt.f32.s32 %v3115_v8  ;;  %v3101_v27 = vpop.xlane.xlu0 %3100 }
 0xf97   : > { %3245 = vst.msk [vmem:[%s6736_s22 + $0x38] sm:$0xff] %vm3237_vm4, %v3228_v9  ;;  %v3227_v46 = vsel %vm3220_vm7, %v6491_v39, %v2993_v61  ;;  %v3102_v28 = vcvt.f32.s32 %v3101_v27 }
 0xf98   : > { %3244 = vst.msk [vmem:[%s6736_s22 + $0x30] sm:$0xff] %vm3237_vm4, %v3227_v46  ;;  %v3119_v15 = vadd.s32 %v3118_v48, %v3116_v33 }
 0xf99   : > { %v3105_v23 = vadd.s32 %v3104_v49, %v3102_v28 }
 0xf9a   : > { %v3236_v53 = vsel %vm3220_vm7, %v6504_v30, %v3119_v15 }
 0xf9b   : > { %3253 = vst.msk [vmem:[%s6736_s22 + $0x78] sm:$0xff] %vm3237_vm4, %v3236_v53  ;;  %v3235_v10 = vsel %vm3220_vm7, %v6509_v38, %v3105_v23 }
 0xf9c   : > { %3252 = vst.msk [vmem:[%s6736_s22 + $0x70] sm:$0xff] %vm3237_vm4, %v3235_v10 }
 0xf9d PF: > { %s12_s11 = sadd.s32 1, %s3599_s11   ;;  %s7019_s9 = smov %s3595_s10 }
 0xf9e   : > { %p9_p5 = scmp.ge.s32.totalorder %s12_s11, 4   ;;  %s7020_s10 = smov %s7022_s12 }
 0xfa0   :  { %11 = sbr.rel (!%p9_p5) target bundleno = 2 (0x2), region = 61 }

</bundles_post_ra>
